<compile_context>
chip_gen: v7x
topology: tpu7x:2x2x1
jax: 0.10.0
libtpu: 0.0.40
codegen_flags: <defaults>
</compile_context>

<pallas_src>
import functools

import jax
import jax.numpy as jnp
from jax.experimental import pallas as pl
from jax.experimental.pallas import tpu as pltpu

Z_SIZE = 128
Y_DIM = 4            # task_gen.y_dim
Y_PAD = 128          # lane-dense padded width of the final logits block
H_ENC = 256          # encoder hidden width
H_G1 = 512           # g_theta hidden
H_G2 = 256           # g_theta out
H_F = 256            # f_phi hidden


# ---------------------------------------------------------------------------
# Single fused forward kernel (everything VMEM resident, no grid).
# ---------------------------------------------------------------------------
def _fused_forward_kernel(
    # inputs
    x_ref,
    enc_w1_ref, enc_w2_ref, enc_w3_ref,
    g_w1a_ref, g_w1b_ref,
    g_w2_hbm, f_w_hbm, y_w_hbm,          # memory_space=pl.ANY (manual DMA)
    vecs_ref,                            # packed small f32 vectors, (16, 512)
    # output
    o_ref,                               # (B_pad, 128) f32, lane/sublane dense
    # scratch
    g_w2_vmem, f_w_vmem, y_w_vmem, dma_sem,
    *, B, T, use_bf16,
):
    f32 = jnp.float32
    mm = jnp.bfloat16 if use_bf16 else jnp.float32

    # ---- Kick off late-stage weight DMAs; encoder compute hides them. ----
    cp_g2 = pltpu.make_async_copy(g_w2_hbm, g_w2_vmem, dma_sem.at[0])
    cp_f = pltpu.make_async_copy(f_w_hbm, f_w_vmem, dma_sem.at[1])
    cp_y = pltpu.make_async_copy(y_w_hbm, y_w_vmem, dma_sem.at[2])
    cp_g2.start()
    cp_f.start()
    cp_y.start()

    # ---- Unpack the small per-layer vectors (static slices, f32). ----
    enc_b1 = vecs_ref[0:1, :H_ENC]
    enc_b2 = vecs_ref[1:2, :H_ENC]
    enc_b3 = vecs_ref[2:3, :Z_SIZE]
    gamma = vecs_ref[3:4, :Z_SIZE]
    beta = vecs_ref[4:5, :Z_SIZE]
    g_w1a_tag = vecs_ref[5:6, :H_G1]
    g_w1b_tag = vecs_ref[6:7, :H_G1]
    g_b1 = vecs_ref[7:8, :H_G1]
    g_b2 = vecs_ref[8:9, :H_G2]
    f_b = vecs_ref[9:10, :H_F]
    y_b = vecs_ref[10:11, :Y_PAD]

    def dot(a, w):
        # bf16 (or f32) MXU inputs, f32 accumulation.
        return jnp.dot(a.astype(mm), w, preferred_element_type=f32)

    # ---- Encoder MLP, all B*T frames batched (M = B*T). ----
    x = x_ref[...]                                                 # (B*T, CHW)
    h = jnp.maximum(dot(x, enc_w1_ref[...]) + enc_b1, 0.0)
    h = jnp.maximum(dot(h, enc_w2_ref[...]) + enc_b2, 0.0)
    z = jnp.maximum(dot(h, enc_w3_ref[...]) + enc_b3, 0.0)         # (B*T, 128)

    # ---- Context norm over the sequence axis (torch.var unbiased), f32. ----
    z3 = z.reshape(B, T, Z_SIZE)
    mu = jnp.mean(z3, axis=1, keepdims=True)
    var = jnp.sum((z3 - mu) ** 2, axis=1, keepdims=True) / (T - 1)
    zn = ((z3 - mu) / jnp.sqrt(var + 1e-8)).reshape(B * T, Z_SIZE)
    zn = zn * gamma + beta                                         # (B*T, 128)

    # ---- g_theta first layer: pair-independent halves hoisted out of the
    #      T*T pair set.  Temporal tag (frame index t) is generated in-kernel
    #      and enters as a rank-1 VPU add so the MXU contraction stays at
    #      K = 128 (no Dz=129 concat). ----
    tag = jax.lax.broadcasted_iota(jnp.int32, (B, T, 1), 1).astype(f32)
    pa3 = dot(zn, g_w1a_ref[...]).reshape(B, T, H_G1) \
        + tag * g_w1a_tag.reshape(1, 1, H_G1)                      # (B,T,512)
    pb3 = dot(zn, g_w1b_ref[...]).reshape(B, T, H_G1) \
        + tag * g_w1b_tag.reshape(1, 1, H_G1)                      # (B,T,512)

    # ---- All T*T ordered pairs, batched into one M = B*T*T matmul.  The
    #      pair tensor + ReLU live in bf16 (largest activation) when use_bf16.
    pair_dt = mm
    h4 = (pa3[:, :, None, :].astype(pair_dt)
          + pb3[:, None, :, :].astype(pair_dt)
          + g_b1.reshape(1, 1, 1, H_G1).astype(pair_dt))           # (B,T,T,512)
    h2 = jnp.maximum(h4, 0.0).reshape(B * T * T, H_G1)             # relu(g_hidden)

    cp_g2.wait()
    g2 = jnp.maximum(dot(h2, g_w2_vmem[...]) + g_b2, 0.0)          # relu(g_out)
    all_g = jnp.sum(g2.reshape(B, T * T, H_G2), axis=1)            # (B, 256)

    # ---- f_phi + zero-padded y_out (lane-dense 128-wide output block). ----
    cp_f.wait()
    f_h = jnp.maximum(dot(all_g, f_w_vmem[...]) + f_b, 0.0)        # (B, 256)
    cp_y.wait()
    y = dot(f_h, y_w_vmem[...]) + y_b                              # (B, 128)

    # Pad rows to the full sublane-aligned block -> single unmasked store.
    b_pad = o_ref.shape[0]
    if b_pad > B:
        y = jnp.concatenate([y, jnp.zeros((b_pad - B, Y_PAD), f32)], axis=0)
    o_ref[...] = y


# ---------------------------------------------------------------------------
# Parameter initialization (mirrors shapes/inits in Model.__init__).
# kaiming_normal for relu layers, xavier_normal for y_out, zero biases,
# gamma=1 / beta=0 for contextnorm.
# ---------------------------------------------------------------------------
def init_params(key, in_dim):
    ks = jax.random.split(key, 7)

    def kaiming(k, fi, fo):
        return jax.random.normal(k, (fi, fo), jnp.float32) * jnp.sqrt(2.0 / fi)

    def xavier(k, fi, fo):
        return jax.random.normal(k, (fi, fo), jnp.float32) * jnp.sqrt(2.0 / (fi + fo))

    dz = Z_SIZE + 1
    p = {}
    # Encoder_mlp: Linear(in,256) -> Linear(256,256) -> Linear(256,128), all ReLU.
    p["enc_w1"], p["enc_b1"] = kaiming(ks[0], in_dim, H_ENC), jnp.zeros((H_ENC,), jnp.float32)
    p["enc_w2"], p["enc_b2"] = kaiming(ks[1], H_ENC, H_ENC), jnp.zeros((H_ENC,), jnp.float32)
    p["enc_w3"], p["enc_b3"] = kaiming(ks[2], H_ENC, Z_SIZE), jnp.zeros((Z_SIZE,), jnp.float32)
    # contextnorm
    p["gamma"] = jnp.ones((Z_SIZE,), jnp.float32)
    p["beta"] = jnp.zeros((Z_SIZE,), jnp.float32)
    # g_theta_hidden: Linear(2*(z+1), 512), stored split so the two 128-wide
    # z halves feed the MXU and the two temporal-tag rows become rank-1 adds.
    w1 = kaiming(ks[3], 2 * dz, H_G1)
    p["g_w1a_z"] = w1[:Z_SIZE]
    p["g_w1a_tag"] = w1[Z_SIZE:Z_SIZE + 1]
    p["g_w1b_z"] = w1[dz:dz + Z_SIZE]
    p["g_w1b_tag"] = w1[dz + Z_SIZE:dz + Z_SIZE + 1]
    p["g_b1"] = jnp.zeros((H_G1,), jnp.float32)
    p["g_w2"], p["g_b2"] = kaiming(ks[4], H_G1, H_G2), jnp.zeros((H_G2,), jnp.float32)
    # f_phi + y_out
    p["f_w"], p["f_b"] = kaiming(ks[5], H_G2, H_F), jnp.zeros((H_F,), jnp.float32)
    p["y_w"], p["y_b"] = xavier(ks[6], H_F, Y_DIM), jnp.zeros((Y_DIM,), jnp.float32)
    return p


# ---------------------------------------------------------------------------
# One-time parameter packing (hoisted out of the per-call path):
#   * weights cast to bf16 for HBM storage / MXU inputs,
#   * y_out weight zero-padded to 128 lanes,
#   * all small bias/scale/tag vectors packed into a single (16, 512) f32 slab.
# ---------------------------------------------------------------------------
def pack_params(p, use_bf16=True):
    wdt = jnp.bfloat16 if use_bf16 else jnp.float32

    y_w_pad = jnp.zeros((H_F, Y_PAD), jnp.float32).at[:, :Y_DIM].set(p["y_w"])

    vecs = jnp.zeros((16, H_G1), jnp.float32)
    vecs = vecs.at[0, :H_ENC].set(p["enc_b1"])
    vecs = vecs.at[1, :H_ENC].set(p["enc_b2"])
    vecs = vecs.at[2, :Z_SIZE].set(p["enc_b3"])
    vecs = vecs.at[3, :Z_SIZE].set(p["gamma"])
    vecs = vecs.at[4, :Z_SIZE].set(p["beta"])
    vecs = vecs.at[5, :H_G1].set(p["g_w1a_tag"][0])
    vecs = vecs.at[6, :H_G1].set(p["g_w1b_tag"][0])
    vecs = vecs.at[7, :H_G1].set(p["g_b1"])
    vecs = vecs.at[8, :H_G2].set(p["g_b2"])
    vecs = vecs.at[9, :H_F].set(p["f_b"])
    vecs = vecs.at[10, :Y_DIM].set(p["y_b"])

    return {
        "enc_w1": p["enc_w1"].astype(wdt),
        "enc_w2": p["enc_w2"].astype(wdt),
        "enc_w3": p["enc_w3"].astype(wdt),
        "g_w1a": p["g_w1a_z"].astype(wdt),
        "g_w1b": p["g_w1b_z"].astype(wdt),
        "g_w2": p["g_w2"].astype(wdt),
        "f_w": p["f_w"].astype(wdt),
        "y_w": y_w_pad.astype(wdt),
        "vecs": vecs,
    }


# ---------------------------------------------------------------------------
# Forward pass: one fused pallas_call; only trivial glue (reshape, slice,
# argmax) lives in the JAX wrapper.
# ---------------------------------------------------------------------------
def forward(x_seq, packed):
    B, T, C, H, W = x_seq.shape
    assert T >= 2, "contextnorm uses unbiased variance over the sequence axis (T >= 2)"
    use_bf16 = packed["enc_w1"].dtype == jnp.bfloat16
    wdt = packed["g_w2"].dtype

    x_flat = x_seq.reshape(B * T, C * H * W).astype(jnp.float32)
    b_pad = ((B + 7) // 8) * 8        # sublane-aligned output rows

    vmem = pl.BlockSpec(memory_space=pltpu.MemorySpace.VMEM)
    anyspace = pl.BlockSpec(memory_space=pl.ANY)

    args = (
        x_flat,
        packed["enc_w1"], packed["enc_w2"], packed["enc_w3"],
        packed["g_w1a"], packed["g_w1b"],
        packed["g_w2"], packed["f_w"], packed["y_w"],
        packed["vecs"],
    )

    in_bytes = sum(int(a.size) * a.dtype.itemsize for a in args)
    out_bytes = b_pad * Y_PAD * 4
    flops = 2 * (
        B * T * (C * H * W * H_ENC + H_ENC * H_ENC + H_ENC * Z_SIZE)
        + 2 * B * T * Z_SIZE * H_G1
        + B * T * T * H_G1 * H_G2
        + B * (H_G2 * H_F + H_F * Y_PAD)
    )

    kernel = functools.partial(_fused_forward_kernel, B=B, T=T, use_bf16=use_bf16)
    y_padded = pl.pallas_call(
        kernel,
        out_shape=jax.ShapeDtypeStruct((b_pad, Y_PAD), jnp.float32),
        in_specs=[vmem] * 6 + [anyspace] * 3 + [vmem],
        out_specs=vmem,
        scratch_shapes=[
            pltpu.VMEM((H_G1, H_G2), wdt),       # g_w2 landing buffer
            pltpu.VMEM((H_G2, H_F), wdt),        # f_w  landing buffer
            pltpu.VMEM((H_F, Y_PAD), wdt),       # y_w  landing buffer
            pltpu.SemaphoreType.DMA((3,)),
        ],
        cost_estimate=pl.CostEstimate(
            flops=flops, transcendentals=0, bytes_accessed=in_bytes + out_bytes),
    )(*args)

    y_pred_linear = y_padded[:B, :Y_DIM]
    y_pred = jnp.argmax(y_pred_linear, axis=1)    # glue argmax
    return y_pred_linear, y_pred, None


if __name__ == "__main__":
    key = jax.random.PRNGKey(0)
    pkey, xkey = jax.random.split(key)

    # Small shapes consistent with the module: B=2, seq_len T=8, 1x16x16 frames.
    B, T, C, H, W = 2, 8, 1, 16, 16
    raw_params = init_params(pkey, C * H * W)
    packed_params = pack_params(raw_params, use_bf16=True)   # bf16 weights in HBM
    x_seq = jax.random.normal(xkey, (B, T, C, H, W), dtype=jnp.float32)

    y_pred_linear, y_pred, _ = forward(x_seq, packed_params)
    jax.block_until_ready((y_pred_linear, y_pred))

    assert y_pred_linear.shape == (B, Y_DIM) and y_pred_linear.dtype == jnp.float32
    assert y_pred.shape == (B,)
    # TODO(synk): Encoder_conv / Encoder_rand bodies were not provided in the
    # source module; this script implements the 'mlp' encoder branch.
    print("KERNEL_OK")
</pallas_src>

<mosaic_0001>
module attributes {stable_mosaic.version = 11 : i64} {
  func.func @_fused_forward_kernel(%arg0: memref<16x256xf32, #tpu.memory_space<vmem>>, %arg1: memref<256x256xbf16, #tpu.memory_space<vmem>>, %arg2: memref<256x256xbf16, #tpu.memory_space<vmem>>, %arg3: memref<256x128xbf16, #tpu.memory_space<vmem>>, %arg4: memref<128x512xbf16, #tpu.memory_space<vmem>>, %arg5: memref<128x512xbf16, #tpu.memory_space<vmem>>, %arg6: memref<512x256xbf16, #tpu.memory_space<any>>, %arg7: memref<256x256xbf16, #tpu.memory_space<any>>, %arg8: memref<256x128xbf16, #tpu.memory_space<any>>, %arg9: memref<16x512xf32, #tpu.memory_space<vmem>>, %arg10: memref<8x128xf32, #tpu.memory_space<vmem>>, %arg11: memref<512x256xbf16, #tpu.memory_space<vmem>>, %arg12: memref<256x256xbf16, #tpu.memory_space<vmem>>, %arg13: memref<256x128xbf16, #tpu.memory_space<vmem>>, %arg14: memref<3x!tpu.dma_semaphore, #tpu.memory_space<semaphore_mem>>) attributes {dimension_semantics = [], scalar_prefetch = 0 : i64, scratch_operands = 4 : i64, tpu.core_type = #tpu.core_type<tc>} {
    %c0_i32 = arith.constant 0 : i32
    %0 = tpu.memref_slice %arg14[%c0_i32] : memref<3x!tpu.dma_semaphore, #tpu.memory_space<semaphore_mem>> -> memref<1x!tpu.dma_semaphore, #tpu.memory_space<semaphore_mem>>
    %1 = tpu.memref_squeeze %0 : memref<1x!tpu.dma_semaphore, #tpu.memory_space<semaphore_mem>> -> memref<!tpu.dma_semaphore, #tpu.memory_space<semaphore_mem>>
    tpu.enqueue_dma source(%arg6 : memref<512x256xbf16, #tpu.memory_space<any>>) target(%arg11 : memref<512x256xbf16, #tpu.memory_space<vmem>>) target_semaphore(%1 : memref<!tpu.dma_semaphore, #tpu.memory_space<semaphore_mem>>)
    %c1_i32 = arith.constant 1 : i32
    %2 = tpu.memref_slice %arg14[%c1_i32] : memref<3x!tpu.dma_semaphore, #tpu.memory_space<semaphore_mem>> -> memref<1x!tpu.dma_semaphore, #tpu.memory_space<semaphore_mem>>
    %3 = tpu.memref_squeeze %2 : memref<1x!tpu.dma_semaphore, #tpu.memory_space<semaphore_mem>> -> memref<!tpu.dma_semaphore, #tpu.memory_space<semaphore_mem>>
    tpu.enqueue_dma source(%arg7 : memref<256x256xbf16, #tpu.memory_space<any>>) target(%arg12 : memref<256x256xbf16, #tpu.memory_space<vmem>>) target_semaphore(%3 : memref<!tpu.dma_semaphore, #tpu.memory_space<semaphore_mem>>)
    %c2_i32 = arith.constant 2 : i32
    %4 = tpu.memref_slice %arg14[%c2_i32] : memref<3x!tpu.dma_semaphore, #tpu.memory_space<semaphore_mem>> -> memref<1x!tpu.dma_semaphore, #tpu.memory_space<semaphore_mem>>
    %5 = tpu.memref_squeeze %4 : memref<1x!tpu.dma_semaphore, #tpu.memory_space<semaphore_mem>> -> memref<!tpu.dma_semaphore, #tpu.memory_space<semaphore_mem>>
    tpu.enqueue_dma source(%arg8 : memref<256x128xbf16, #tpu.memory_space<any>>) target(%arg13 : memref<256x128xbf16, #tpu.memory_space<vmem>>) target_semaphore(%5 : memref<!tpu.dma_semaphore, #tpu.memory_space<semaphore_mem>>)
    %c0 = arith.constant 0 : index
    %c0_0 = arith.constant 0 : index
    %6 = vector.load %arg9[%c0, %c0_0] : memref<16x512xf32, #tpu.memory_space<vmem>>, vector<1x256xf32>
    %c1 = arith.constant 1 : index
    %c0_1 = arith.constant 0 : index
    %7 = vector.load %arg9[%c1, %c0_1] : memref<16x512xf32, #tpu.memory_space<vmem>>, vector<1x256xf32>
    %c2 = arith.constant 2 : index
    %c0_2 = arith.constant 0 : index
    %8 = vector.load %arg9[%c2, %c0_2] : memref<16x512xf32, #tpu.memory_space<vmem>>, vector<1x128xf32>
    %c3 = arith.constant 3 : index
    %c0_3 = arith.constant 0 : index
    %9 = vector.load %arg9[%c3, %c0_3] : memref<16x512xf32, #tpu.memory_space<vmem>>, vector<1x128xf32>
    %c4 = arith.constant 4 : index
    %c0_4 = arith.constant 0 : index
    %10 = vector.load %arg9[%c4, %c0_4] : memref<16x512xf32, #tpu.memory_space<vmem>>, vector<1x128xf32>
    %c5 = arith.constant 5 : index
    %c0_5 = arith.constant 0 : index
    %11 = vector.load %arg9[%c5, %c0_5] : memref<16x512xf32, #tpu.memory_space<vmem>>, vector<1x512xf32>
    %c6 = arith.constant 6 : index
    %c0_6 = arith.constant 0 : index
    %12 = vector.load %arg9[%c6, %c0_6] : memref<16x512xf32, #tpu.memory_space<vmem>>, vector<1x512xf32>
    %c7 = arith.constant 7 : index
    %c0_7 = arith.constant 0 : index
    %13 = vector.load %arg9[%c7, %c0_7] : memref<16x512xf32, #tpu.memory_space<vmem>>, vector<1x512xf32>
    %c8 = arith.constant 8 : index
    %c0_8 = arith.constant 0 : index
    %14 = vector.load %arg9[%c8, %c0_8] : memref<16x512xf32, #tpu.memory_space<vmem>>, vector<1x256xf32>
    %c9 = arith.constant 9 : index
    %c0_9 = arith.constant 0 : index
    %15 = vector.load %arg9[%c9, %c0_9] : memref<16x512xf32, #tpu.memory_space<vmem>>, vector<1x256xf32>
    %c10 = arith.constant 10 : index
    %c0_10 = arith.constant 0 : index
    %16 = vector.load %arg9[%c10, %c0_10] : memref<16x512xf32, #tpu.memory_space<vmem>>, vector<1x128xf32>
    %c0_11 = arith.constant 0 : index
    %c0_12 = arith.constant 0 : index
    %17 = vector.load %arg0[%c0_11, %c0_12] : memref<16x256xf32, #tpu.memory_space<vmem>>, vector<16x256xf32>
    %c0_13 = arith.constant 0 : index
    %c0_14 = arith.constant 0 : index
    %18 = vector.load %arg1[%c0_13, %c0_14] : memref<256x256xbf16, #tpu.memory_space<vmem>>, vector<256x256xbf16>
    %19 = arith.truncf %17 : vector<16x256xf32> to vector<16x256xbf16>
    %cst = arith.constant dense<0.000000e+00> : vector<16x256xf32>
    %20 = tpu.matmul %19, %18, %cst {dimension_numbers = #tpu.dot_dimension_numbers<[1], [0], [0], [1], [0, 0, 1, 1], [], []>} : vector<16x256xbf16>, vector<256x256xbf16>, vector<16x256xf32> -> vector<16x256xf32>
    %21 = vector.broadcast %6 : vector<1x256xf32> to vector<16x256xf32>
    %22 = arith.addf %20, %21 : vector<16x256xf32>
    %cst_15 = arith.constant 0.000000e+00 : f32
    %23 = vector.broadcast %cst_15 : f32 to vector<16x256xf32>
    %24 = arith.maximumf %22, %23 : vector<16x256xf32>
    %c0_16 = arith.constant 0 : index
    %c0_17 = arith.constant 0 : index
    %25 = vector.load %arg2[%c0_16, %c0_17] : memref<256x256xbf16, #tpu.memory_space<vmem>>, vector<256x256xbf16>
    %26 = arith.truncf %24 : vector<16x256xf32> to vector<16x256xbf16>
    %cst_18 = arith.constant dense<0.000000e+00> : vector<16x256xf32>
    %27 = tpu.matmul %26, %25, %cst_18 {dimension_numbers = #tpu.dot_dimension_numbers<[1], [0], [0], [1], [0, 0, 1, 1], [], []>} : vector<16x256xbf16>, vector<256x256xbf16>, vector<16x256xf32> -> vector<16x256xf32>
    %28 = vector.broadcast %7 : vector<1x256xf32> to vector<16x256xf32>
    %29 = arith.addf %27, %28 : vector<16x256xf32>
    %cst_19 = arith.constant 0.000000e+00 : f32
    %30 = vector.broadcast %cst_19 : f32 to vector<16x256xf32>
    %31 = arith.maximumf %29, %30 : vector<16x256xf32>
    %c0_20 = arith.constant 0 : index
    %c0_21 = arith.constant 0 : index
    %32 = vector.load %arg3[%c0_20, %c0_21] : memref<256x128xbf16, #tpu.memory_space<vmem>>, vector<256x128xbf16>
    %33 = arith.truncf %31 : vector<16x256xf32> to vector<16x256xbf16>
    %cst_22 = arith.constant dense<0.000000e+00> : vector<16x128xf32>
    %34 = tpu.matmul %33, %32, %cst_22 {dimension_numbers = #tpu.dot_dimension_numbers<[1], [0], [0], [1], [0, 0, 1, 1], [], []>} : vector<16x256xbf16>, vector<256x128xbf16>, vector<16x128xf32> -> vector<16x128xf32>
    %35 = vector.broadcast %8 : vector<1x128xf32> to vector<16x128xf32>
    %36 = arith.addf %34, %35 : vector<16x128xf32>
    %cst_23 = arith.constant 0.000000e+00 : f32
    %37 = vector.broadcast %cst_23 : f32 to vector<16x128xf32>
    %38 = arith.maximumf %36, %37 : vector<16x128xf32>
    %39 = vector.shape_cast %38 : vector<16x128xf32> to vector<2x8x128xf32>
    %cst_24 = arith.constant dense<0.000000e+00> : vector<2x128xf32>
    %40 = vector.multi_reduction <add>, %39, %cst_24 [1] : vector<2x8x128xf32> to vector<2x128xf32>
    %41 = vector.shape_cast %40 : vector<2x128xf32> to vector<2x1x128xf32>
    %cst_25 = arith.constant 8.000000e+00 : f32
    %42 = vector.broadcast %cst_25 : f32 to vector<2x1x128xf32>
    %43 = arith.divf %41, %42 : vector<2x1x128xf32>
    %44 = vector.broadcast %43 : vector<2x1x128xf32> to vector<2x8x128xf32>
    %45 = arith.subf %39, %44 : vector<2x8x128xf32>
    %46 = arith.mulf %45, %45 : vector<2x8x128xf32>
    %cst_26 = arith.constant dense<0.000000e+00> : vector<2x128xf32>
    %47 = vector.multi_reduction <add>, %46, %cst_26 [1] : vector<2x8x128xf32> to vector<2x128xf32>
    %48 = vector.shape_cast %47 : vector<2x128xf32> to vector<2x1x128xf32>
    %cst_27 = arith.constant 7.000000e+00 : f32
    %49 = vector.broadcast %cst_27 : f32 to vector<2x1x128xf32>
    %50 = arith.divf %48, %49 : vector<2x1x128xf32>
    %51 = vector.broadcast %43 : vector<2x1x128xf32> to vector<2x8x128xf32>
    %52 = arith.subf %39, %51 : vector<2x8x128xf32>
    %cst_28 = arith.constant 9.99999993E-9 : f32
    %53 = vector.broadcast %cst_28 : f32 to vector<2x1x128xf32>
    %54 = arith.addf %50, %53 : vector<2x1x128xf32>
    %55 = math.sqrt %54 : vector<2x1x128xf32>
    %56 = vector.broadcast %55 : vector<2x1x128xf32> to vector<2x8x128xf32>
    %57 = arith.divf %52, %56 : vector<2x8x128xf32>
    %58 = vector.shape_cast %57 : vector<2x8x128xf32> to vector<16x128xf32>
    %59 = vector.broadcast %9 : vector<1x128xf32> to vector<16x128xf32>
    %60 = arith.mulf %58, %59 : vector<16x128xf32>
    %61 = vector.broadcast %10 : vector<1x128xf32> to vector<16x128xf32>
    %62 = arith.addf %60, %61 : vector<16x128xf32>
    %63 = tpu.iota {dimensions = array<i32: 1>} : vector<2x8x1xi32>
    %64 = arith.sitofp %63 : vector<2x8x1xi32> to vector<2x8x1xf32>
    %c0_29 = arith.constant 0 : index
    %c0_30 = arith.constant 0 : index
    %65 = vector.load %arg4[%c0_29, %c0_30] : memref<128x512xbf16, #tpu.memory_space<vmem>>, vector<128x512xbf16>
    %66 = arith.truncf %62 : vector<16x128xf32> to vector<16x128xbf16>
    %cst_31 = arith.constant dense<0.000000e+00> : vector<16x512xf32>
    %67 = tpu.matmul %66, %65, %cst_31 {dimension_numbers = #tpu.dot_dimension_numbers<[1], [0], [0], [1], [0, 0, 1, 1], [], []>} : vector<16x128xbf16>, vector<128x512xbf16>, vector<16x512xf32> -> vector<16x512xf32>
    %68 = vector.shape_cast %67 : vector<16x512xf32> to vector<2x8x512xf32>
    %69 = vector.shape_cast %11 : vector<1x512xf32> to vector<1x1x512xf32>
    %70 = vector.broadcast %64 : vector<2x8x1xf32> to vector<2x8x512xf32>
    %71 = vector.broadcast %69 : vector<1x1x512xf32> to vector<2x8x512xf32>
    %72 = arith.mulf %70, %71 : vector<2x8x512xf32>
    %73 = arith.addf %68, %72 : vector<2x8x512xf32>
    %c0_32 = arith.constant 0 : index
    %c0_33 = arith.constant 0 : index
    %74 = vector.load %arg5[%c0_32, %c0_33] : memref<128x512xbf16, #tpu.memory_space<vmem>>, vector<128x512xbf16>
    %75 = arith.truncf %62 : vector<16x128xf32> to vector<16x128xbf16>
    %cst_34 = arith.constant dense<0.000000e+00> : vector<16x512xf32>
    %76 = tpu.matmul %75, %74, %cst_34 {dimension_numbers = #tpu.dot_dimension_numbers<[1], [0], [0], [1], [0, 0, 1, 1], [], []>} : vector<16x128xbf16>, vector<128x512xbf16>, vector<16x512xf32> -> vector<16x512xf32>
    %77 = vector.shape_cast %76 : vector<16x512xf32> to vector<2x8x512xf32>
    %78 = vector.shape_cast %12 : vector<1x512xf32> to vector<1x1x512xf32>
    %79 = vector.broadcast %64 : vector<2x8x1xf32> to vector<2x8x512xf32>
    %80 = vector.broadcast %78 : vector<1x1x512xf32> to vector<2x8x512xf32>
    %81 = arith.mulf %79, %80 : vector<2x8x512xf32>
    %82 = arith.addf %77, %81 : vector<2x8x512xf32>
    %83 = vector.shape_cast %73 : vector<2x8x512xf32> to vector<2x8x1x512xf32>
    %84 = arith.truncf %83 : vector<2x8x1x512xf32> to vector<2x8x1x512xbf16>
    %85 = vector.shape_cast %82 : vector<2x8x512xf32> to vector<2x1x8x512xf32>
    %86 = arith.truncf %85 : vector<2x1x8x512xf32> to vector<2x1x8x512xbf16>
    %87 = vector.broadcast %84 : vector<2x8x1x512xbf16> to vector<2x8x8x512xbf16>
    %88 = vector.broadcast %86 : vector<2x1x8x512xbf16> to vector<2x8x8x512xbf16>
    %89 = arith.addf %87, %88 : vector<2x8x8x512xbf16>
    %90 = vector.shape_cast %13 : vector<1x512xf32> to vector<1x1x1x512xf32>
    %91 = arith.truncf %90 : vector<1x1x1x512xf32> to vector<1x1x1x512xbf16>
    %92 = vector.broadcast %91 : vector<1x1x1x512xbf16> to vector<2x8x8x512xbf16>
    %93 = arith.addf %89, %92 : vector<2x8x8x512xbf16>
    %cst_35 = arith.constant 0.000000e+00 : bf16
    %94 = vector.broadcast %cst_35 : bf16 to vector<2x8x8x512xbf16>
    %95 = arith.maximumf %93, %94 : vector<2x8x8x512xbf16>
    %96 = vector.shape_cast %95 : vector<2x8x8x512xbf16> to vector<128x512xbf16>
    %c0_i32_36 = arith.constant 0 : i32
    %97 = tpu.memref_slice %arg14[%c0_i32_36] : memref<3x!tpu.dma_semaphore, #tpu.memory_space<semaphore_mem>> -> memref<1x!tpu.dma_semaphore, #tpu.memory_space<semaphore_mem>>
    %98 = tpu.memref_squeeze %97 : memref<1x!tpu.dma_semaphore, #tpu.memory_space<semaphore_mem>> -> memref<!tpu.dma_semaphore, #tpu.memory_space<semaphore_mem>>
    tpu.wait_dma2 semaphore(%98 : memref<!tpu.dma_semaphore, #tpu.memory_space<semaphore_mem>>) src(%arg6 : memref<512x256xbf16, #tpu.memory_space<any>>) dst(%arg11 : memref<512x256xbf16, #tpu.memory_space<vmem>>)
    %c0_37 = arith.constant 0 : index
    %c0_38 = arith.constant 0 : index
    %99 = vector.load %arg11[%c0_37, %c0_38] : memref<512x256xbf16, #tpu.memory_space<vmem>>, vector<512x256xbf16>
    %cst_39 = arith.constant dense<0.000000e+00> : vector<128x256xf32>
    %100 = tpu.matmul %96, %99, %cst_39 {dimension_numbers = #tpu.dot_dimension_numbers<[1], [0], [0], [1], [0, 0, 1, 1], [], []>} : vector<128x512xbf16>, vector<512x256xbf16>, vector<128x256xf32> -> vector<128x256xf32>
    %101 = vector.broadcast %14 : vector<1x256xf32> to vector<128x256xf32>
    %102 = arith.addf %100, %101 : vector<128x256xf32>
    %cst_40 = arith.constant 0.000000e+00 : f32
    %103 = vector.broadcast %cst_40 : f32 to vector<128x256xf32>
    %104 = arith.maximumf %102, %103 : vector<128x256xf32>
    %105 = vector.shape_cast %104 : vector<128x256xf32> to vector<2x64x256xf32>
    %cst_41 = arith.constant dense<0.000000e+00> : vector<2x256xf32>
    %106 = vector.multi_reduction <add>, %105, %cst_41 [1] : vector<2x64x256xf32> to vector<2x256xf32>
    %c1_i32_42 = arith.constant 1 : i32
    %107 = tpu.memref_slice %arg14[%c1_i32_42] : memref<3x!tpu.dma_semaphore, #tpu.memory_space<semaphore_mem>> -> memref<1x!tpu.dma_semaphore, #tpu.memory_space<semaphore_mem>>
    %108 = tpu.memref_squeeze %107 : memref<1x!tpu.dma_semaphore, #tpu.memory_space<semaphore_mem>> -> memref<!tpu.dma_semaphore, #tpu.memory_space<semaphore_mem>>
    tpu.wait_dma2 semaphore(%108 : memref<!tpu.dma_semaphore, #tpu.memory_space<semaphore_mem>>) src(%arg7 : memref<256x256xbf16, #tpu.memory_space<any>>) dst(%arg12 : memref<256x256xbf16, #tpu.memory_space<vmem>>)
    %c0_43 = arith.constant 0 : index
    %c0_44 = arith.constant 0 : index
    %109 = vector.load %arg12[%c0_43, %c0_44] : memref<256x256xbf16, #tpu.memory_space<vmem>>, vector<256x256xbf16>
    %110 = arith.truncf %106 : vector<2x256xf32> to vector<2x256xbf16>
    %cst_45 = arith.constant dense<0.000000e+00> : vector<2x256xf32>
    %111 = tpu.matmul %110, %109, %cst_45 {dimension_numbers = #tpu.dot_dimension_numbers<[1], [0], [0], [1], [0, 0, 1, 1], [], []>} : vector<2x256xbf16>, vector<256x256xbf16>, vector<2x256xf32> -> vector<2x256xf32>
    %112 = vector.broadcast %15 : vector<1x256xf32> to vector<2x256xf32>
    %113 = arith.addf %111, %112 : vector<2x256xf32>
    %cst_46 = arith.constant 0.000000e+00 : f32
    %114 = vector.broadcast %cst_46 : f32 to vector<2x256xf32>
    %115 = arith.maximumf %113, %114 : vector<2x256xf32>
    %c2_i32_47 = arith.constant 2 : i32
    %116 = tpu.memref_slice %arg14[%c2_i32_47] : memref<3x!tpu.dma_semaphore, #tpu.memory_space<semaphore_mem>> -> memref<1x!tpu.dma_semaphore, #tpu.memory_space<semaphore_mem>>
    %117 = tpu.memref_squeeze %116 : memref<1x!tpu.dma_semaphore, #tpu.memory_space<semaphore_mem>> -> memref<!tpu.dma_semaphore, #tpu.memory_space<semaphore_mem>>
    tpu.wait_dma2 semaphore(%117 : memref<!tpu.dma_semaphore, #tpu.memory_space<semaphore_mem>>) src(%arg8 : memref<256x128xbf16, #tpu.memory_space<any>>) dst(%arg13 : memref<256x128xbf16, #tpu.memory_space<vmem>>)
    %c0_48 = arith.constant 0 : index
    %c0_49 = arith.constant 0 : index
    %118 = vector.load %arg13[%c0_48, %c0_49] : memref<256x128xbf16, #tpu.memory_space<vmem>>, vector<256x128xbf16>
    %119 = arith.truncf %115 : vector<2x256xf32> to vector<2x256xbf16>
    %cst_50 = arith.constant dense<0.000000e+00> : vector<2x128xf32>
    %120 = tpu.matmul %119, %118, %cst_50 {dimension_numbers = #tpu.dot_dimension_numbers<[1], [0], [0], [1], [0, 0, 1, 1], [], []>} : vector<2x256xbf16>, vector<256x128xbf16>, vector<2x128xf32> -> vector<2x128xf32>
    %121 = vector.broadcast %16 : vector<1x128xf32> to vector<2x128xf32>
    %122 = arith.addf %120, %121 : vector<2x128xf32>
    %cst_51 = arith.constant 0.000000e+00 : f32
    %123 = vector.broadcast %cst_51 : f32 to vector<6x128xf32>
    %124 = tpu.concatenate %122, %123 in 0 : vector<2x128xf32>, vector<6x128xf32> -> vector<8x128xf32>
    %c0_52 = arith.constant 0 : index
    %c0_53 = arith.constant 0 : index
    %125 = vector.load %arg10[%c0_52, %c0_53] : memref<8x128xf32, #tpu.memory_space<vmem>>, vector<8x128xf32>
    tpu.vector_store %arg10[%c0_52, %c0_53], %124 {strides = array<i32>} : memref<8x128xf32, #tpu.memory_space<vmem>>, vector<8x128xf32>,
    return
  }
}

</mosaic_0001>

<bundles_post_ra>
// kernel: tpu_custom_call.1
= control target key start
LH: loop header
LB: loop body
LE: loop exit
PB: predicated region body
PF: predicated region fallthrough
CT: control target
= control target key end

     0   :  { %15 = vsyncpa [#allocation7], 0  ;;  %s5524_s0 = inlined_call_operand.hbm [shape: f32[16,256], index: 0, kind: input, shape index: {}]   ;;  %s5525_s1 = inlined_call_operand.hbm [shape: bf16[256,256], index: 1, kind: input, shape index: {}]   ;;  %s5526_s2 = inlined_call_operand.hbm [shape: bf16[256,256], index: 2, kind: input, shape index: {}]   ;;  %s5527_s3 = inlined_call_operand.hbm [shape: bf16[256,128], index: 3, kind: input, shape index: {}]   ;;  %s5528_s4 = inlined_call_operand.hbm [shape: bf16[128,512], index: 4, kind: input, shape index: {}]   ;;  %s5529_s5 = inlined_call_operand.hbm [shape: bf16[128,512], index: 5, kind: input, shape index: {}]   ;;  %s5530_s6 = inlined_call_operand.hbm [shape: bf16[512,256], index: 6, kind: input, shape index: {}]   ;;  %s5531_s7 = inlined_call_operand.hbm [shape: bf16[256,256], index: 7, kind: input, shape index: {}]   ;;  %s5532_s8 = inlined_call_operand.hbm [shape: bf16[256,128], index: 8, kind: input, shape index: {}]   ;;  %s5533_s9 = inlined_call_operand.hbm [shape: f32[16,512], index: 9, kind: input, shape index: {}]   ;;  %s5534_s10 = inlined_call_operand.hbm [shape: f32[8,128], index: 10, kind: output, shape index: {}]  }
   0x1   :  { %16 = vsyncpa [#allocation10], 0 }
   0x2   :  { %17 = vsyncpa [#allocation13], 0 }
   0x3   :  { %18 = vsyncpa [#allocation16], 0 }
   0x4   :  { %19 = vsyncpa [#allocation8], 0  ;;  %s4358_s13 = smov [#allocation9]   ;;  %s4144_s17 = scalar_lea.hbm %s5525_s1, 4096 }
   0x5   :  { %s37_s14 = sshll.u32 %s4358_s13, 4  ;;  %p4145_p0 = scmp.ne.s32.totalorder %s5525_s1, %s4144_s17  ;;  %s38_s14 = int_to_ptr.vmem [resolvable:$true] %s37_s14 }
   0x6   :  { %p4148_p1 = scmp.lt.u32.totalorder %s4144_s17, %s5525_s1 }
   0x8   :  { %p4150_p2 = pnand %p4148_p1, %p4145_p0 }
   0xa   :  { %4153 = shalt.err (!%p4150_p2)
}
   0xb   :  { %s4154_s22 = scalar_lea.vmem %s38_s14, 4096  ;;  %p4159_p4 = scmp.lt.s32.totalorder %s38_s14, %s38_s14 }
   0xc   :  { %p4155_p3 = scmp.ne.s32.totalorder %s38_s14, %s4154_s22  ;;  %p4160_p5 = scmp.lt.s32.totalorder %s4154_s22, %s4154_s22 }
   0xe   :  { %p4161_p6 = por %p4160_p5, %p4159_p4 }
  0x10   :  { %p4162_p7 = pnand %p4161_p6, %p4155_p3 }
  0x12   :  { %4165 = shalt.err (!%p4162_p7)
}
  0x13   :  { %s4359_s23 = smov 128   ;;  %s4360_s24 = smov 8  }
  0x14   :  { %43 = dma.hbm_to_vmem [thread:$0]  %s5525_s1, 4096, %s38_s14, [#allocation10], %s4359_s23, %s4359_s23, %s4360_s24  }
  0x15   :  { %s4361_s27 = smov [#allocation12]   ;;  %s4166_s11 = scalar_lea.hbm %s5527_s3, 2048 }
  0x16   :  { %s61_s28 = sshll.u32 %s4361_s27, 4  ;;  %p4167_p8 = scmp.ne.s32.totalorder %s5527_s3, %s4166_s11  ;;  %s62_s28 = int_to_ptr.vmem [resolvable:$true] %s61_s28 }
  0x17   :  { %p4170_p9 = scmp.lt.u32.totalorder %s4166_s11, %s5527_s3 }
  0x19   :  { %p4172_p10 = pnand %p4170_p9, %p4167_p8 }
  0x1b   :  { %4175 = shalt.err (!%p4172_p10)
}
  0x1c   :  { %s4176_s17 = scalar_lea.vmem %s62_s28, 2048  ;;  %p4181_p12 = scmp.lt.s32.totalorder %s62_s28, %s62_s28 }
  0x1d   :  { %p4177_p11 = scmp.ne.s32.totalorder %s62_s28, %s4176_s17  ;;  %p4182_p13 = scmp.lt.s32.totalorder %s4176_s17, %s4176_s17 }
  0x1f   :  { %p4183_p0 = por %p4182_p13, %p4181_p12 }
  0x21   :  { %p4184_p1 = pnand %p4183_p0, %p4177_p11 }
  0x23   :  { %4187 = shalt.err (!%p4184_p1)
}
  0x24   :  { %s4362_s1 = smov 64   ;;  %s4363_s14 = smov 4  }
  0x25   :  { %67 = dma.hbm_to_vmem [thread:$0]  %s5527_s3, 2048, %s62_s28, [#allocation13], %s4362_s1, %s4362_s1, %s4363_s14  }
  0x26   :  { %s4364_s20 = smov [#allocation15]   ;;  %s4365_s22 = smov [#allocation6]  }
  0x27   :  { %s85_s21 = sshll.u32 %s4364_s20, 4  ;;  %s25_s25 = sshll.u32 %s4365_s22, 4  ;;  %s86_s21 = int_to_ptr.vmem [resolvable:$true] %s85_s21  ;;  %s4469_s25 = int_to_ptr.vmem [resolvable:$true] %s25_s25 }
  0x28   :  { %s4188_s29 = scalar_lea.hbm %s5529_s5, 4096 }
  0x29   :  { %p4189_p2 = scmp.ne.s32.totalorder %s5529_s5, %s4188_s29  ;;  %p4192_p3 = scmp.lt.u32.totalorder %s4188_s29, %s5529_s5 }
  0x2b   :  { %p4194_p4 = pnand %p4192_p3, %p4189_p2 }
  0x2d   :  { %4197 = shalt.err (!%p4194_p4)
}
  0x2e   :  { %s4198_s3 = scalar_lea.vmem %s86_s21, 4096  ;;  %p4203_p6 = scmp.lt.s32.totalorder %s86_s21, %s86_s21 }
  0x2f   :  { %p4199_p5 = scmp.ne.s32.totalorder %s86_s21, %s4198_s3  ;;  %p4204_p7 = scmp.lt.s32.totalorder %s4198_s3, %s4198_s3 }
  0x31   :  { %p4205_p8 = por %p4204_p7, %p4203_p6 }
  0x33   :  { %p4206_p9 = pnand %p4205_p8, %p4199_p5 }
  0x35   :  { %4209 = shalt.err (!%p4206_p9)
}
  0x36   :  { %s4366_s28 = smov 256   ;;  %s4367_s15 = smov 16  }
  0x37   :  { %91 = dma.hbm_to_vmem [thread:$0]  %s5529_s5, 4096, %s86_s21, [#allocation16], %s4366_s28, %s4366_s28, %s4367_s15  }
  0x38   :  { %s4210_s20 = scalar_lea.hbm %s5524_s0, 512 }
  0x39   :  { %p4211_p10 = scmp.ne.s32.totalorder %s5524_s0, %s4210_s20  ;;  %p4214_p11 = scmp.lt.u32.totalorder %s4210_s20, %s5524_s0 }
  0x3b   :  { %p4216_p12 = pnand %p4214_p11, %p4211_p10 }
  0x3d   :  { %4219 = shalt.err (!%p4216_p12)
}
  0x3e   :  { %s4220_s30 = scalar_lea.vmem %s4469_s25, 512  ;;  %p4225_p0 = scmp.lt.s32.totalorder %s4469_s25, %s4469_s25 }
  0x3f   :  { %p4221_p13 = scmp.ne.s32.totalorder %s4469_s25, %s4220_s30  ;;  %p4226_p1 = scmp.lt.s32.totalorder %s4220_s30, %s4220_s30 }
  0x41   :  { %p4227_p2 = por %p4226_p1, %p4225_p0 }
  0x43   :  { %p4228_p3 = pnand %p4227_p2, %p4221_p13 }
  0x45   :  { %4231 = shalt.err (!%p4228_p3)
}
  0x46   :  { %31 = dma.hbm_to_vmem [thread:$0]  %s5524_s0, 512, %s4469_s25, [#allocation7], %s4366_s28, %s4366_s28, %s4367_s15  }
  0x47   :  { %s4368_s11 = smov [#allocation11]   ;;  %s4369_s13 = smov [#allocation14]  }
  0x48   :  { %s49_s12 = sshll.u32 %s4368_s11, 4  ;;  %s73_s3 = sshll.u32 %s4369_s13, 4  ;;  %s50_s12 = int_to_ptr.vmem [resolvable:$true] %s49_s12  ;;  %s4506_s3 = int_to_ptr.vmem [resolvable:$true] %s73_s3 }
  0x49   :  { %s4232_s18 = scalar_lea.hbm %s5526_s2, 4096 }
  0x4a   :  { %p4233_p4 = scmp.ne.s32.totalorder %s5526_s2, %s4232_s18  ;;  %p4236_p5 = scmp.lt.u32.totalorder %s4232_s18, %s5526_s2 }
  0x4c   :  { %p4238_p6 = pnand %p4236_p5, %p4233_p4 }
  0x4e   :  { %4241 = shalt.err (!%p4238_p6)
}
  0x4f   :  { %s4242_s0 = scalar_lea.vmem %s50_s12, 4096  ;;  %p4247_p8 = scmp.lt.s32.totalorder %s50_s12, %s50_s12 }
  0x50   :  { %p4243_p7 = scmp.ne.s32.totalorder %s50_s12, %s4242_s0  ;;  %p4248_p9 = scmp.lt.s32.totalorder %s4242_s0, %s4242_s0 }
  0x52   :  { %p4249_p10 = por %p4248_p9, %p4247_p8 }
  0x54   :  { %p4250_p11 = pnand %p4249_p10, %p4243_p7 }
  0x56   :  { %4253 = shalt.err (!%p4250_p11)
}
  0x57   :  { %55 = dma.hbm_to_vmem [thread:$0]  %s5526_s2, 4096, %s50_s12, [#allocation10], %s4359_s23, %s4359_s23, %s4360_s24  }
  0x58   :  { %s4254_s5 = scalar_lea.hbm %s5528_s4, 4096 }
  0x59   :  { %p4255_p12 = scmp.ne.s32.totalorder %s5528_s4, %s4254_s5  ;;  %p4258_p13 = scmp.lt.u32.totalorder %s4254_s5, %s5528_s4 }
  0x5b   :  { %p4260_p0 = pnand %p4258_p13, %p4255_p12 }
  0x5d   :  { %4263 = shalt.err (!%p4260_p0)
}
  0x5e   :  { %s4264_s17 = scalar_lea.vmem %s4506_s3, 4096  ;;  %p4269_p2 = scmp.lt.s32.totalorder %s4506_s3, %s4506_s3 }
  0x5f   :  { %p4265_p1 = scmp.ne.s32.totalorder %s4506_s3, %s4264_s17  ;;  %p4270_p3 = scmp.lt.s32.totalorder %s4264_s17, %s4264_s17 }
  0x61   :  { %p4271_p4 = por %p4270_p3, %p4269_p2 }
  0x63   :  { %p4272_p5 = pnand %p4271_p4, %p4265_p1 }
  0x65   :  { %4275 = shalt.err (!%p4272_p5)
}
  0x66   :  { %79 = dma.hbm_to_vmem [thread:$0]  %s5528_s4, 4096, %s4506_s3, [#allocation13], %s4366_s28, %s4366_s28, %s4367_s15  }
  0x67   :  { %s4370_s12 = smov [#allocation17]   ;;  %s4276_s22 = scalar_lea.hbm %s5533_s9, 1024 }
  0x68   :  { %s97_s18 = sshll.u32 %s4370_s12, 4  ;;  %p4277_p6 = scmp.ne.s32.totalorder %s5533_s9, %s4276_s22  ;;  %s98_s18 = int_to_ptr.vmem [resolvable:$true] %s97_s18 }
  0x69   :  { %p4280_p7 = scmp.lt.u32.totalorder %s4276_s22, %s5533_s9 }
  0x6b   :  { %p4282_p8 = pnand %p4280_p7, %p4277_p6 }
  0x6d   :  { %4285 = shalt.err (!%p4282_p8)
}
  0x6e   :  { %s4286_s29 = scalar_lea.vmem %s98_s18, 1024  ;;  %p4291_p10 = scmp.lt.s32.totalorder %s98_s18, %s98_s18 }
  0x6f   :  { %p4287_p9 = scmp.ne.s32.totalorder %s98_s18, %s4286_s29  ;;  %p4292_p11 = scmp.lt.s32.totalorder %s4286_s29, %s4286_s29 }
  0x71   :  { %p4293_p12 = por %p4292_p11, %p4291_p10 }
  0x73   :  { %p4294_p13 = pnand %p4293_p12, %p4287_p9 }
  0x75   :  { %4297 = shalt.err (!%p4294_p13)
}
  0x76   :  { %s4371_s4 = smov 512   ;;  %s4372_s15 = smov 32  }
  0x77   :  { %103 = dma.hbm_to_vmem [thread:$0]  %s5533_s9, 1024, %s98_s18, [#allocation16], %s4371_s4, %s4371_s4, %s4372_s15  }
  0x78   :  { %4342 = dma.done.wait [#allocation7], 512  }
  0x79   :  { %4343 = vsyncadd [#allocation7], 4294966784 }
  0x7a   :  { %4344 = dma.done.wait [#allocation10], 8192  }
  0x7b   :  { %4345 = vsyncadd [#allocation10], 4294959104 }
  0x7c   :  { %4346 = dma.done.wait [#allocation13], 6144  }
  0x7d   :  { %4347 = vsyncadd [#allocation13], 4294961152 }
  0x7e   :  { %4348 = dma.done.wait [#allocation16], 5120  }
  0x7f   :  { %4349 = vsyncadd [#allocation16], 4294962176  ;;  %s130_s5 = sld [smem:[#allocation0]]   ;;  %142 = sst [smem:[#allocation20]] %s4366_s28 }
  0x80   :  { %144 = sst [smem:[#allocation20 + $0x1]] %s4366_s28  ;;  %s4373_s21 = smov [#allocation2]  }
  0x81   :  { %s138_s11 = sshll.u32 %s4373_s21, 4  ;;  %148 = sst [smem:[#allocation20 + $0x3]] %s4362_s1  ;;  %s139_s11 = int_to_ptr.vmem [resolvable:$true] %s138_s11 }
  0x82   :  { %150 = sst [smem:[#allocation20 + $0x4]] %s4359_s23  ;;  %s4374_s16 = smov 2  }
  0x83   :  { %154 = sst [smem:[#allocation20 + $0x6]] %s4359_s23  ;;  %s4375_s17 = smov [#allocation5]  }
  0x84   :  { %156 = sst [smem:[#allocation20 + $0x7]] %s4362_s1  ;;  %s4376_s2 = smov [#allocation19]  }
  0x85   :  { %s3611_s9 = sshll.u32 %s130_s5, 26  ;;  %158 = sst [smem:[#allocation20 + $0x8]] %s4363_s14 }
  0x86   :  { %s3612_s13 = sadd.s32 134217728, %s3611_s9  ;;  %146 = sst [smem:[#allocation20 + $0x2]] %s4374_s16 }
  0x87   :  { %152 = sst [smem:[#allocation20 + $0x5]] %s4374_s16  ;;  %s4377_s18 = smov [#allocation3]  }
  0x88   :  { %160 = dma.general %s5530_s6, 8192, %s139_s11, %s4375_s17, %s4376_s2, [#allocation20], %s3612_s13, 0  }
  0x89   :  { %177 = sst [smem:[#allocation22]] %s4366_s28  ;;  %s173_s19 = sshll.u32 %s4377_s18, 4  ;;  %s174_s19 = int_to_ptr.vmem [resolvable:$true] %s173_s19 }
  0x8a   :  { %179 = sst [smem:[#allocation22 + $0x1]] %s4366_s28  ;;  %s4378_s6 = smov [#allocation5 + $0x1]  }
  0x8b   :  { %181 = sst [smem:[#allocation22 + $0x2]] %s4374_s16  ;;  %s4379_s20 = smov [#allocation21]  }
  0x8c   :  { %183 = sst [smem:[#allocation22 + $0x3]] %s4362_s1  ;;  %s4298_s28 = scalar_lea.hbm %s5532_s8, 2048 }
  0x8d   :  { %185 = sst [smem:[#allocation22 + $0x4]] %s4359_s23  ;;  %p4299_p0 = scmp.ne.s32.totalorder %s5532_s8, %s4298_s28 }
  0x8e   :  { %187 = sst [smem:[#allocation22 + $0x5]] %s4374_s16  ;;  %p4302_p1 = scmp.lt.u32.totalorder %s4298_s28, %s5532_s8 }
  0x8f   :  { %189 = sst [smem:[#allocation22 + $0x6]] %s4359_s23 }
  0x90   :  { %191 = sst [smem:[#allocation22 + $0x7]] %s4362_s1  ;;  %p4304_p2 = pnand %p4302_p1, %p4299_p0 }
  0x91   :  { %193 = sst [smem:[#allocation22 + $0x8]] %s4363_s14 }
  0x92   :  { %195 = dma.general %s5531_s7, 4096, %s174_s19, %s4378_s6, %s4379_s20, [#allocation22], %s3612_s13, 0  }
  0x93   :  { %v4575_v0 = vld [vmem:[#allocation17 + $0x20] ss:$8 sm:$0x3]  ;;  %v4577_v1 = vld [vmem:[#allocation17 + $0x21] ss:$8 sm:$0x3] }
  0x94   :  { %5551 = vst [vmem:[#allocation35_spill] sm:$0xff] %v4575_v0  ;;  %5552 = vst [vmem:[#allocation36_spill] sm:$0xff] %v4577_v1  ;;  %v4579_v2 = vld [vmem:[#allocation17 + $0x22] ss:$0 sm:$0xff]  ;;  %v3928_v3 = vld [vmem:[#allocation9 + $0x4] ss:$8 sps:$4 sm:$0xff]  }
  0x95   :  { %5553 = vst [vmem:[#allocation37_spill] sm:$0xff] %v4579_v2  ;;  %v3930_v4 = vld [vmem:[#allocation9] ss:$8 sps:$4 sm:$0xff]   ;;  %v3931_v5 = vld [vmem:[#allocation9 + $0x14] ss:$8 sps:$4 sm:$0xff]   ;;  %434 = vmatprep.subr.bf16.mxu0 %v3928_v3  ;;  %s4382_s7 = smov [#allocation4]  }
  0x96   :  { %435 = vmatpush1.bf16.msra.mxu0 %v3930_v4  ;;  %v3933_v6 = vld [vmem:[#allocation9 + $0x10] ss:$8 sps:$4 sm:$0xff]   ;;  %v3934_v7 = vld [vmem:[#allocation9 + $0x24] ss:$8 sps:$4 sm:$0xff]   ;;  %v3936_v8 = vld [vmem:[#allocation9 + $0x20] ss:$8 sps:$4 sm:$0xff]  }
  0x97   :  { %436 = vmatprep.subr.bf16.mxu0 %v3931_v5  ;;  %v3937_v9 = vld [vmem:[#allocation9 + $0x34] ss:$8 sps:$4 sm:$0xff]   ;;  %v3939_v10 = vld [vmem:[#allocation9 + $0x30] ss:$8 sps:$4 sm:$0xff]   ;;  %v3940_v11 = vld [vmem:[#allocation9 + $0x44] ss:$8 sps:$4 sm:$0xff]  }
  0x98   :  { %v3942_v12 = vld [vmem:[#allocation9 + $0x40] ss:$8 sps:$4 sm:$0xff]   ;;  %v3943_v13 = vld [vmem:[#allocation9 + $0x54] ss:$8 sps:$4 sm:$0xff]   ;;  %v3945_v14 = vld [vmem:[#allocation9 + $0x50] ss:$8 sps:$4 sm:$0xff]  }
  0x99   :  { %v3946_v15 = vld [vmem:[#allocation9 + $0x64] ss:$8 sps:$4 sm:$0xff]   ;;  %v3948_v17 = vld [vmem:[#allocation9 + $0x60] ss:$8 sps:$4 sm:$0xff]   ;;  %v228_v18 = vld [vmem:[#allocation6 + $0x18] sm:$0xff]  ;;  %s204_s23 = sshll.u32 %s4382_s7, 4  ;;  %s205_s23 = int_to_ptr.vmem [resolvable:$true] %s204_s23 }
  0x9a   :  { %437 = vmatpush1.bf16.msra.mxu0 %v3933_v6  ;;  %v226_v16 = vld [vmem:[#allocation6 + $0x8] sm:$0xff]  ;;  %v3949_v22 = vld [vmem:[#allocation9 + $0x74] ss:$8 sps:$4 sm:$0xff]   ;;  %v3951_v24 = vld [vmem:[#allocation9 + $0x70] ss:$8 sps:$4 sm:$0xff]  }
  0x9b   :  { %438 = vmatprep.subr.bf16.mxu0 %v3934_v7  ;;  %v262_v19 = vpack.c.bf16 %v228_v18, %v226_v16  ;;  %v3976_v20 = vld [vmem:[#allocation11 + $0x4] ss:$8 sps:$4 sm:$0xff]   ;;  %v3978_v21 = vld [vmem:[#allocation11] ss:$8 sps:$4 sm:$0xff]   ;;  %v3979_v23 = vld [vmem:[#allocation11 + $0x14] ss:$8 sps:$4 sm:$0xff]  }
  0x9c   :  { %686 = vmatprep.subr.bf16.mxu1 %v3976_v20  ;;  %v3981_v25 = vld [vmem:[#allocation11 + $0x10] ss:$8 sps:$4 sm:$0xff]   ;;  %v3982_v26 = vld [vmem:[#allocation11 + $0x24] ss:$8 sps:$4 sm:$0xff]   ;;  %v3954_v28 = vld [vmem:[#allocation9 + $0x80] ss:$8 sps:$4 sm:$0xff]  }
  0x9d   :  { %466 = vmatprep.mubr.bf16.mxu0 %v262_v19  ;;  %687 = vmatpush1.bf16.msra.mxu1 %v3978_v21  ;;  %v3952_v27 = vld [vmem:[#allocation9 + $0x84] ss:$8 sps:$4 sm:$0xff]   ;;  %v3984_v29 = vld [vmem:[#allocation11 + $0x20] ss:$8 sps:$4 sm:$0xff]   ;;  %v3985_v30 = vld [vmem:[#allocation11 + $0x34] ss:$8 sps:$4 sm:$0xff]  }
  0x9e   :  { %439 = vmatpush1.bf16.msra.mxu0 %v3936_v8  ;;  %688 = vmatprep.subr.bf16.mxu1 %v3979_v23  ;;  %v3955_v31 = vld [vmem:[#allocation9 + $0x94] ss:$8 sps:$4 sm:$0xff]   ;;  %v3957_v32 = vld [vmem:[#allocation9 + $0x90] ss:$8 sps:$4 sm:$0xff]   ;;  %v3988_v34 = vld [vmem:[#allocation11 + $0x44] ss:$8 sps:$4 sm:$0xff]   ;;  %v264_v23 = vlaneseq }
  0x9f   :  { %440 = vmatprep.subr.bf16.mxu0 %v3937_v9  ;;  %v3987_v33 = vld [vmem:[#allocation11 + $0x30] ss:$8 sps:$4 sm:$0xff]   ;;  %v3958_v35 = vld [vmem:[#allocation9 + $0xa4] ss:$8 sps:$4 sm:$0xff]   ;;  %v3960_v36 = vld [vmem:[#allocation9 + $0xa0] ss:$8 sps:$4 sm:$0xff]  }
  0xa0   :  { %v3990_v37 = vld [vmem:[#allocation11 + $0x40] ss:$8 sps:$4 sm:$0xff]   ;;  %v3991_v38 = vld [vmem:[#allocation11 + $0x54] ss:$8 sps:$4 sm:$0xff]   ;;  %v3993_v40 = vld [vmem:[#allocation11 + $0x50] ss:$8 sps:$4 sm:$0xff]  }
  0xa1   :  { %689 = vmatpush1.bf16.msra.mxu1 %v3981_v25  ;;  %v3961_v39 = vld [vmem:[#allocation9 + $0xb4] ss:$8 sps:$4 sm:$0xff]   ;;  %v3963_v41 = vld [vmem:[#allocation9 + $0xb0] ss:$8 sps:$4 sm:$0xff]   ;;  %v3994_v42 = vld [vmem:[#allocation11 + $0x64] ss:$8 sps:$4 sm:$0xff]  }
  0xa2   :  { %441 = vmatpush1.bf16.msra.mxu0 %v3939_v10  ;;  %690 = vmatprep.subr.bf16.mxu1 %v3982_v26  ;;  %v3964_v43 = vld [vmem:[#allocation9 + $0xc4] ss:$8 sps:$4 sm:$0xff]   ;;  %v3996_v44 = vld [vmem:[#allocation11 + $0x60] ss:$8 sps:$4 sm:$0xff]   ;;  %v3997_v46 = vld [vmem:[#allocation11 + $0x74] ss:$8 sps:$4 sm:$0xff]  }
  0xa3   :  { %442 = vmatprep.subr.bf16.mxu0 %v3940_v11  ;;  %v3966_v45 = vld [vmem:[#allocation9 + $0xc0] ss:$8 sps:$4 sm:$0xff]   ;;  %v3967_v47 = vld [vmem:[#allocation9 + $0xd4] ss:$8 sps:$4 sm:$0xff]   ;;  %v3999_v48 = vld [vmem:[#allocation11 + $0x70] ss:$8 sps:$4 sm:$0xff]  }
  0xa4   :  { %v3969_v49 = vld [vmem:[#allocation9 + $0xd0] ss:$8 sps:$4 sm:$0xff]   ;;  %v4000_v50 = vld [vmem:[#allocation11 + $0x84] ss:$8 sps:$4 sm:$0xff]   ;;  %v4002_v52 = vld [vmem:[#allocation11 + $0x80] ss:$8 sps:$4 sm:$0xff]  }
  0xa5   :  { %691 = vmatpush1.bf16.msra.mxu1 %v3984_v29  ;;  %v3970_v51 = vld [vmem:[#allocation9 + $0xe4] ss:$8 sps:$4 sm:$0xff]   ;;  %v3972_v53 = vld [vmem:[#allocation9 + $0xe0] ss:$8 sps:$4 sm:$0xff]   ;;  %v4003_v54 = vld [vmem:[#allocation11 + $0x94] ss:$8 sps:$4 sm:$0xff]  }
  0xa6   :  { %443 = vmatpush1.bf16.msra.mxu0 %v3942_v12  ;;  %692 = vmatprep.subr.bf16.mxu1 %v3985_v30  ;;  %v3973_v55 = vld [vmem:[#allocation9 + $0xf4] ss:$8 sps:$4 sm:$0xff]   ;;  %v4005_v56 = vld [vmem:[#allocation11 + $0x90] ss:$8 sps:$4 sm:$0xff]   ;;  %v225_v58 = vld [vmem:[#allocation6] sm:$0xff] }
  0xa7   :  { %444 = vmatprep.subr.bf16.mxu0 %v3943_v13  ;;  %v3975_v57 = vld [vmem:[#allocation9 + $0xf0] ss:$8 sps:$4 sm:$0xff]   ;;  %v4006_v60 = vld [vmem:[#allocation11 + $0xa4] ss:$8 sps:$4 sm:$0xff]   ;;  %v4008_v61 = vld [vmem:[#allocation11 + $0xa0] ss:$8 sps:$4 sm:$0xff]  }
  0xa8   :  { %v227_v59 = vld [vmem:[#allocation6 + $0x10] sm:$0xff]  ;;  %v4012_v4 = vld [vmem:[#allocation11 + $0xc4] ss:$8 sps:$4 sm:$0xff]   ;;  %v4014_v5 = vld [vmem:[#allocation11 + $0xc0] ss:$8 sps:$4 sm:$0xff]  }
  0xa9   :  { %693 = vmatpush1.bf16.msra.mxu1 %v3987_v33  ;;  %v4009_v62 = vld [vmem:[#allocation11 + $0xb4] ss:$8 sps:$4 sm:$0xff]   ;;  %v261_v63 = vpack.c.bf16 %v227_v59, %v225_v58  ;;  %v4011_v3 = vld [vmem:[#allocation11 + $0xb0] ss:$8 sps:$4 sm:$0xff]   ;;  %v4018_v8 = vld [vmem:[#allocation11 + $0xe4] ss:$8 sps:$4 sm:$0xff]  }
  0xaa   :  { %445 = vmatpush1.bf16.msra.mxu0 %v3945_v14  ;;  %694 = vmatprep.subr.bf16.mxu1 %v3988_v34  ;;  %v4015_v6 = vld [vmem:[#allocation11 + $0xd4] ss:$8 sps:$4 sm:$0xff]   ;;  %v4017_v7 = vld [vmem:[#allocation11 + $0xd0] ss:$8 sps:$4 sm:$0xff]   ;;  %v4020_v9 = vld [vmem:[#allocation11 + $0xe0] ss:$8 sps:$4 sm:$0xff]  }
  0xab   :  { %446 = vmatprep.subr.bf16.mxu0 %v3946_v15  ;;  %v4021_v10 = vld [vmem:[#allocation11 + $0xf4] ss:$8 sps:$4 sm:$0xff]   ;;  %v4023_v11 = vld [vmem:[#allocation11 + $0xf0] ss:$8 sps:$4 sm:$0xff]   ;;  %v4024_v12 = vld [vmem:[#allocation12 + $0x40] sm:$0xff]  }
  0xac   :  { %v4025_v13 = vld [vmem:[#allocation12] sm:$0xff]   ;;  %v4026_v14 = vld [vmem:[#allocation12 + $0x48] sm:$0xff]   ;;  %v4028_v16 = vld [vmem:[#allocation12 + $0x50] sm:$0xff]  }
  0xad   :  { %695 = vmatpush1.bf16.msra.mxu1 %v3990_v37  ;;  %v4027_v15 = vld [vmem:[#allocation12 + $0x8] sm:$0xff]   ;;  %v4030_v18 = vld [vmem:[#allocation12 + $0x58] sm:$0xff]   ;;  %v4032_v20 = vld [vmem:[#allocation12 + $0x60] sm:$0xff]  }
  0xae   :  { %447 = vmatpush1.bf16.msra.mxu0 %v3948_v17  ;;  %696 = vmatprep.subr.bf16.mxu1 %v3991_v38  ;;  %v4029_v17 = vld [vmem:[#allocation12 + $0x10] sm:$0xff]   ;;  %v4031_v19 = vld [vmem:[#allocation12 + $0x18] sm:$0xff]   ;;  %v4033_v21 = vld [vmem:[#allocation12 + $0x20] sm:$0xff]  }
  0xaf   :  { %448 = vmatprep.subr.bf16.mxu0 %v3949_v22  ;;  %v4034_v22 = vld [vmem:[#allocation12 + $0x68] sm:$0xff]  }
  0xb0   :  { %v208_v26 = vld [vmem:[#allocation17] ss:$8 sm:$0x3] }
  0xb1   :  { %697 = vmatpush1.bf16.msra.mxu1 %v3993_v40 }
  0xb2   :  { %449 = vmatpush1.bf16.msra.mxu0 %v3951_v24  ;;  %698 = vmatprep.subr.bf16.mxu1 %v3994_v42  ;;  %v4581_v24 = vshrl.u32 %v264_v23, 7  ;;  %v4069_v23 = vld [vmem:[#allocation15 + $0x84] ss:$16 sps:$4 sm:$0xff]  }
  0xb3   :  { %450 = vmatprep.subr.bf16.mxu0 %v3952_v27 }
  0xb4   :  { %v4584_v25 = vsub.s32 0, %v4581_v24  ;;  %v4587_v27 = vsub.s32 1, %v4581_v24 }
  0xb5   :  { %699 = vmatpush1.bf16.msra.mxu1 %v3996_v44  ;;  %v4035_v44 = vld [vmem:[#allocation12 + $0x28] sm:$0xff]  }
  0xb6   :  { %451 = vmatpush1.bf16.msra.mxu0 %v3954_v28  ;;  %700 = vmatprep.subr.bf16.mxu1 %v3997_v46  ;;  %5554 = vst [vmem:[#allocation38_spill] sm:$0xff] %v4584_v25  ;;  %5555 = vst [vmem:[#allocation39_spill] sm:$0xff] %v4587_v27  ;;  %v267_v28 = vrot.slane %v208_v26, %v4584_v25  ;;  %v271_v29 = vrot.slane %v208_v26, %v4587_v27  ;;  %v4037_v46 = vld [vmem:[#allocation12 + $0x30] sm:$0xff]  }
  0xb7   :  { %452 = vmatprep.subr.bf16.mxu0 %v3955_v31  ;;  %v4067_v26 = vld [vmem:[#allocation15 + $0x80] ss:$16 sps:$4 sm:$0xff]  }
  0xb9   :  { %701 = vmatpush1.bf16.msra.mxu1 %v3999_v48  ;;  %v4039_v48 = vld [vmem:[#allocation12 + $0x38] sm:$0xff]  }
  0xba   :  { %453 = vmatpush1.bf16.msra.mxu0 %v3957_v32  ;;  %702 = vmatprep.subr.bf16.mxu1 %v4000_v50 }
  0xbb   :  { %454 = vmatprep.subr.bf16.mxu0 %v3958_v35 }
  0xbd   :  { %703 = vmatpush1.bf16.msra.mxu1 %v4002_v52 }
  0xbe   :  { %455 = vmatpush1.bf16.msra.mxu0 %v3960_v36  ;;  %704 = vmatprep.subr.bf16.mxu1 %v4003_v54 }
  0xbf   :  { %456 = vmatprep.subr.bf16.mxu0 %v3961_v39 }
  0xc1   :  { %705 = vmatpush1.bf16.msra.mxu1 %v4005_v56 }
  0xc2   :  { %457 = vmatpush1.bf16.msra.mxu0 %v3963_v41  ;;  %706 = vmatprep.subr.bf16.mxu1 %v4006_v60 }
  0xc3   :  { %458 = vmatprep.subr.bf16.mxu0 %v3964_v43 }
  0xc5   :  { %707 = vmatpush1.bf16.msra.mxu1 %v4008_v61 }
  0xc6   :  { %459 = vmatpush1.bf16.msra.mxu0 %v3966_v45  ;;  %708 = vmatprep.subr.bf16.mxu1 %v4009_v62  ;;  %v4036_v45 = vld [vmem:[#allocation12 + $0x70] sm:$0xff]  }
  0xc7   :  { %460 = vmatprep.subr.bf16.mxu0 %v3967_v47  ;;  %v4038_v47 = vld [vmem:[#allocation12 + $0x78] sm:$0xff]  }
  0xc9   :  { %709 = vmatpush1.bf16.msra.mxu1 %v4011_v3 }
  0xca   :  { %461 = vmatpush1.bf16.msra.mxu0 %v3969_v49  ;;  %710 = vmatprep.subr.bf16.mxu1 %v4012_v4  ;;  %v210_v49 = vld [vmem:[#allocation17 + $0x1] ss:$8 sm:$0x3] }
  0xcb   :  { %462 = vmatprep.subr.bf16.mxu0 %v3970_v51  ;;  %v519_v50 = vrot.slane %v210_v49, %v4584_v25  ;;  %v523_v51 = vrot.slane %v210_v49, %v4587_v27 }
  0xcd   :  { %711 = vmatpush1.bf16.msra.mxu1 %v4014_v5  ;;  %v4042_v5 = vld [vmem:[#allocation14 + $0x4] ss:$16 sps:$4 sm:$0xff]  }
  0xce   :  { %463 = vmatpush1.bf16.msra.mxu0 %v3972_v53  ;;  %712 = vmatprep.subr.bf16.mxu1 %v4015_v6  ;;  %v4040_v6 = vld [vmem:[#allocation14] ss:$16 sps:$4 sm:$0xff]  }
  0xcf   :  { %464 = vmatprep.subr.bf16.mxu0 %v3973_v55 }
  0xd1   :  { %713 = vmatpush1.bf16.msra.mxu1 %v4017_v7  ;;  %v4045_v7 = vld [vmem:[#allocation15 + $0x4] ss:$16 sps:$4 sm:$0xff]  }
  0xd2   :  { %465 = vmatpush1.bf16.msra.mxu0 %v3975_v57  ;;  %714 = vmatprep.subr.bf16.mxu1 %v4018_v8  ;;  %v4043_v8 = vld [vmem:[#allocation15] ss:$16 sps:$4 sm:$0xff]  }
  0xd3   :  { %3794 = vmatprep.subr.bf16.mxu0 %v4024_v12  ;;  %v4049_v12 = vld [vmem:[#allocation15 + $0x20] ss:$16 sps:$4 sm:$0xff]  }
  0xd5   :  { %467 = vmatmul.mubr.bf16.vlgmr.msra.gmra.mrb[0].mxu0 %v261_v63  ;;  %715 = vmatpush1.bf16.msra.mxu1 %v4020_v9  ;;  %v4048_v9 = vld [vmem:[#allocation14 + $0x24] ss:$16 sps:$4 sm:$0xff]  }
  0xd6   :  { %716 = vmatprep.subr.bf16.mxu1 %v4021_v10  ;;  %3795 = vmatpush3.bf16.msra.mxu0 %v4025_v13  ;;  %v4046_v10 = vld [vmem:[#allocation14 + $0x20] ss:$16 sps:$4 sm:$0xff]   ;;  %v4054_v13 = vld [vmem:[#allocation14 + $0x44] ss:$16 sps:$4 sm:$0xff]  }
  0xd7   :  { %3796 = vmatprep.subr.bf16.mxu0 %v4026_v14  ;;  %v4052_v14 = vld [vmem:[#allocation14 + $0x40] ss:$16 sps:$4 sm:$0xff]  }
  0xd9   :  { %717 = vmatpush1.bf16.msra.mxu1 %v4023_v11  ;;  %v4051_v11 = vld [vmem:[#allocation15 + $0x24] ss:$16 sps:$4 sm:$0xff]  }
  0xda   :  { %3797 = vmatpush3.bf16.msra.mxu0 %v4027_v15  ;;  %1471 = vmatprep.subr.bf16.mxu1 %v4045_v7  ;;  %v4057_v15 = vld [vmem:[#allocation15 + $0x44] ss:$16 sps:$4 sm:$0xff]  }
  0xdb   :  { %3798 = vmatprep.subr.bf16.mxu0 %v4028_v16  ;;  %v4055_v16 = vld [vmem:[#allocation15 + $0x40] ss:$16 sps:$4 sm:$0xff]  }
  0xde   :  { %3799 = vmatpush3.bf16.msra.mxu0 %v4029_v17  ;;  %v4060_v17 = vld [vmem:[#allocation14 + $0x64] ss:$16 sps:$4 sm:$0xff]  }
  0xdf   :  { %3800 = vmatprep.subr.bf16.mxu0 %v4030_v18  ;;  %v4058_v18 = vld [vmem:[#allocation14 + $0x60] ss:$16 sps:$4 sm:$0xff]  }
  0xe2   :  { %3801 = vmatpush3.bf16.msra.mxu0 %v4031_v19  ;;  %v4063_v19 = vld [vmem:[#allocation15 + $0x64] ss:$16 sps:$4 sm:$0xff]  }
  0xe3   :  { %3802 = vmatprep.subr.bf16.mxu0 %v4032_v20  ;;  %v4061_v20 = vld [vmem:[#allocation15 + $0x60] ss:$16 sps:$4 sm:$0xff]  }
  0xe6   :  { %3803 = vmatpush3.bf16.msra.mxu0 %v4033_v21  ;;  %v4066_v21 = vld [vmem:[#allocation14 + $0x84] ss:$16 sps:$4 sm:$0xff]  }
  0xe7   :  { %3804 = vmatprep.subr.bf16.mxu0 %v4034_v22  ;;  %v4064_v22 = vld [vmem:[#allocation14 + $0x80] ss:$16 sps:$4 sm:$0xff]  }
  0xea   :  { %3805 = vmatpush3.bf16.msra.mxu0 %v4035_v44 }
  0xeb   :  { %3806 = vmatprep.subr.bf16.mxu0 %v4036_v45 }
  0xee   :  { %3807 = vmatpush3.bf16.msra.mxu0 %v4037_v46 }
  0xef   :  { %3808 = vmatprep.subr.bf16.mxu0 %v4038_v47 }
  0xf2   :  { %3809 = vmatpush3.bf16.msra.mxu0 %v4039_v48 }
  0xf3   :  { %1160 = vmatprep.subr.bf16.mxu0 %v4042_v5 }
 0x1a8   :  { %v468_v30 = vpop.f32.mrb[0].mxu0 }
 0x1a9   :  { %v469_v31 = vadd.f32 %v468_v30, %v267_v28  ;;  %v470_v32 = vpop.f32.mrb[1].mxu0  ;;  %v4075_v30 = vld [vmem:[#allocation15 + $0xa4] ss:$16 sps:$4 sm:$0xff]  }
 0x1aa   :  { %v471_v33 = vadd.f32 %v470_v32, %v271_v29  ;;  %v472_v34 = vpop.f32.mrb[2].mxu0  ;;  %v4078_v32 = vld [vmem:[#allocation14 + $0xc4] ss:$16 sps:$4 sm:$0xff]  }
 0x1ab   :  { %v473_v35 = vadd.f32 %v472_v34, %v267_v28  ;;  %v474_v36 = vpop.f32.mrb[3].mxu0  ;;  %v477_v38 = vmax.f32 %v469_v31, 0.0  ;;  %v4072_v28 = vld [vmem:[#allocation14 + $0xa4] ss:$16 sps:$4 sm:$0xff]   ;;  %v4073_v31 = vld [vmem:[#allocation15 + $0xa0] ss:$16 sps:$4 sm:$0xff]  }
 0x1ac   :  { %v475_v37 = vadd.f32 %v474_v36, %v271_v29  ;;  %v478_v40 = vmax.f32 %v471_v33, 0.0  ;;  %v4070_v29 = vld [vmem:[#allocation14 + $0xa0] ss:$16 sps:$4 sm:$0xff]   ;;  %v4081_v34 = vld [vmem:[#allocation15 + $0xc4] ss:$16 sps:$4 sm:$0xff]  }
 0x1ad   :  { %v479_v39 = vmax.f32 %v473_v35, 0.0  ;;  %v4076_v33 = vld [vmem:[#allocation14 + $0xc0] ss:$16 sps:$4 sm:$0xff]  }
 0x1ae   :  { %v480_v41 = vmax.f32 %v475_v37, 0.0  ;;  %v4079_v35 = vld [vmem:[#allocation15 + $0xc0] ss:$16 sps:$4 sm:$0xff]   ;;  %v4084_v37 = vld [vmem:[#allocation14 + $0xe4] ss:$16 sps:$4 sm:$0xff]  }
 0x1af   :  { %v513_v42 = vpack.c.bf16 %v479_v39, %v477_v38  ;;  %v4082_v36 = vld [vmem:[#allocation14 + $0xe0] ss:$16 sps:$4 sm:$0xff]   ;;  %v4087_v39 = vld [vmem:[#allocation15 + $0xe4] ss:$16 sps:$4 sm:$0xff]  }
 0x1b0   :  { %v514_v43 = vpack.c.bf16 %v480_v41, %v478_v40  ;;  %v4085_v38 = vld [vmem:[#allocation15 + $0xe0] ss:$16 sps:$4 sm:$0xff]   ;;  %v5535_v40 = vmov 0   ;;  %v4090_v41 = vld [vmem:[#allocation14 + $0xc] ss:$16 sps:$4 sm:$0xff]  }
 0x1b2   :  { %718 = vmatprep.mubr.bf16.mxu1 %v514_v43  ;;  %v211_v43 = vld [vmem:[#allocation17 + $0x2] ss:$0 sm:$0xff] }
 0x1b3   :  { %719 = vmatmul.mubr.bf16.vlgmr.msra.gmra.mrb[0].mxu1 %v513_v42 }
 0x1b4   :  { %1472 = vmatpush1.bf16.msra.mxu1 %v4043_v8  ;;  %1503 = vmatprep.mubr.bf16.mxu1 %v5535_v40 }
 0x1b5   :  { %1473 = vmatprep.subr.bf16.mxu1 %v4051_v11 }
 0x1b8   :  { %1474 = vmatpush1.bf16.msra.mxu1 %v4049_v12 }
 0x1b9   :  { %1475 = vmatprep.subr.bf16.mxu1 %v4057_v15 }
 0x1bc   :  { %1476 = vmatpush1.bf16.msra.mxu1 %v4055_v16 }
 0x1bd   :  { %1477 = vmatprep.subr.bf16.mxu1 %v4063_v19 }
 0x1c0   :  { %1478 = vmatpush1.bf16.msra.mxu1 %v4061_v20 }
 0x1c1   :  { %1479 = vmatprep.subr.bf16.mxu1 %v4069_v23 }
 0x1c4   :  { %1480 = vmatpush1.bf16.msra.mxu1 %v4067_v26 }
 0x1c5   :  { %1481 = vmatprep.subr.bf16.mxu1 %v4075_v30 }
 0x1c8   :  { %1482 = vmatpush1.bf16.msra.mxu1 %v4073_v31 }
 0x1c9   :  { %1483 = vmatprep.subr.bf16.mxu1 %v4081_v34 }
 0x1cc   :  { %1484 = vmatpush1.bf16.msra.mxu1 %v4079_v35 }
 0x1cd   :  { %1485 = vmatprep.subr.bf16.mxu1 %v4087_v39 }
 0x1d0   :  { %1486 = vmatpush1.bf16.msra.mxu1 %v4085_v38 }
 0x286   :  { %v720_v52 = vpop.f32.mrb[0].mxu1 }
 0x287   :  { %v721_v53 = vadd.f32 %v720_v52, %v519_v50  ;;  %v722_v54 = vpop.f32.mrb[1].mxu1 }
 0x288   :  { %v723_v55 = vadd.f32 %v722_v54, %v523_v51  ;;  %v724_v56 = vpop.f32.mrb[2].mxu1 }
 0x289   :  { %v725_v57 = vadd.f32 %v724_v56, %v519_v50  ;;  %v726_v58 = vpop.f32.mrb[3].mxu1  ;;  %v729_v60 = vmax.f32 %v721_v53, 0.0 }
 0x28a   :  { %v727_v59 = vadd.f32 %v726_v58, %v523_v51  ;;  %v730_v62 = vmax.f32 %v723_v55, 0.0 }
 0x28b   :  { %v731_v61 = vmax.f32 %v725_v57, 0.0 }
 0x28c   :  { %v732_v63 = vmax.f32 %v727_v59, 0.0 }
 0x28d   :  { %v765_v3 = vpack.c.bf16 %v731_v61, %v729_v60 }
 0x28e   :  { %v766_v4 = vpack.c.bf16 %v732_v63, %v730_v62 }
 0x290   :  { %895 = vmatprep.mubr.bf16.mxu0 %v766_v4 }
 0x291   :  { %896 = vmatmul.mubr.bf16.vlgmr.msra.gmra.mrb[4].mxu0 %v765_v3 }
 0x292   :  { %1161 = vmatpush1.bf16.msra.mxu0 %v4040_v6  ;;  %1192 = vmatprep.mubr.bf16.mxu0 %v5535_v40 }
 0x293   :  { %1162 = vmatprep.subr.bf16.mxu0 %v4048_v9 }
 0x296   :  { %1163 = vmatpush1.bf16.msra.mxu0 %v4046_v10 }
 0x297   :  { %1164 = vmatprep.subr.bf16.mxu0 %v4054_v13 }
 0x29a   :  { %1165 = vmatpush1.bf16.msra.mxu0 %v4052_v14 }
 0x29b   :  { %1166 = vmatprep.subr.bf16.mxu0 %v4060_v17 }
 0x29e   :  { %1167 = vmatpush1.bf16.msra.mxu0 %v4058_v18 }
 0x29f   :  { %1168 = vmatprep.subr.bf16.mxu0 %v4066_v21 }
 0x2a2   :  { %1169 = vmatpush1.bf16.msra.mxu0 %v4064_v22 }
 0x2a3   :  { %1170 = vmatprep.subr.bf16.mxu0 %v4072_v28 }
 0x2a6   :  { %1171 = vmatpush1.bf16.msra.mxu0 %v4070_v29 }
 0x2a7   :  { %1172 = vmatprep.subr.bf16.mxu0 %v4078_v32 }
 0x2aa   :  { %1173 = vmatpush1.bf16.msra.mxu0 %v4076_v33 }
 0x2ab   :  { %1174 = vmatprep.subr.bf16.mxu0 %v4084_v37 }
 0x2ae   :  { %1175 = vmatpush1.bf16.msra.mxu0 %v4082_v36 }
 0x2af   :  { %1203 = vmatprep.subr.bf16.mxu0 %v4090_v41 }
 0x364   :  { %v3810_v42 = vpop.f32.mrb[4].mxu0 }
 0x365   :  { %v3811_v44 = vpop.f32.mrb[5].mxu0 }
 0x366   :  { %v3812_v45 = vadd.f32 %v3811_v44, %v3810_v42  ;;  %v3813_v46 = vpop.f32.mrb[6].mxu0  ;;  %v212_v42 = vld [vmem:[#allocation17 + $0x3] ss:$0 sm:$0xff] }
 0x367   :  { %v3814_v47 = vpop.f32.mrb[7].mxu0 }
 0x368   :  { %v898_v48 = vadd.f32 %v3812_v45, %v211_v43  ;;  %v3815_v49 = vadd.f32 %v3814_v47, %v3813_v46  ;;  %v213_v46 = vld [vmem:[#allocation17 + $0x4] ss:$0 sm:$0xff] }
 0x36a   :  { %v904_v50 = vmax.f32 %v898_v48, 0.0  ;;  %v901_v51 = vadd.f32 %v3815_v49, %v211_v43 }
 0x36c   :  { %v906_v52 = vrot.slane %v904_v50, 4  ;;  %v905_v53 = vmax.f32 %v901_v51, 0.0 }
 0x36e   :  { %v907_v54 = vadd.f32 %v906_v52, %v904_v50  ;;  %v912_v55 = vrot.slane %v905_v53, 4  ;;  %v4093_v52 = vld [vmem:[#allocation14 + $0x2c] ss:$16 sps:$4 sm:$0xff]  }
 0x370   :  { %v908_v56 = vrot.slane %v907_v54, 2  ;;  %v913_v57 = vadd.f32 %v912_v55, %v905_v53  ;;  %v4094_v55 = vld [vmem:[#allocation14 + $0x48] ss:$16 sps:$4 sm:$0xff]  }
 0x372   :  { %v909_v58 = vadd.f32 %v908_v56, %v907_v54  ;;  %v914_v59 = vrot.slane %v913_v57, 2  ;;  %v4096_v54 = vld [vmem:[#allocation14 + $0x4c] ss:$16 sps:$4 sm:$0xff]  }
 0x373   :  { %v4099_v56 = vld [vmem:[#allocation14 + $0x6c] ss:$16 sps:$4 sm:$0xff]  }
 0x374   :  { %v910_v60 = vrot.slane %v909_v58, 1  ;;  %v915_v61 = vadd.f32 %v914_v59, %v913_v57  ;;  %v4097_v57 = vld [vmem:[#allocation14 + $0x68] ss:$16 sps:$4 sm:$0xff]  }
 0x375   :  { %v4100_v59 = vld [vmem:[#allocation14 + $0x88] ss:$16 sps:$4 sm:$0xff]  }
 0x376   :  { %v911_v62 = vadd.f32 %v910_v60, %v909_v58  ;;  %v916_v63 = vrot.slane %v915_v61, 1  ;;  %v4102_v58 = vld [vmem:[#allocation14 + $0x8c] ss:$16 sps:$4 sm:$0xff]  }
 0x377   :  { %v4105_v60 = vld [vmem:[#allocation14 + $0xac] ss:$16 sps:$4 sm:$0xff]  }
 0x378   :  { %v919_v3 = vmul.f32 0.125, %v911_v62  ;;  %v917_v4 = vadd.f32 %v916_v63, %v915_v61  ;;  %v4103_v61 = vld [vmem:[#allocation14 + $0xa8] ss:$16 sps:$4 sm:$0xff]   ;;  %v4108_v62 = vld [vmem:[#allocation14 + $0xcc] ss:$16 sps:$4 sm:$0xff]  }
 0x379   :  { %v4106_v63 = vld [vmem:[#allocation14 + $0xc8] ss:$16 sps:$4 sm:$0xff]  }
 0x37a   :  { %v921_v5 = vsub.f32 %v904_v50, %v919_v3  ;;  %v920_v6 = vmul.f32 0.125, %v917_v4  ;;  %v4088_v50 = vld [vmem:[#allocation14 + $0x8] ss:$16 sps:$4 sm:$0xff]   ;;  %v4111_v3 = vld [vmem:[#allocation14 + $0xec] ss:$16 sps:$4 sm:$0xff]  }
 0x37b   :  { %v4109_v4 = vld [vmem:[#allocation14 + $0xe8] ss:$16 sps:$4 sm:$0xff]  }
 0x37c   :  { %v923_v7 = vmul.f32 %v921_v5, %v921_v5  ;;  %v922_v8 = vsub.f32 %v905_v53, %v920_v6  ;;  %v4091_v53 = vld [vmem:[#allocation14 + $0x28] ss:$16 sps:$4 sm:$0xff]  }
 0x37d   :  { %v4112_v6 = vld [vmem:[#allocation15 + $0x8] ss:$16 sps:$4 sm:$0xff]  }
 0x37e   :  { %v925_v9 = vrot.slane %v923_v7, 4  ;;  %v924_v10 = vmul.f32 %v922_v8, %v922_v8 }
 0x380   :  { %v926_v11 = vadd.f32 %v925_v9, %v923_v7  ;;  %v931_v12 = vrot.slane %v924_v10, 4  ;;  %v4117_v7 = vld [vmem:[#allocation15 + $0x2c] ss:$16 sps:$4 sm:$0xff]  }
 0x381   :  { %v4120_v9 = vld [vmem:[#allocation15 + $0x4c] ss:$16 sps:$4 sm:$0xff]  }
 0x382   :  { %v927_v13 = vrot.slane %v926_v11, 2  ;;  %v932_v14 = vadd.f32 %v931_v12, %v924_v10  ;;  %v4118_v10 = vld [vmem:[#allocation15 + $0x48] ss:$16 sps:$4 sm:$0xff]  }
 0x383   :  { %v4121_v12 = vld [vmem:[#allocation15 + $0x68] ss:$16 sps:$4 sm:$0xff]  }
 0x384   :  { %v928_v15 = vadd.f32 %v927_v13, %v926_v11  ;;  %v933_v16 = vrot.slane %v932_v14, 2  ;;  %v4123_v11 = vld [vmem:[#allocation15 + $0x6c] ss:$16 sps:$4 sm:$0xff]  }
 0x385   :  { %v4126_v13 = vld [vmem:[#allocation15 + $0x8c] ss:$16 sps:$4 sm:$0xff]  }
 0x386   :  { %v929_v17 = vrot.slane %v928_v15, 1  ;;  %v934_v18 = vadd.f32 %v933_v16, %v932_v14  ;;  %v4124_v14 = vld [vmem:[#allocation15 + $0x88] ss:$16 sps:$4 sm:$0xff]  }
 0x387   :  { %v4127_v16 = vld [vmem:[#allocation15 + $0xa8] ss:$16 sps:$4 sm:$0xff]  }
 0x388   :  { %v930_v19 = vadd.f32 %v929_v17, %v928_v15  ;;  %v935_v20 = vrot.slane %v934_v18, 1  ;;  %v4129_v15 = vld [vmem:[#allocation15 + $0xac] ss:$16 sps:$4 sm:$0xff]  }
 0x389   :  { %v4132_v17 = vld [vmem:[#allocation15 + $0xcc] ss:$16 sps:$4 sm:$0xff]  }
 0x38a   :  { %v938_v21 = vmul.f32 0.14285715, %v930_v19  ;;  %v936_v22 = vadd.f32 %v935_v20, %v934_v18  ;;  %v4130_v18 = vld [vmem:[#allocation15 + $0xc8] ss:$16 sps:$4 sm:$0xff]   ;;  %v4135_v19 = vld [vmem:[#allocation15 + $0xec] ss:$16 sps:$4 sm:$0xff]  }
 0x38b   :  { %v4133_v20 = vld [vmem:[#allocation15 + $0xe8] ss:$16 sps:$4 sm:$0xff]  }
 0x38c   :  { %v940_v23 = vadd.f32 1e-08, %v938_v21  ;;  %v939_v26 = vmul.f32 0.14285715, %v936_v22  ;;  %v4604_v22 = vcvt.s32.f32 %v4581_v24 }
 0x38d   :  { %v215_v21 = vld [vmem:[#allocation17 + $0x5] ss:$8 sm:$0xf] }
 0x38e   :  { %4136 = vrsqrt.f32 %v940_v23  ;;  %v941_v28 = vadd.f32 1e-08, %v939_v26  ;;  %vm944_vm0 = vcmp.eq.f32.partialorder %v940_v23, inf  ;;  %v947_v31 = vand.u32 2147483648, %v940_v23 }
 0x38f   :  { %vm946_vm1 = vcmp.eq.f32.partialorder %v940_v23, 0.0  ;;  %v1254_v26 = vrot.slane %v215_v21, %v4587_v27 }
 0x390   :  { %4138 = vrsqrt.f32 %v941_v28  ;;  %vm951_vm2 = vcmp.eq.f32.partialorder %v941_v28, inf  ;;  %v954_v36 = vand.u32 2147483648, %v941_v28  ;;  %vm953_vm3 = vcmp.eq.f32.partialorder %v941_v28, 0.0 }
 0x398   :  { %v4137_v29 = vpop.eup %4136 }
 0x399   :  { %v943_v30 = vmul.f32 %v4137_v29, %v940_v23  ;;  %v1268_v29 = vmul.f32 %v1254_v26, %v4604_v22 }
 0x39a   :  { %v4139_v32 = vpop.eup %4138 }
 0x39b   :  { %v945_v33 = vsel %vm944_vm0, %v940_v23, %v943_v30  ;;  %v950_v35 = vmul.f32 %v4139_v32, %v941_v28  ;;  %v1250_v23 = vrot.slane %v215_v21, %v4584_v25 }
 0x39c   :  { %v948_v34 = vsel %vm946_vm1, %v947_v31, %v945_v33 }
 0x39d   :  { %4140 = vrcp.f32 %v948_v34  ;;  %v952_v37 = vsel %vm951_vm2, %v941_v28, %v950_v35  ;;  %v1267_v28 = vmul.f32 %v1250_v23, %v4604_v22 }
 0x39e   :  { %v955_v38 = vsel %vm953_vm3, %v954_v36, %v952_v37 }
 0x39f   :  { %4142 = vrcp.f32 %v955_v38 }
 0x3a7   :  { %v4141_v39 = vpop.eup %4140 }
 0x3a8   :  { %v957_v41 = vmul.f32 %v4141_v39, %v921_v5  ;;  %v4114_v5 = vld [vmem:[#allocation15 + $0xc] ss:$16 sps:$4 sm:$0xff]  }
 0x3a9   :  { %v4143_v43 = vpop.eup %4142 }
 0x3aa   :  { %v959_v44 = vmul.f32 %v4143_v43, %v922_v8  ;;  %v960_v45 = vmul.f32 %v957_v41, %v212_v42  ;;  %v4115_v8 = vld [vmem:[#allocation15 + $0x28] ss:$16 sps:$4 sm:$0xff]  }
 0x3ac   :  { %v961_v47 = vmul.f32 %v959_v44, %v212_v42  ;;  %v962_v48 = vadd.f32 %v960_v45, %v213_v46 }
 0x3ae   :  { %v963_v49 = vadd.f32 %v961_v47, %v213_v46  ;;  %v219_v47 = vld [vmem:[#allocation17 + $0x7] ss:$8 sm:$0xf] }
 0x3b0   :  { %v4595_v51 = vpack.c.bf16 %v963_v49, %v962_v48  ;;  %v4626_v48 = vld [vmem:[#allocation17 + $0x6] ss:$8 sm:$0xf]  ;;  %v4629_v49 = vsub.s32 2, %v4581_v24 }
 0x3b2   :  { %1193 = vmatmul.mubr.bf16.vlgmr.msra.gmra.mrb[8].mxu0 %v4595_v51  ;;  %1504 = vmatmul.mubr.bf16.vlgmr.msra.gmra.mrb[4].mxu1 %v4595_v51  ;;  %5556 = vst [vmem:[#allocation40_spill] sm:$0xff] %v4629_v49 }
 0x3b3   :  { %1204 = vmatpush1.bf16.msra.mxu0 %v4088_v50  ;;  %1235 = vmatprep.mubr.bf16.mxu0 %v5535_v40  ;;  %v4632_v50 = vsub.s32 3, %v4581_v24 }
 0x3b4   :  { %1205 = vmatprep.subr.bf16.mxu0 %v4093_v52  ;;  %v2646_v52 = vrot.slane %v219_v47, %v4587_v27 }
 0x3b7   :  { %1206 = vmatpush1.bf16.msra.mxu0 %v4091_v53  ;;  %v1561_v53 = vrot.slane %v4626_v48, %v4584_v25 }
 0x3b8   :  { %1207 = vmatprep.subr.bf16.mxu0 %v4096_v54  ;;  %v1565_v54 = vrot.slane %v4626_v48, %v4587_v27 }
 0x3bb   :  { %1208 = vmatpush1.bf16.msra.mxu0 %v4094_v55  ;;  %v4381_v55 = vmov 1966171168  }
 0x3bc   :  { %1209 = vmatprep.subr.bf16.mxu0 %v4099_v56  ;;  %v1603_v56 = vunpack.c.l.s4 %v4381_v55 }
 0x3bf   :  { %1210 = vmatpush1.bf16.msra.mxu0 %v4097_v57  ;;  %v1258_v57 = vrot.slane %v215_v21, %v4629_v49 }
 0x3c0   :  { %1211 = vmatprep.subr.bf16.mxu0 %v4102_v58  ;;  %v1262_v58 = vrot.slane %v215_v21, %v4632_v50 }
 0x3c3   :  { %1212 = vmatpush1.bf16.msra.mxu0 %v4100_v59 }
 0x3c4   :  { %1213 = vmatprep.subr.bf16.mxu0 %v4105_v60  ;;  %v2660_v60 = vpack.c.bf16 %v2646_v52, %v2646_v52 }
 0x3c7   :  { %1214 = vmatpush1.bf16.msra.mxu0 %v4103_v61  ;;  %v1578_v61 = vmul.f32 %v1561_v53, %v4604_v22 }
 0x3c8   :  { %1215 = vmatprep.subr.bf16.mxu0 %v4108_v62  ;;  %v1579_v62 = vmul.f32 %v1565_v54, %v4604_v22 }
 0x3cb   :  { %1216 = vmatpush1.bf16.msra.mxu0 %v4106_v63  ;;  %v1604_v63 = vunpack.c.0.s8 %v1603_v56 }
 0x3cc   :  { %1217 = vmatprep.subr.bf16.mxu0 %v4111_v3  ;;  %v1269_v3 = vmul.f32 %v1258_v57, %v4604_v22 }
 0x3cf   :  { %1218 = vmatpush1.bf16.msra.mxu0 %v4109_v4  ;;  %v1270_v4 = vmul.f32 %v1262_v58, %v4604_v22 }
 0x3d0   :  { %1514 = vmatprep.subr.bf16.mxu0 %v4114_v5 }
 0x3d2   :  { %1236 = vmatmul.mubr.bf16.vlgmr.msra.gmra.mrb[12].mxu0 %v4595_v51 }
 0x3d3   :  { %1515 = vmatpush1.bf16.msra.mxu0 %v4112_v6  ;;  %1546 = vmatprep.mubr.bf16.mxu0 %v5535_v40  ;;  %v2671_v6 = vpack.i.b16 %v2660_v60, %v2660_v60 }
 0x3d4   :  { %1516 = vmatprep.subr.bf16.mxu0 %v4117_v7 }
 0x3d7   :  { %1517 = vmatpush1.bf16.msra.mxu0 %v4115_v8 }
 0x3d8   :  { %1518 = vmatprep.subr.bf16.mxu0 %v4120_v9  ;;  %v2650_v9 = vrot.slane %v219_v47, %v4629_v49 }
 0x3db   :  { %1519 = vmatpush1.bf16.msra.mxu0 %v4118_v10 }
 0x3dc   :  { %1520 = vmatprep.subr.bf16.mxu0 %v4123_v11 }
 0x3df   :  { %1521 = vmatpush1.bf16.msra.mxu0 %v4121_v12  ;;  %v4648_v12 = vsub.s32 %v1604_v63, %v4581_v24 }
 0x3e0   :  { %1522 = vmatprep.subr.bf16.mxu0 %v4126_v13 }
 0x3e3   :  { %1523 = vmatpush1.bf16.msra.mxu0 %v4124_v14 }
 0x3e4   :  { %1524 = vmatprep.subr.bf16.mxu0 %v4129_v15 }
 0x3e7   :  { %1525 = vmatpush1.bf16.msra.mxu0 %v4127_v16  ;;  %v2654_v16 = vrot.slane %v219_v47, %v4632_v50 }
 0x3e8   :  { %1526 = vmatprep.subr.bf16.mxu0 %v4132_v17 }
 0x3eb   :  { %1527 = vmatpush1.bf16.msra.mxu0 %v4130_v18 }
 0x3ec   :  { %1528 = vmatprep.subr.bf16.mxu0 %v4135_v19 }
 0x3ef   :  { %1529 = vmatpush1.bf16.msra.mxu0 %v4133_v20 }
 0x3f2   :  { %1547 = vmatmul.mubr.bf16.vlgmr.msra.gmra.mrb[16].mxu0 %v4595_v51  ;;  %v2642_v51 = vrot.slane %v219_v47, %v4584_v25 }
 0x3f4   :  { %v2659_v59 = vpack.c.bf16 %v2642_v51, %v2642_v51 }
 0x3f6   :  { %v2664_v5 = vpack.i.b16 %v2659_v59, %v2659_v59 }
 0x485   :  { %v1194_v30 = vpop.f32.mrb[8].mxu0  ;;  %v1505_v31 = vpop.f32.mrb[4].mxu1 }
 0x486   :  { %v4610_v32 = vadd.f32 %v1267_v28, %v1194_v30  ;;  %v1196_v33 = vpop.f32.mrb[9].mxu0  ;;  %v1507_v34 = vpop.f32.mrb[5].mxu1  ;;  %v1582_v7 = vadd.f32 %v1578_v61, %v1505_v31 }
 0x487   :  { %v4612_v35 = vadd.f32 %v1268_v29, %v1196_v33  ;;  %v1198_v36 = vpop.f32.mrb[10].mxu0  ;;  %v1509_v37 = vpop.f32.mrb[6].mxu1  ;;  %v1583_v8 = vadd.f32 %v1579_v62, %v1507_v34 }
 0x488   :  { %v4614_v38 = vadd.f32 %v1267_v28, %v1198_v36  ;;  %v1200_v39 = vpop.f32.mrb[11].mxu0  ;;  %v1511_v41 = vpop.f32.mrb[7].mxu1  ;;  %v1586_v10 = vadd.f32 %v1578_v61, %v1509_v37 }
 0x489   :  { %v1598_v42 = vcombine.low %v4610_v32, %v4612_v35  ;;  %v1599_v43 = vcombine.high %v4610_v32, %v4612_v35  ;;  %v4620_v44 = vadd.f32 %v1268_v29, %v1200_v39  ;;  %v1587_v13 = vadd.f32 %v1579_v62, %v1511_v41 }
 0x48b   :  { %v1666_v45 = vcombine.low %v4614_v38, %v4620_v44  ;;  %v1667_v46 = vcombine.high %v4614_v38, %v4620_v44 }
 0x4a5   :  { %v1237_v11 = vpop.f32.mrb[12].mxu0 }
 0x4a6   :  { %v1273_v14 = vadd.f32 %v1269_v3, %v1237_v11  ;;  %v1239_v15 = vpop.f32.mrb[13].mxu0 }
 0x4a7   :  { %4307 = shalt.err (!%p4304_p2)  }
 0x4a8   :  { %s4308_s4 = scalar_lea.vmem %s205_s23, 2048  ;;  %p4313_p4 = scmp.lt.s32.totalorder %s205_s23, %s205_s23 }
 0x4a9   :  { %p4309_p3 = scmp.ne.s32.totalorder %s205_s23, %s4308_s4  ;;  %p4314_p5 = scmp.lt.s32.totalorder %s4308_s4, %s4308_s4 }
 0x4ab   :  { %p4315_p6 = por %p4314_p5, %p4313_p4 }
 0x4ad   :  { %p4316_p7 = pnand %p4315_p6, %p4309_p3 }
 0x4af   :  { %4319 = shalt.err (!%p4316_p7)  }
 0x4b0   :  { %207 = dma.hbm_to_vmem [thread:$0]  %s5532_s8, 2048, %s205_s23, [#allocation5 + $0x2]  ;;  %v1274_v24 = vadd.f32 %v1270_v4, %v1239_v15  ;;  %v4664_v17 = vrot.slane %v2664_v5, %v4584_v25  ;;  %v4667_v18 = vrot.slane %v2671_v6, %v4584_v25  ;;  %v1241_v19 = vpop.f32.mrb[14].mxu0  ;;  %v4669_v20 = vpack.c.bf16 %v1582_v7, %v1582_v7 }
 0x4b1   :  { %v4671_v21 = vpack.c.bf16 %v1583_v8, %v1583_v8  ;;  %v1277_v23 = vadd.f32 %v1269_v3, %v1241_v19  ;;  %v1243_v26 = vpop.f32.mrb[15].mxu0  ;;  %v2661_v28 = vpack.c.bf16 %v2650_v9, %v2650_v9  ;;  %v4673_v29 = vpack.c.bf16 %v1586_v10, %v1586_v10 }
 0x4b2   :  { %v1600_v30 = vcombine.low %v1273_v14, %v1274_v24  ;;  %v1601_v31 = vcombine.high %v1273_v14, %v1274_v24  ;;  %v1278_v33 = vadd.f32 %v1270_v4, %v1243_v26  ;;  %v1608_v34 = vrot.slane %v1598_v42, %v4648_v12 }
 0x4b3   :  { %5557 = vst [vmem:[#allocation41_spill] sm:$0xff] %v4673_v29  ;;  %v1615_v36 = vrot.slane %v1599_v43, %v4648_v12  ;;  %v4683_v37 = vpack.c.bf16 %v1587_v13, %v1587_v13  ;;  %v2662_v39 = vpack.c.bf16 %v2654_v16, %v2654_v16  ;;  %v4691_v53 = vrot.slane %v1666_v45, %v4648_v12 }
 0x4b4   :  { %v1622_v41 = vrot.slane %v1600_v30, %v4648_v12  ;;  %v1629_v47 = vrot.slane %v1601_v31, %v4648_v12  ;;  %v1668_v51 = vcombine.low %v1277_v23, %v1278_v33  ;;  %v1669_v52 = vcombine.high %v1277_v23, %v1278_v33 }
 0x4b5   :  { %5558 = vst [vmem:[#allocation42_spill] sm:$0xff] %v4683_v37  ;;  %v1569_v42 = vrot.slane %v4626_v48, %v4629_v49  ;;  %v2678_v32 = vpack.i.b16 %v2661_v28, %v2661_v28  ;;  %v1573_v35 = vrot.slane %v4626_v48, %v4632_v50  ;;  %v4701_v57 = vrot.slane %v1667_v46, %v4648_v12 }
 0x4b6   :  { %v1630_v43 = vcombine.low %v1608_v34, %v1622_v41  ;;  %v1631_v54 = vcombine.high %v1608_v34, %v1622_v41  ;;  %v1632_v55 = vcombine.low %v1615_v36, %v1629_v47  ;;  %v1633_v56 = vcombine.high %v1615_v36, %v1629_v47 }
 0x4b7   :  { %v4704_v45 = vrot.slane %v1668_v51, %v4648_v12  ;;  %v4707_v58 = vrot.slane %v1669_v52, %v4648_v12  ;;  %v2685_v59 = vpack.i.b16 %v2662_v39, %v2662_v39  ;;  %v4722_v4 = vmul.f32 %v1569_v42, %v4604_v22 }
 0x4b8   :  { %v1640_v60 = vrot.slane %v1630_v43, %v4648_v12  ;;  %v1647_v48 = vrot.slane %v1632_v55, %v4648_v12  ;;  %v1654_v61 = vrot.slane %v1631_v54, %v4648_v12  ;;  %v1661_v62 = vrot.slane %v1633_v56, %v4648_v12 }
 0x4b9   :  { %v4725_v5 = vrot.slane %v2678_v32, %v4584_v25  ;;  %v4728_v6 = vmul.f32 %v1573_v35, %v4604_v22  ;;  %v4731_v10 = vrot.slane %v2685_v59, %v4584_v25 }
 0x4ba   :  { %v1662_v3 = vcombine.high %v1640_v60, %v1640_v60  ;;  %v1663_v7 = vcombine.high %v1647_v48, %v1647_v48  ;;  %v1664_v8 = vcombine.high %v1654_v61, %v1654_v61  ;;  %v1665_v9 = vcombine.high %v1661_v62, %v1661_v62 }
 0x4bb   :  { %5559 = vst [vmem:[#allocation43_spill] sm:$0xff] %v4725_v5  ;;  %5560 = vst [vmem:[#allocation44_spill] sm:$0xff] %v4728_v6  ;;  %v1737_v11 = vrot.slane %v1640_v60, %v4584_v25  ;;  %v1741_v13 = vrot.slane %v1640_v60, %v4587_v27  ;;  %v1745_v14 = vrot.slane %v1640_v60, %v4629_v49 }
 0x4bc   :  { %5561 = vst [vmem:[#allocation45_spill] sm:$0xff] %v4731_v10  ;;  %v1749_v15 = vrot.slane %v1640_v60, %v4632_v50  ;;  %v1753_v16 = vrot.slane %v1654_v61, %v4584_v25  ;;  %v1757_v24 = vrot.slane %v1654_v61, %v4587_v27  ;;  %v1761_v22 = vrot.slane %v1654_v61, %v4629_v49 }
 0x4bd   :  { %v1765_v19 = vrot.slane %v1654_v61, %v4632_v50  ;;  %v1769_v23 = vrot.slane %v1662_v3, %v4584_v25  ;;  %v1773_v26 = vrot.slane %v1662_v3, %v4587_v27  ;;  %v1777_v28 = vrot.slane %v1662_v3, %v4629_v49 }
 0x4be   :  { %v1781_v30 = vrot.slane %v1662_v3, %v4632_v50  ;;  %v1785_v31 = vrot.slane %v1664_v8, %v4584_v25  ;;  %v1789_v33 = vrot.slane %v1664_v8, %v4587_v27  ;;  %v1793_v34 = vrot.slane %v1664_v8, %v4629_v49 }
 0x4bf   :  { %v1797_v36 = vrot.slane %v1664_v8, %v4632_v50  ;;  %v1801_v39 = vrot.slane %v1647_v48, %v4584_v25  ;;  %v1805_v41 = vrot.slane %v1647_v48, %v4587_v27  ;;  %v1809_v47 = vrot.slane %v1647_v48, %v4629_v49 }
 0x4c0   :  { %v1813_v51 = vrot.slane %v1647_v48, %v4632_v50  ;;  %v1817_v52 = vrot.slane %v1661_v62, %v4584_v25  ;;  %v1821_v42 = vrot.slane %v1661_v62, %v4587_v27  ;;  %v1825_v32 = vrot.slane %v1661_v62, %v4629_v49 }
 0x4c1   :  { %v1829_v35 = vrot.slane %v1661_v62, %v4632_v50  ;;  %v1833_v43 = vrot.slane %v1663_v7, %v4584_v25  ;;  %v1837_v54 = vrot.slane %v1663_v7, %v4587_v27  ;;  %v1841_v55 = vrot.slane %v1663_v7, %v4629_v49 }
 0x4c2   :  { %v1845_v56 = vrot.slane %v1663_v7, %v4632_v50  ;;  %v1849_v59 = vrot.slane %v1665_v9, %v4584_v25  ;;  %v1853_v60 = vrot.slane %v1665_v9, %v4587_v27  ;;  %v1857_v48 = vrot.slane %v1665_v9, %v4629_v49 }
 0x4c3   :  { %v1861_v61 = vrot.slane %v1665_v9, %v4632_v50  ;;  %v2054_v3 = vpack.c.bf16 %v1737_v11, %v1737_v11  ;;  %v2055_v8 = vpack.c.bf16 %v1741_v13, %v1741_v13  ;;  %v2056_v63 = vpack.c.bf16 %v1745_v14, %v1745_v14 }
 0x4c4   :  { %v2057_v62 = vpack.c.bf16 %v1749_v15, %v1749_v15  ;;  %v2058_v44 = vpack.c.bf16 %v1753_v16, %v1753_v16  ;;  %v2059_v46 = vpack.c.bf16 %v1757_v24, %v1757_v24  ;;  %v2060_v38 = vpack.c.bf16 %v1761_v22, %v1761_v22 }
 0x4c5   :  { %v2061_v40 = vpack.c.bf16 %v1765_v19, %v1765_v19  ;;  %v2062_v2 = vpack.c.bf16 %v1769_v23, %v1769_v23  ;;  %v2063_v1 = vpack.c.bf16 %v1773_v26, %v1773_v26  ;;  %v2064_v0 = vpack.c.bf16 %v1777_v28, %v1777_v28 }
 0x4c6   :  { %v2065_v7 = vpack.c.bf16 %v1781_v30, %v1781_v30  ;;  %v2066_v10 = vpack.c.bf16 %v1785_v31, %v1785_v31  ;;  %v2067_v5 = vpack.c.bf16 %v1789_v33, %v1789_v33  ;;  %v2068_v37 = vpack.c.bf16 %v1793_v34, %v1793_v34 }
 0x4c7   :  { %v2069_v29 = vpack.c.bf16 %v1797_v36, %v1797_v36  ;;  %v2070_v27 = vpack.c.bf16 %v1801_v39, %v1801_v39  ;;  %v2071_v49 = vpack.c.bf16 %v1805_v41, %v1805_v41  ;;  %v2072_v6 = vpack.c.bf16 %v1809_v47, %v1809_v47 }
 0x4c8   :  { %v2073_v9 = vpack.c.bf16 %v1813_v51, %v1813_v51  ;;  %v2074_v11 = vpack.c.bf16 %v1817_v52, %v1817_v52  ;;  %v2075_v13 = vpack.c.bf16 %v1821_v42, %v1821_v42  ;;  %v4765_v14 = vpack.c.bf16 %v1825_v32, %v1825_v32 }
 0x4c9   :  { %v4767_v15 = vpack.c.bf16 %v1829_v35, %v1829_v35  ;;  %v4769_v16 = vpack.c.bf16 %v1833_v43, %v1833_v43  ;;  %v4771_v24 = vpack.c.bf16 %v1837_v54, %v1837_v54  ;;  %v4773_v22 = vpack.c.bf16 %v1841_v55, %v1841_v55 }
 0x4ca   :  { %v4775_v19 = vpack.c.bf16 %v1845_v56, %v1845_v56  ;;  %v2127_v23 = vpack.i.b16 %v2054_v3, %v2054_v3  ;;  %v2134_v26 = vpack.i.b16 %v2055_v8, %v2055_v8  ;;  %v2141_v28 = vpack.i.b16 %v2056_v63, %v2056_v63 }
 0x4cb   :  { %v2148_v30 = vpack.i.b16 %v2057_v62, %v2057_v62  ;;  %v2155_v31 = vpack.i.b16 %v2058_v44, %v2058_v44  ;;  %v2162_v33 = vpack.i.b16 %v2059_v46, %v2059_v46  ;;  %v2169_v34 = vpack.i.b16 %v2060_v38, %v2060_v38  ;;  %v4793_v38 = vpop.f32.mrb[16].mxu0 }
 0x4cc   :  { %v2176_v36 = vpack.i.b16 %v2061_v40, %v2061_v40  ;;  %v2082_v39 = vpack.c.bf16 %v1849_v59, %v1849_v59  ;;  %v2083_v41 = vpack.c.bf16 %v1853_v60, %v1853_v60  ;;  %v4777_v47 = vpack.c.bf16 %v1857_v48, %v1857_v48  ;;  %v4795_v43 = vpop.f32.mrb[17].mxu0 }
 0x4cd   :  { %v4779_v51 = vpack.c.bf16 %v1861_v61, %v1861_v61  ;;  %v4782_v52 = vrot.slane %v2127_v23, %v4584_v25  ;;  %v4785_v42 = vrot.slane %v2134_v26, %v4584_v25  ;;  %v4788_v32 = vrot.slane %v2141_v28, %v4584_v25  ;;  %v4809_v60 = vpop.f32.mrb[18].mxu0 }
 0x4ce   :  { %v4791_v44 = vrot.slane %v2148_v30, %v4584_v25  ;;  %v2183_v40 = vpack.i.b16 %v2062_v2, %v2062_v2  ;;  %v2190_v46 = vpack.i.b16 %v2063_v1, %v2063_v1  ;;  %v2197_v63 = vpack.i.b16 %v2064_v0, %v2064_v0  ;;  %v4811_v61 = vpop.f32.mrb[19].mxu0 }
 0x4cf   :  { %v2204_v35 = vpack.i.b16 %v2065_v7, %v2065_v7  ;;  %v4798_v54 = vrot.slane %v2155_v31, %v4584_v25  ;;  %v4801_v55 = vrot.slane %v2162_v33, %v4584_v25  ;;  %v4804_v56 = vrot.slane %v2169_v34, %v4584_v25 }
 0x4d0   :  { %5562 = vst [vmem:[#allocation46_spill] sm:$0xff] %v4791_v44  ;;  %v4807_v59 = vrot.slane %v2176_v36, %v4584_v25  ;;  %v2211_v2 = vpack.i.b16 %v2066_v10, %v2066_v10  ;;  %v2218_v1 = vpack.i.b16 %v2067_v5, %v2067_v5  ;;  %v2225_v0 = vpack.i.b16 %v2068_v37, %v2068_v37 }
 0x4d1   :  { %v2232_v48 = vpack.i.b16 %v2069_v29, %v2069_v29  ;;  %v2188_v3 = vrot.slane %v2183_v40, %v4584_v25  ;;  %v2195_v8 = vrot.slane %v2190_v46, %v4584_v25  ;;  %v4816_v62 = vrot.slane %v2197_v63, %v4584_v25 }
 0x4d2   :  { %5563 = vst [vmem:[#allocation47_spill] sm:$0xff] %v4807_v59  ;;  %v4819_v7 = vrot.slane %v2204_v35, %v4584_v25  ;;  %v2239_v23 = vpack.i.b16 %v2070_v27, %v2070_v27  ;;  %v2246_v26 = vpack.i.b16 %v2071_v49, %v2071_v49  ;;  %v2253_v28 = vpack.i.b16 %v2072_v6, %v2072_v6 }
 0x4d3   :  { %v2260_v30 = vpack.i.b16 %v2073_v9, %v2073_v9  ;;  %v2267_v10 = vpack.i.b16 %v2074_v11, %v2074_v11  ;;  %v2274_v5 = vpack.i.b16 %v2075_v13, %v2075_v13  ;;  %v2281_v29 = vpack.i.b16 %v4765_v14, %v4765_v14 }
 0x4d4   :  { %5564 = vst [vmem:[#allocation48_spill] sm:$0xff] %v4819_v7  ;;  %v2288_v37 = vpack.i.b16 %v4767_v15, %v4767_v15  ;;  %v2216_v31 = vrot.slane %v2211_v2, %v4584_v25  ;;  %v2223_v33 = vrot.slane %v2218_v1, %v4584_v25  ;;  %v4828_v34 = vrot.slane %v2225_v0, %v4584_v25 }
 0x4d5   :  { %v4831_v27 = vrot.slane %v2232_v48, %v4584_v25  ;;  %v2244_v49 = vrot.slane %v2239_v23, %v4584_v25  ;;  %v2251_v6 = vrot.slane %v2246_v26, %v4584_v25  ;;  %v4836_v9 = vrot.slane %v2253_v28, %v4584_v25 }
 0x4d6   :  { %5565 = vst [vmem:[#allocation49_spill] sm:$0xff] %v4828_v34  ;;  %v4839_v11 = vrot.slane %v2260_v30, %v4584_v25  ;;  %v2272_v13 = vrot.slane %v2267_v10, %v4584_v25  ;;  %v2279_v14 = vrot.slane %v2274_v5, %v4584_v25  ;;  %v2295_v15 = vpack.i.b16 %v4769_v16, %v4769_v16 }
 0x4d7   :  { %5566 = vst [vmem:[#allocation50_spill] sm:$0xff] %v4831_v27  ;;  %5567 = vst [vmem:[#allocation51_spill] sm:$0xff] %v4836_v9  ;;  %v2302_v36 = vpack.i.b16 %v4771_v24, %v4771_v24  ;;  %v4848_v40 = vrot.slane %v2281_v29, %v4584_v25  ;;  %v4851_v46 = vrot.slane %v2288_v37, %v4584_v25 }
 0x4d8   :  { %5568 = vst [vmem:[#allocation52_spill] sm:$0xff] %v4839_v11  ;;  %v2323_v63 = vpack.i.b16 %v2082_v39, %v2082_v39  ;;  %v2330_v35 = vpack.i.b16 %v2083_v41, %v2083_v41  ;;  %v2309_v2 = vpack.i.b16 %v4773_v22, %v4773_v22  ;;  %v2316_v1 = vpack.i.b16 %v4775_v19, %v4775_v19 }
 0x4d9   :  { %5569 = vst [vmem:[#allocation53_spill] sm:$0xff] %v4848_v40  ;;  %5570 = vst [vmem:[#allocation54_spill] sm:$0xff] %v4851_v46  ;;  %v2337_v16 = vpack.i.b16 %v4777_v47, %v4777_v47  ;;  %v2344_v24 = vpack.i.b16 %v4779_v51, %v4779_v51  ;;  %v2300_v0 = vrot.slane %v2295_v15, %v4584_v25 }
 0x4da   :  { %v2307_v48 = vrot.slane %v2302_v36, %v4584_v25  ;;  %v2328_v23 = vrot.slane %v2323_v63, %v4584_v25  ;;  %v2335_v39 = vrot.slane %v2330_v35, %v4584_v25  ;;  %v2574_v22 = vadd.bf16 %v4782_v52, %v4669_v20 }
 0x4db   :  { %v2575_v19 = vadd.bf16 %v4785_v42, %v4671_v21  ;;  %v2578_v41 = vadd.bf16 %v4798_v54, %v4669_v20  ;;  %v2579_v47 = vadd.bf16 %v4801_v55, %v4671_v21  ;;  %v2582_v51 = vadd.bf16 %v2188_v3, %v4669_v20 }
 0x4dc   :  { %v2583_v26 = vadd.bf16 %v2195_v8, %v4671_v21  ;;  %v2586_v28 = vadd.bf16 %v2216_v31, %v4669_v20  ;;  %v2587_v30 = vadd.bf16 %v2223_v33, %v4671_v21  ;;  %v2590_v10 = vadd.bf16 %v2244_v49, %v4669_v20 }
 0x4dd   :  { %v2591_v52 = vadd.bf16 %v2251_v6, %v4671_v21  ;;  %v2594_v42 = vadd.bf16 %v2272_v13, %v4669_v20  ;;  %v2595_v5 = vadd.bf16 %v2279_v14, %v4671_v21  ;;  %v2598_v54 = vadd.bf16 %v2300_v0, %v4669_v20 }
 0x4de   :  { %v2599_v55 = vadd.bf16 %v2307_v48, %v4671_v21  ;;  %v2602_v3 = vadd.bf16 %v2328_v23, %v4669_v20  ;;  %v2603_v8 = vadd.bf16 %v2335_v39, %v4671_v21  ;;  %v2691_v29 = vadd.bf16 %v4664_v17, %v2574_v22 }
 0x4df   :  { %v2692_v37 = vadd.bf16 %v4667_v18, %v2575_v19  ;;  %v2695_v31 = vadd.bf16 %v4664_v17, %v2578_v41  ;;  %v2696_v33 = vadd.bf16 %v4667_v18, %v2579_v47  ;;  %v2699_v49 = vadd.bf16 %v4664_v17, %v2582_v51 }
 0x4e0   :  { %v2700_v6 = vadd.bf16 %v4667_v18, %v2583_v26  ;;  %v2703_v13 = vadd.bf16 %v4664_v17, %v2586_v28  ;;  %v2704_v14 = vadd.bf16 %v4667_v18, %v2587_v30  ;;  %v2707_v20 = vadd.bf16 %v4664_v17, %v2590_v10 }
 0x4e1   :  { %v2708_v21 = vadd.bf16 %v4667_v18, %v2591_v52  ;;  %v2711_v15 = vadd.bf16 %v4664_v17, %v2594_v42  ;;  %v2712_v36 = vadd.bf16 %v4667_v18, %v2595_v5  ;;  %v2715_v63 = vadd.bf16 %v4664_v17, %v2598_v54 }
 0x4e2   :  { %v2716_v35 = vadd.bf16 %v4667_v18, %v2599_v55  ;;  %v2719_v0 = vadd.bf16 %v4664_v17, %v2602_v3  ;;  %v2720_v48 = vadd.bf16 %v4667_v18, %v2603_v8  ;;  %v5571_v23 = vmov 0  }
 0x4e3   :  { %v4902_v39 = vmax.bf16 %v5571_v23, %v2691_v29  ;;  %v4905_v22 = vmax.bf16 %v5571_v23, %v2692_v37  ;;  %v4908_v19 = vmax.bf16 %v5571_v23, %v2695_v31  ;;  %v4911_v41 = vmax.bf16 %v5571_v23, %v2696_v33 }
 0x4e4   :  { %v4914_v47 = vmax.bf16 %v5571_v23, %v2699_v49  ;;  %v4917_v51 = vmax.bf16 %v5571_v23, %v2700_v6  ;;  %v4920_v26 = vmax.bf16 %v5571_v23, %v2703_v13  ;;  %v4923_v28 = vmax.bf16 %v5571_v23, %v2704_v14 }
 0x4e5   :  { %5572 = vst [vmem:[#allocation55_spill] sm:$0xff] %v4902_v39  ;;  %5573 = vst [vmem:[#allocation56_spill] sm:$0xff] %v4905_v22  ;;  %v4926_v30 = vmax.bf16 %v5571_v23, %v2707_v20  ;;  %v4929_v10 = vmax.bf16 %v5571_v23, %v2708_v21  ;;  %v4932_v52 = vmax.bf16 %v5571_v23, %v2711_v15 }
 0x4e6   :  { %5574 = vst [vmem:[#allocation57_spill] sm:$0xff] %v4908_v19  ;;  %5575 = vst [vmem:[#allocation58_spill] sm:$0xff] %v4911_v41  ;;  %v4935_v42 = vmax.bf16 %v5571_v23, %v2712_v36  ;;  %v4938_v5 = vmax.bf16 %v5571_v23, %v2715_v63  ;;  %v4941_v54 = vmax.bf16 %v5571_v23, %v2716_v35  ;;  %v5597_v63 = vld [vmem:[#allocation39_spill] sm:$0xff]  ;;  %v5598_v35 = vld [vmem:[#allocation40_spill] sm:$0xff] }
 0x4e7   :  { %5576 = vst [vmem:[#allocation59_spill] sm:$0xff] %v4914_v47  ;;  %5577 = vst [vmem:[#allocation60_spill] sm:$0xff] %v4917_v51  ;;  %v4944_v55 = vmax.bf16 %v5571_v23, %v2719_v0  ;;  %v4947_v3 = vmax.bf16 %v5571_v23, %v2720_v48  ;;  %v5588_v8 = vcombine.low %v4691_v53, %v4704_v45 }
 0x4e8   :  { %5578 = vst [vmem:[#allocation61_spill] sm:$0xff] %v4920_v26  ;;  %5579 = vst [vmem:[#allocation62_spill] sm:$0xff] %v4923_v28  ;;  %v5589_v37 = vcombine.low %v4701_v57, %v4707_v58  ;;  %v5590_v33 = vcombine.high %v4691_v53, %v4704_v45  ;;  %v5591_v6 = vcombine.high %v4701_v57, %v4707_v58  ;;  %v5596_v57 = vld [vmem:[#allocation44_spill] sm:$0xff] }
 0x4e9   :  { %5580 = vst [vmem:[#allocation63_spill] sm:$0xff] %v4926_v30  ;;  %5581 = vst [vmem:[#allocation64_spill] sm:$0xff] %v4929_v10  ;;  %v1708_v29 = vrot.slane %v5588_v8, %v4648_v12  ;;  %v4966_v14 = vrot.slane %v2309_v2, %v4584_v25  ;;  %v4969_v20 = vrot.slane %v2316_v1, %v4584_v25 }
 0x4ea   :  { %5582 = vst [vmem:[#allocation65_spill] sm:$0xff] %v4932_v52  ;;  %5583 = vst [vmem:[#allocation66_spill] sm:$0xff] %v4935_v42  ;;  %v1715_v31 = vrot.slane %v5589_v37, %v4648_v12  ;;  %v1722_v49 = vrot.slane %v5590_v33, %v4648_v12  ;;  %v1729_v13 = vrot.slane %v5591_v6, %v4648_v12 }
 0x4eb   :  { %5584 = vst [vmem:[#allocation67_spill] sm:$0xff] %v4938_v5  ;;  %5585 = vst [vmem:[#allocation68_spill] sm:$0xff] %v4941_v54  ;;  %v4972_v21 = vrot.slane %v2337_v16, %v4584_v25  ;;  %v4975_v15 = vrot.slane %v2344_v24, %v4584_v25  ;;  %v1730_v36 = vcombine.high %v1708_v29, %v1708_v29 }
 0x4ec   :  { %5586 = vst [vmem:[#allocation69_spill] sm:$0xff] %v4944_v55  ;;  %5587 = vst [vmem:[#allocation70_spill] sm:$0xff] %v4947_v3  ;;  %v4979_v53 = vadd.f32 %v4722_v4, %v4793_v38  ;;  %v4983_v12 = vadd.f32 %v5596_v57, %v4795_v43  ;;  %v4987_v45 = vadd.f32 %v4722_v4, %v4809_v60 }
 0x4ed   :  { %5592 = vst [vmem:[#allocation71_spill] sm:$0xff] %v4966_v14  ;;  %5593 = vst [vmem:[#allocation72_spill] sm:$0xff] %v4969_v20  ;;  %v1731_v58 = vcombine.high %v1715_v31, %v1715_v31  ;;  %v1732_v2 = vcombine.high %v1722_v49, %v1722_v49  ;;  %v1733_v1 = vcombine.high %v1729_v13, %v1729_v13 }
 0x4ee   :  { %5594 = vst [vmem:[#allocation73_spill] sm:$0xff] %v4972_v21  ;;  %5595 = vst [vmem:[#allocation74_spill] sm:$0xff] %v4975_v15  ;;  %v4991_v16 = vadd.f32 %v5596_v57, %v4811_v61  ;;  %v1865_v24 = vrot.slane %v1708_v29, %v4584_v25  ;;  %v1869_v38 = vrot.slane %v1708_v29, %v5597_v63 }
 0x4ef   :  { %v1873_v0 = vrot.slane %v1708_v29, %v5598_v35  ;;  %v1877_v43 = vrot.slane %v1708_v29, %v4632_v50  ;;  %v1881_v48 = vrot.slane %v1722_v49, %v4584_v25  ;;  %v1885_v4 = vrot.slane %v1722_v49, %v5597_v63 }
 0x4f0   :  { %v1889_v60 = vrot.slane %v1722_v49, %v5598_v35  ;;  %v1893_v8 = vrot.slane %v1722_v49, %v4632_v50  ;;  %v1897_v37 = vrot.slane %v1730_v36, %v4584_v25  ;;  %v1901_v61 = vrot.slane %v1730_v36, %v5597_v63 }
 0x4f1   :  { %v1905_v33 = vrot.slane %v1730_v36, %v5598_v35  ;;  %v1909_v6 = vrot.slane %v1730_v36, %v4632_v50  ;;  %v1913_v57 = vrot.slane %v1732_v2, %v4584_v25  ;;  %v1917_v29 = vrot.slane %v1732_v2, %v5597_v63 }
 0x4f2   :  { %v1921_v5 = vrot.slane %v1732_v2, %v5598_v35  ;;  %v1925_v55 = vrot.slane %v1732_v2, %v4632_v50  ;;  %v1929_v54 = vrot.slane %v1715_v31, %v4584_v25  ;;  %v1933_v49 = vrot.slane %v1715_v31, %v5597_v63 }
 0x4f3   :  { %v1937_v3 = vrot.slane %v1715_v31, %v5598_v35  ;;  %v1941_v30 = vrot.slane %v1715_v31, %v4632_v50  ;;  %v1945_v52 = vrot.slane %v1729_v13, %v4584_v25  ;;  %v1949_v36 = vrot.slane %v1729_v13, %v5597_v63 }
 0x4f4   :  { %v1953_v10 = vrot.slane %v1729_v13, %v5598_v35  ;;  %v1957_v42 = vrot.slane %v1729_v13, %v4632_v50  ;;  %v1961_v47 = vrot.slane %v1731_v58, %v4584_v25  ;;  %v1965_v2 = vrot.slane %v1731_v58, %v5597_v63 }
 0x4f5   :  { %v1969_v26 = vrot.slane %v1731_v58, %v5598_v35  ;;  %v1973_v51 = vrot.slane %v1731_v58, %v4632_v50  ;;  %v1977_v28 = vrot.slane %v1733_v1, %v4584_v25  ;;  %v1981_v31 = vrot.slane %v1733_v1, %v5597_v63 }
 0x4f6   :  { %v1985_v39 = vrot.slane %v1733_v1, %v5598_v35  ;;  %v1989_v19 = vrot.slane %v1733_v1, %v4632_v50  ;;  %v2086_v22 = vpack.c.bf16 %v1865_v24, %v1865_v24  ;;  %v2087_v41 = vpack.c.bf16 %v1869_v38, %v1869_v38 }
 0x4f7   :  { %v2088_v15 = vpack.c.bf16 %v1873_v0, %v1873_v0  ;;  %v2089_v13 = vpack.c.bf16 %v1877_v43, %v1877_v43  ;;  %v2090_v20 = vpack.c.bf16 %v1881_v48, %v1881_v48  ;;  %v2091_v46 = vpack.c.bf16 %v1885_v4, %v1885_v4 }
 0x4f8   :  { %v2092_v11 = vpack.c.bf16 %v1889_v60, %v1889_v60  ;;  %v2093_v27 = vpack.c.bf16 %v1893_v8, %v1893_v8  ;;  %v2094_v7 = vpack.c.bf16 %v1897_v37, %v1897_v37  ;;  %v2095_v59 = vpack.c.bf16 %v1901_v61, %v1901_v61 }
 0x4f9   :  { %v2096_v44 = vpack.c.bf16 %v1905_v33, %v1905_v33  ;;  %v2097_v58 = vpack.c.bf16 %v1909_v6, %v1909_v6  ;;  %v2098_v21 = vpack.c.bf16 %v1913_v57, %v1913_v57  ;;  %v2099_v14 = vpack.c.bf16 %v1917_v29, %v1917_v29 }
 0x4fa   :  { %v2100_v40 = vpack.c.bf16 %v1921_v5, %v1921_v5  ;;  %v2101_v63 = vpack.c.bf16 %v1925_v55, %v1925_v55  ;;  %v2102_v9 = vpack.c.bf16 %v1929_v54, %v1929_v54  ;;  %v2103_v35 = vpack.c.bf16 %v1933_v49, %v1933_v49 }
 0x4fb   :  { %v2104_v34 = vpack.c.bf16 %v1937_v3, %v1937_v3  ;;  %v2105_v50 = vpack.c.bf16 %v1941_v30, %v1941_v30  ;;  %v2106_v1 = vpack.c.bf16 %v1945_v52, %v1945_v52  ;;  %v2107_v24 = vpack.c.bf16 %v1949_v36, %v1949_v36 }
 0x4fc   :  { %v2108_v38 = vpack.c.bf16 %v1953_v10, %v1953_v10  ;;  %v2109_v0 = vpack.c.bf16 %v1957_v42, %v1957_v42  ;;  %v5025_v43 = vpack.c.bf16 %v1961_v47, %v1961_v47  ;;  %v5027_v48 = vpack.c.bf16 %v1965_v2, %v1965_v2 }
 0x4fd   :  { %v5029_v4 = vpack.c.bf16 %v1969_v26, %v1969_v26  ;;  %v5031_v60 = vpack.c.bf16 %v1973_v51, %v1973_v51  ;;  %v2351_v8 = vpack.i.b16 %v2086_v22, %v2086_v22  ;;  %v2358_v37 = vpack.i.b16 %v2087_v41, %v2087_v41 }
 0x4fe   :  { %v2365_v5 = vpack.i.b16 %v2088_v15, %v2088_v15  ;;  %v2372_v55 = vpack.i.b16 %v2089_v13, %v2089_v13  ;;  %v2379_v54 = vpack.i.b16 %v2090_v20, %v2090_v20  ;;  %v2386_v61 = vpack.i.b16 %v2091_v46, %v2091_v46 }
 0x4ff   :  { %v2393_v3 = vpack.i.b16 %v2092_v11, %v2092_v11  ;;  %v2400_v30 = vpack.i.b16 %v2093_v27, %v2093_v27  ;;  %v2114_v52 = vpack.c.bf16 %v1977_v28, %v1977_v28  ;;  %v2115_v33 = vpack.c.bf16 %v1981_v31, %v1981_v31 }
 0x500   :  { %v5033_v10 = vpack.c.bf16 %v1985_v39, %v1985_v39  ;;  %v5035_v47 = vpack.c.bf16 %v1989_v19, %v1989_v19  ;;  %v5038_v42 = vrot.slane %v2351_v8, %v4584_v25  ;;  %v5041_v51 = vrot.slane %v2358_v37, %v4584_v25 }
 0x501   :  { %v5044_v22 = vrot.slane %v2365_v5, %v4584_v25  ;;  %v5047_v41 = vrot.slane %v2372_v55, %v4584_v25  ;;  %v2407_v11 = vpack.i.b16 %v2094_v7, %v2094_v7  ;;  %v2414_v27 = vpack.i.b16 %v2095_v59, %v2095_v59 }
 0x502   :  { %v2421_v46 = vpack.i.b16 %v2096_v44, %v2096_v44  ;;  %v2428_v26 = vpack.i.b16 %v2097_v58, %v2097_v58  ;;  %v5050_v39 = vrot.slane %v2379_v54, %v4584_v25  ;;  %v5053_v19 = vrot.slane %v2386_v61, %v4584_v25 }
 0x503   :  { %v5056_v28 = vrot.slane %v2393_v3, %v4584_v25  ;;  %v5059_v20 = vrot.slane %v2400_v30, %v4584_v25  ;;  %v2435_v15 = vpack.i.b16 %v2098_v21, %v2098_v21  ;;  %v2442_v6 = vpack.i.b16 %v2099_v14, %v2099_v14 }
 0x504   :  { %v2449_v57 = vpack.i.b16 %v2100_v40, %v2100_v40  ;;  %v2456_v29 = vpack.i.b16 %v2101_v63, %v2101_v63  ;;  %v2412_v59 = vrot.slane %v2407_v11, %v4584_v25  ;;  %v2419_v44 = vrot.slane %v2414_v27, %v4584_v25 }
 0x505   :  { %v5064_v7 = vrot.slane %v2421_v46, %v4584_v25  ;;  %v5067_v49 = vrot.slane %v2428_v26, %v4584_v25  ;;  %v2463_v36 = vpack.i.b16 %v2102_v9, %v2102_v9  ;;  %v2470_v2 = vpack.i.b16 %v2103_v35, %v2103_v35 }
 0x506   :  { %v2477_v31 = vpack.i.b16 %v2104_v34, %v2104_v34  ;;  %v2484_v13 = vpack.i.b16 %v2105_v50, %v2105_v50  ;;  %v2491_v58 = vpack.i.b16 %v2106_v1, %v2106_v1  ;;  %v2498_v8 = vpack.i.b16 %v2107_v24, %v2107_v24 }
 0x507   :  { %v2505_v21 = vpack.i.b16 %v2108_v38, %v2108_v38  ;;  %v2512_v14 = vpack.i.b16 %v2109_v0, %v2109_v0  ;;  %v2440_v40 = vrot.slane %v2435_v15, %v4584_v25  ;;  %v2447_v63 = vrot.slane %v2442_v6, %v4584_v25  ;;  %v5600_v15 = vld [vmem:[#allocation42_spill] sm:$0xff] }
 0x508   :  { %v5072_v37 = vrot.slane %v2449_v57, %v4584_v25  ;;  %v5075_v5 = vrot.slane %v2456_v29, %v4584_v25  ;;  %v2468_v55 = vrot.slane %v2463_v36, %v4584_v25  ;;  %v2475_v9 = vrot.slane %v2470_v2, %v4584_v25 }
 0x509   :  { %v5080_v34 = vrot.slane %v2477_v31, %v4584_v25  ;;  %v5083_v35 = vrot.slane %v2484_v13, %v4584_v25  ;;  %v2496_v50 = vrot.slane %v2491_v58, %v4584_v25  ;;  %v2503_v1 = vrot.slane %v2498_v8, %v4584_v25 }
 0x50a   :  { %v2519_v24 = vpack.i.b16 %v5025_v43, %v5025_v43  ;;  %v2526_v38 = vpack.i.b16 %v5027_v48, %v5027_v48  ;;  %v5092_v0 = vrot.slane %v2505_v21, %v4584_v25  ;;  %v5095_v54 = vrot.slane %v2512_v14, %v4584_v25 }
 0x50b   :  { %v2547_v61 = vpack.i.b16 %v2114_v52, %v2114_v52  ;;  %v2554_v3 = vpack.i.b16 %v2115_v33, %v2115_v33  ;;  %v2533_v30 = vpack.i.b16 %v5029_v4, %v5029_v4  ;;  %v2540_v11 = vpack.i.b16 %v5031_v60, %v5031_v60  ;;  %v5599_v33 = vld [vmem:[#allocation41_spill] sm:$0xff] }
 0x50c   :  { %v2561_v43 = vpack.i.b16 %v5033_v10, %v5033_v10  ;;  %v2568_v48 = vpack.i.b16 %v5035_v47, %v5035_v47  ;;  %v2524_v27 = vrot.slane %v2519_v24, %v4584_v25  ;;  %v2531_v46 = vrot.slane %v2526_v38, %v4584_v25 }
 0x50d   :  { %v2552_v26 = vrot.slane %v2547_v61, %v4584_v25  ;;  %v2559_v52 = vrot.slane %v2554_v3, %v4584_v25  ;;  %v2606_v4 = vadd.bf16 %v5038_v42, %v5599_v33  ;;  %v2607_v60 = vadd.bf16 %v5041_v51, %v5600_v15 }
 0x50e   :  { %v2610_v10 = vadd.bf16 %v5050_v39, %v5599_v33  ;;  %v2611_v47 = vadd.bf16 %v5053_v19, %v5600_v15  ;;  %v2614_v6 = vadd.bf16 %v2412_v59, %v5599_v33  ;;  %v2615_v57 = vadd.bf16 %v2419_v44, %v5600_v15 }
 0x50f   :  { %v2618_v29 = vadd.bf16 %v2440_v40, %v5599_v33  ;;  %v2619_v36 = vadd.bf16 %v2447_v63, %v5600_v15  ;;  %v2622_v2 = vadd.bf16 %v2468_v55, %v5599_v33  ;;  %v2623_v42 = vadd.bf16 %v2475_v9, %v5600_v15 }
 0x510   :  { %v2626_v51 = vadd.bf16 %v2496_v50, %v5599_v33  ;;  %v2627_v31 = vadd.bf16 %v2503_v1, %v5600_v15  ;;  %v2630_v39 = vadd.bf16 %v2524_v27, %v5599_v33  ;;  %v2631_v19 = vadd.bf16 %v2531_v46, %v5600_v15 }
 0x511   :  { %v2634_v59 = vadd.bf16 %v2552_v26, %v5599_v33  ;;  %v2635_v44 = vadd.bf16 %v2559_v52, %v5600_v15  ;;  %v2723_v13 = vadd.bf16 %v4664_v17, %v2606_v4  ;;  %v2724_v58 = vadd.bf16 %v4667_v18, %v2607_v60 }
 0x512   :  { %v2727_v8 = vadd.bf16 %v4664_v17, %v2610_v10  ;;  %v2728_v21 = vadd.bf16 %v4667_v18, %v2611_v47  ;;  %v2731_v14 = vadd.bf16 %v4664_v17, %v2614_v6  ;;  %v2732_v40 = vadd.bf16 %v4667_v18, %v2615_v57 }
 0x513   :  { %v2735_v63 = vadd.bf16 %v4664_v17, %v2618_v29  ;;  %v2736_v55 = vadd.bf16 %v4667_v18, %v2619_v36  ;;  %v2739_v9 = vadd.bf16 %v4664_v17, %v2622_v2  ;;  %v2740_v50 = vadd.bf16 %v4667_v18, %v2623_v42 }
 0x514   :  { %v2743_v1 = vadd.bf16 %v4664_v17, %v2626_v51  ;;  %v2744_v24 = vadd.bf16 %v4667_v18, %v2627_v31  ;;  %v2747_v38 = vadd.bf16 %v4664_v17, %v2630_v39  ;;  %v2748_v61 = vadd.bf16 %v4667_v18, %v2631_v19 }
 0x515   :  { %v2751_v3 = vadd.bf16 %v4664_v17, %v2634_v59  ;;  %v2752_v27 = vadd.bf16 %v4667_v18, %v2635_v44  ;;  %v5146_v46 = vmax.bf16 %v5571_v23, %v2723_v13  ;;  %v5149_v26 = vmax.bf16 %v5571_v23, %v2724_v58  ;;  %v5601_v13 = vld [vmem:[#allocation49_spill] sm:$0xff]  ;;  %v5602_v58 = vld [vmem:[#allocation51_spill] sm:$0xff] }
 0x516   :  { %v5152_v52 = vmax.bf16 %v5571_v23, %v2727_v8  ;;  %v5155_v33 = vmax.bf16 %v5571_v23, %v2728_v21  ;;  %v5158_v4 = vmax.bf16 %v5571_v23, %v2731_v14  ;;  %v5161_v15 = vmax.bf16 %v5571_v23, %v2732_v40  ;;  %v5603_v21 = vld [vmem:[#allocation53_spill] sm:$0xff]  ;;  %v5604_v14 = vld [vmem:[#allocation71_spill] sm:$0xff] }
 0x517   :  { %v5164_v17 = vmax.bf16 %v5571_v23, %v2735_v63  ;;  %v5167_v18 = vmax.bf16 %v5571_v23, %v2736_v55  ;;  %v5170_v60 = vmax.bf16 %v5571_v23, %v2739_v9  ;;  %v5173_v10 = vmax.bf16 %v5571_v23, %v2740_v50  ;;  %v5606_v55 = vld [vmem:[#allocation43_spill] sm:$0xff] }
 0x518   :  { %v5176_v47 = vmax.bf16 %v5571_v23, %v2743_v1  ;;  %v5179_v6 = vmax.bf16 %v5571_v23, %v2744_v24  ;;  %v5182_v57 = vmax.bf16 %v5571_v23, %v2747_v38  ;;  %v5185_v29 = vmax.bf16 %v5571_v23, %v2748_v61 }
 0x519   :  { %v5188_v36 = vmax.bf16 %v5571_v23, %v2751_v3  ;;  %v5191_v2 = vmax.bf16 %v5571_v23, %v2752_v27  ;;  %v5194_v42 = vrot.slane %v2533_v30, %v4584_v25  ;;  %v5197_v51 = vrot.slane %v2540_v11, %v4584_v25 }
 0x51a   :  { %v5200_v31 = vrot.slane %v2561_v43, %v4584_v25  ;;  %v2120_v39 = vpack.c.bf16 %v4979_v53, %v4979_v53  ;;  %v5205_v19 = vrot.slane %v2568_v48, %v4584_v25  ;;  %v2121_v59 = vpack.c.bf16 %v4983_v12, %v4983_v12 }
 0x51b   :  { %v5211_v44 = vpack.c.bf16 %v4987_v45, %v4987_v45  ;;  %v5215_v30 = vpack.c.bf16 %v4991_v16, %v4991_v16  ;;  %v5605_v45 = vld [vmem:[#allocation73_spill] sm:$0xff] }
 0x51c   :  { %v2576_v11 = vadd.bf16 %v4788_v32, %v2120_v39  ;;  %v2580_v43 = vadd.bf16 %v4804_v56, %v2120_v39  ;;  %v2584_v53 = vadd.bf16 %v4816_v62, %v2120_v39  ;;  %v2588_v48 = vadd.bf16 %v5601_v13, %v2120_v39  ;;  %v5607_v13 = vld [vmem:[#allocation46_spill] sm:$0xff] }
 0x51d   :  { %v2592_v8 = vadd.bf16 %v5602_v58, %v2120_v39  ;;  %v2596_v12 = vadd.bf16 %v5603_v21, %v2120_v39  ;;  %v2600_v40 = vadd.bf16 %v5604_v14, %v2120_v39  ;;  %v2604_v63 = vadd.bf16 %v5605_v45, %v2120_v39  ;;  %v5608_v58 = vld [vmem:[#allocation47_spill] sm:$0xff]  ;;  %v5609_v21 = vld [vmem:[#allocation48_spill] sm:$0xff]  ;;  %v5610_v14 = vld [vmem:[#allocation50_spill] sm:$0xff] }
 0x51e   :  { %v2693_v9 = vadd.bf16 %v5606_v55, %v2576_v11  ;;  %v2697_v16 = vadd.bf16 %v5606_v55, %v2580_v43  ;;  %v2701_v32 = vadd.bf16 %v5606_v55, %v2584_v53  ;;  %v2705_v56 = vadd.bf16 %v5606_v55, %v2588_v48  ;;  %v5611_v45 = vld [vmem:[#allocation52_spill] sm:$0xff] }
 0x51f   :  { %v2709_v62 = vadd.bf16 %v5606_v55, %v2592_v8  ;;  %v2713_v50 = vadd.bf16 %v5606_v55, %v2596_v12  ;;  %v2717_v1 = vadd.bf16 %v5606_v55, %v2600_v40  ;;  %v2721_v24 = vadd.bf16 %v5606_v55, %v2604_v63 }
 0x520   :  { %v5234_v38 = vmax.bf16 %v5571_v23, %v2693_v9  ;;  %v5237_v61 = vmax.bf16 %v5571_v23, %v2697_v16  ;;  %v5240_v3 = vmax.bf16 %v5571_v23, %v2701_v32  ;;  %v5243_v27 = vmax.bf16 %v5571_v23, %v2705_v56  ;;  %v5612_v9 = vld [vmem:[#allocation54_spill] sm:$0xff]  ;;  %v5613_v32 = vld [vmem:[#allocation72_spill] sm:$0xff] }
 0x521   :  { %v5246_v39 = vmax.bf16 %v5571_v23, %v2709_v62  ;;  %v5249_v11 = vmax.bf16 %v5571_v23, %v2713_v50  ;;  %v5252_v43 = vmax.bf16 %v5571_v23, %v2717_v1  ;;  %v5255_v53 = vmax.bf16 %v5571_v23, %v2721_v24  ;;  %v5614_v62 = vld [vmem:[#allocation74_spill] sm:$0xff]  ;;  %v5615_v1 = vld [vmem:[#allocation45_spill] sm:$0xff] }
 0x522   :  { %v2577_v48 = vadd.bf16 %v5607_v13, %v2121_v59  ;;  %v2581_v8 = vadd.bf16 %v5608_v58, %v2121_v59  ;;  %v2585_v12 = vadd.bf16 %v5609_v21, %v2121_v59  ;;  %v2589_v40 = vadd.bf16 %v5610_v14, %v2121_v59 }
 0x523   :  { %v2593_v63 = vadd.bf16 %v5611_v45, %v2121_v59  ;;  %v2597_v16 = vadd.bf16 %v5612_v9, %v2121_v59  ;;  %v2601_v56 = vadd.bf16 %v5613_v32, %v2121_v59  ;;  %v2605_v50 = vadd.bf16 %v5614_v62, %v2121_v59 }
 0x524   :  { %v2694_v25 = vadd.bf16 %v5615_v1, %v2577_v48  ;;  %v2698_v24 = vadd.bf16 %v5615_v1, %v2581_v8  ;;  %v2702_v13 = vadd.bf16 %v5615_v1, %v2585_v12  ;;  %v2706_v58 = vadd.bf16 %v5615_v1, %v2589_v40 }
 0x525   :  { %v2710_v21 = vadd.bf16 %v5615_v1, %v2593_v63  ;;  %v2714_v14 = vadd.bf16 %v5615_v1, %v2597_v16  ;;  %v2718_v45 = vadd.bf16 %v5615_v1, %v2601_v56  ;;  %v2722_v9 = vadd.bf16 %v5615_v1, %v2605_v50 }
 0x526   :  { %v5274_v32 = vmax.bf16 %v5571_v23, %v2694_v25  ;;  %v5277_v59 = vmax.bf16 %v5571_v23, %v2698_v24  ;;  %v5280_v48 = vmax.bf16 %v5571_v23, %v2702_v13  ;;  %v5283_v8 = vmax.bf16 %v5571_v23, %v2706_v58 }
 0x527   :  { %v5286_v12 = vmax.bf16 %v5571_v23, %v2710_v21  ;;  %v5289_v40 = vmax.bf16 %v5571_v23, %v2714_v14  ;;  %v5292_v63 = vmax.bf16 %v5571_v23, %v2718_v45  ;;  %v5295_v25 = vmax.bf16 %v5571_v23, %v2722_v9 }
 0x528   :  { %v2608_v16 = vadd.bf16 %v5044_v22, %v5211_v44  ;;  %v2612_v56 = vadd.bf16 %v5056_v28, %v5211_v44  ;;  %v2616_v62 = vadd.bf16 %v5064_v7, %v5211_v44  ;;  %v2620_v50 = vadd.bf16 %v5072_v37, %v5211_v44 }
 0x529   :  { %v2624_v24 = vadd.bf16 %v5080_v34, %v5211_v44  ;;  %v2628_v13 = vadd.bf16 %v5092_v0, %v5211_v44  ;;  %v2632_v58 = vadd.bf16 %v5194_v42, %v5211_v44  ;;  %v2636_v22 = vadd.bf16 %v5200_v31, %v5211_v44 }
 0x52a   :  { %v2725_v28 = vadd.bf16 %v5606_v55, %v2608_v16  ;;  %v2729_v21 = vadd.bf16 %v5606_v55, %v2612_v56  ;;  %v2733_v7 = vadd.bf16 %v5606_v55, %v2616_v62  ;;  %v2737_v37 = vadd.bf16 %v5606_v55, %v2620_v50 }
 0x52b   :  { %v2741_v14 = vadd.bf16 %v5606_v55, %v2624_v24  ;;  %v2745_v34 = vadd.bf16 %v5606_v55, %v2628_v13  ;;  %v2749_v0 = vadd.bf16 %v5606_v55, %v2632_v58  ;;  %v2753_v45 = vadd.bf16 %v5606_v55, %v2636_v22 }
 0x52c   :  { %v5322_v42 = vmax.bf16 %v5571_v23, %v2725_v28  ;;  %v5325_v31 = vmax.bf16 %v5571_v23, %v2729_v21  ;;  %v5328_v44 = vmax.bf16 %v5571_v23, %v2733_v7  ;;  %v5331_v9 = vmax.bf16 %v5571_v23, %v2737_v37 }
 0x52d   :  { %v5334_v16 = vmax.bf16 %v5571_v23, %v2741_v14  ;;  %v5337_v56 = vmax.bf16 %v5571_v23, %v2745_v34  ;;  %v5340_v55 = vmax.bf16 %v5571_v23, %v2749_v0  ;;  %v5343_v62 = vmax.bf16 %v5571_v23, %v2753_v45 }
 0x52e   :  { %v2609_v50 = vadd.bf16 %v5047_v41, %v5215_v30  ;;  %v2613_v24 = vadd.bf16 %v5059_v20, %v5215_v30  ;;  %v2617_v13 = vadd.bf16 %v5067_v49, %v5215_v30  ;;  %v2621_v58 = vadd.bf16 %v5075_v5, %v5215_v30 }
 0x52f   :  { %5616 = vst [vmem:[#allocation44_spill] sm:$0xff] %v5340_v55  ;;  %v2625_v22 = vadd.bf16 %v5083_v35, %v5215_v30  ;;  %v2629_v28 = vadd.bf16 %v5095_v54, %v5215_v30  ;;  %v2633_v21 = vadd.bf16 %v5197_v51, %v5215_v30  ;;  %v2637_v41 = vadd.bf16 %v5205_v19, %v5215_v30 }
 0x530   :  { %v2726_v20 = vadd.bf16 %v5615_v1, %v2609_v50  ;;  %v2730_v7 = vadd.bf16 %v5615_v1, %v2613_v24  ;;  %v2734_v49 = vadd.bf16 %v5615_v1, %v2617_v13  ;;  %v2738_v5 = vadd.bf16 %v5615_v1, %v2621_v58 }
 0x531   :  { %v2742_v37 = vadd.bf16 %v5615_v1, %v2625_v22  ;;  %v2746_v35 = vadd.bf16 %v5615_v1, %v2629_v28  ;;  %v2750_v54 = vadd.bf16 %v5615_v1, %v2633_v21  ;;  %v2754_v14 = vadd.bf16 %v5615_v1, %v2637_v41 }
 0x532   :  { %v5370_v51 = vmax.bf16 %v5571_v23, %v2726_v20  ;;  %v5373_v19 = vmax.bf16 %v5571_v23, %v2730_v7  ;;  %v5376_v30 = vmax.bf16 %v5571_v23, %v2734_v49  ;;  %v5379_v34 = vmax.bf16 %v5571_v23, %v2738_v5 }
 0x533   :  { %v5382_v0 = vmax.bf16 %v5571_v23, %v2742_v37  ;;  %v5385_v45 = vmax.bf16 %v5571_v23, %v2746_v35  ;;  %v5388_v1 = vmax.bf16 %v5571_v23, %v2750_v54  ;;  %v5391_v50 = vmax.bf16 %v5571_v23, %v2754_v14 }
 0x534   :  { %4350 = dma.done.wait [#allocation5], 8192 }
 0x535   :  { %4351 = vsyncadd [#allocation5], 4294959104  ;;  %v5617_v24 = vld [vmem:[#allocation58_spill] sm:$0xff]  ;;  %v5618_v13 = vld [vmem:[#allocation56_spill] sm:$0xff] }
 0x536   :  { %v3760_v58 = vcombine.low %v5618_v13, %v5617_v24  ;;  %v2952_v22 = vld [vmem:[#allocation2 + $0x8] sm:$0xff]  ;;  %v2951_v28 = vld [vmem:[#allocation2] sm:$0xff]  ;;  %v2954_v21 = vld [vmem:[#allocation2 + $0x18] sm:$0xff] }
 0x537   :  { %3090 = vmatprep.subr.bf16.mxu1 %v2952_v22  ;;  %v2953_v41 = vld [vmem:[#allocation2 + $0x10] sm:$0xff]  ;;  %v2956_v20 = vld [vmem:[#allocation2 + $0x28] sm:$0xff]  ;;  %v2955_v7 = vld [vmem:[#allocation2 + $0x20] sm:$0xff] }
 0x538   :  { %3122 = vmatprep.mubr.bf16.mxu1 %v3760_v58  ;;  %3091 = vmatpush1.bf16.msra.mxu1 %v2951_v28  ;;  %v2958_v49 = vld [vmem:[#allocation2 + $0x38] sm:$0xff]  ;;  %v2957_v23 = vld [vmem:[#allocation2 + $0x30] sm:$0xff]  ;;  %v2960_v5 = vld [vmem:[#allocation2 + $0x48] sm:$0xff] }
 0x539   :  { %3092 = vmatprep.subr.bf16.mxu1 %v2954_v21  ;;  %v2959_v37 = vld [vmem:[#allocation2 + $0x40] sm:$0xff]  ;;  %v2962_v35 = vld [vmem:[#allocation2 + $0x58] sm:$0xff]  ;;  %v2961_v54 = vld [vmem:[#allocation2 + $0x50] sm:$0xff] }
 0x53a   :  { %v2964_v14 = vld [vmem:[#allocation2 + $0x68] sm:$0xff]  ;;  %v2963_v24 = vld [vmem:[#allocation2 + $0x60] sm:$0xff]  ;;  %v2966_v13 = vld [vmem:[#allocation2 + $0x78] sm:$0xff] }
 0x53b   :  { %v2965_v58 = vld [vmem:[#allocation2 + $0x70] sm:$0xff]  ;;  %v2968_v22 = vld [vmem:[#allocation2 + $0x88] sm:$0xff]  ;;  %v2967_v28 = vld [vmem:[#allocation2 + $0x80] sm:$0xff] }
 0x53c   :  { %3093 = vmatpush1.bf16.msra.mxu1 %v2953_v41  ;;  %v2970_v21 = vld [vmem:[#allocation2 + $0x98] sm:$0xff]  ;;  %v2969_v41 = vld [vmem:[#allocation2 + $0x90] sm:$0xff] }
 0x53d   :  { %3094 = vmatprep.subr.bf16.mxu1 %v2956_v20  ;;  %v2972_v20 = vld [vmem:[#allocation2 + $0xa8] sm:$0xff]  ;;  %v5626_v55 = vld [vmem:[#allocation64_spill] sm:$0xff] }
 0x540   :  { %3095 = vmatpush1.bf16.msra.mxu1 %v2955_v7  ;;  %v2971_v7 = vld [vmem:[#allocation2 + $0xa0] sm:$0xff] }
 0x541   :  { %3096 = vmatprep.subr.bf16.mxu1 %v2958_v49  ;;  %v2974_v49 = vld [vmem:[#allocation2 + $0xb8] sm:$0xff] }
 0x544   :  { %3097 = vmatpush1.bf16.msra.mxu1 %v2957_v23  ;;  %v2973_v23 = vld [vmem:[#allocation2 + $0xb0] sm:$0xff] }
 0x545   :  { %3098 = vmatprep.subr.bf16.mxu1 %v2960_v5  ;;  %v2976_v5 = vld [vmem:[#allocation2 + $0xc8] sm:$0xff] }
 0x548   :  { %3099 = vmatpush1.bf16.msra.mxu1 %v2959_v37  ;;  %v2975_v37 = vld [vmem:[#allocation2 + $0xc0] sm:$0xff] }
 0x549   :  { %3100 = vmatprep.subr.bf16.mxu1 %v2962_v35  ;;  %v2978_v35 = vld [vmem:[#allocation2 + $0xd8] sm:$0xff] }
 0x54c   :  { %3101 = vmatpush1.bf16.msra.mxu1 %v2961_v54  ;;  %v2977_v54 = vld [vmem:[#allocation2 + $0xd0] sm:$0xff] }
 0x54d   :  { %3102 = vmatprep.subr.bf16.mxu1 %v2964_v14  ;;  %v2980_v14 = vld [vmem:[#allocation2 + $0xe8] sm:$0xff] }
 0x550   :  { %3103 = vmatpush1.bf16.msra.mxu1 %v2963_v24  ;;  %v2979_v24 = vld [vmem:[#allocation2 + $0xe0] sm:$0xff] }
 0x551   :  { %3104 = vmatprep.subr.bf16.mxu1 %v2966_v13  ;;  %v2982_v13 = vld [vmem:[#allocation2 + $0xf8] sm:$0xff] }
 0x554   :  { %3105 = vmatpush1.bf16.msra.mxu1 %v2965_v58  ;;  %v2981_v58 = vld [vmem:[#allocation2 + $0xf0] sm:$0xff] }
 0x555   :  { %3106 = vmatprep.subr.bf16.mxu1 %v2968_v22  ;;  %v2984_v22 = vld [vmem:[#allocation2 + $0x108] sm:$0xff] }
 0x558   :  { %3107 = vmatpush1.bf16.msra.mxu1 %v2967_v28  ;;  %v5619_v28 = vld [vmem:[#allocation57_spill] sm:$0xff] }
 0x559   :  { %3108 = vmatprep.subr.bf16.mxu1 %v2970_v21  ;;  %v5620_v21 = vld [vmem:[#allocation55_spill] sm:$0xff] }
 0x55c   :  { %3109 = vmatpush1.bf16.msra.mxu1 %v2969_v41  ;;  %v3759_v41 = vcombine.low %v5620_v21, %v5619_v28  ;;  %v2990_v21 = vld [vmem:[#allocation2 + $0x138] sm:$0xff] }
 0x55d   :  { %3110 = vmatprep.subr.bf16.mxu1 %v2972_v20  ;;  %v5621_v20 = vld [vmem:[#allocation62_spill] sm:$0xff] }
 0x560   :  { %3111 = vmatpush1.bf16.msra.mxu1 %v2971_v7  ;;  %v5622_v7 = vld [vmem:[#allocation60_spill] sm:$0xff] }
 0x561   :  { %3112 = vmatprep.subr.bf16.mxu1 %v2974_v49  ;;  %v3764_v49 = vcombine.low %v5622_v7, %v5621_v20  ;;  %v5627_v20 = vld [vmem:[#allocation65_spill] sm:$0xff]  ;;  %v5628_v7 = vld [vmem:[#allocation63_spill] sm:$0xff] }
 0x564   :  { %3113 = vmatpush1.bf16.msra.mxu1 %v2973_v23  ;;  %v2983_v23 = vld [vmem:[#allocation2 + $0x100] sm:$0xff] }
 0x565   :  { %3114 = vmatprep.subr.bf16.mxu1 %v2976_v5  ;;  %v2986_v5 = vld [vmem:[#allocation2 + $0x118] sm:$0xff] }
 0x568   :  { %3115 = vmatpush1.bf16.msra.mxu1 %v2975_v37  ;;  %v2985_v37 = vld [vmem:[#allocation2 + $0x110] sm:$0xff] }
 0x569   :  { %3116 = vmatprep.subr.bf16.mxu1 %v2978_v35  ;;  %v2988_v35 = vld [vmem:[#allocation2 + $0x128] sm:$0xff] }
 0x56c   :  { %3117 = vmatpush1.bf16.msra.mxu1 %v2977_v54  ;;  %v5623_v54 = vld [vmem:[#allocation61_spill] sm:$0xff] }
 0x56d   :  { %3118 = vmatprep.subr.bf16.mxu1 %v2980_v14  ;;  %v5624_v14 = vld [vmem:[#allocation59_spill] sm:$0xff] }
 0x570   :  { %3119 = vmatpush1.bf16.msra.mxu1 %v2979_v24  ;;  %v3763_v24 = vcombine.low %v5624_v14, %v5623_v54  ;;  %v2994_v14 = vld [vmem:[#allocation2 + $0x158] sm:$0xff] }
 0x571   :  { %3120 = vmatprep.subr.bf16.mxu1 %v2982_v13  ;;  %v5625_v13 = vld [vmem:[#allocation66_spill] sm:$0xff] }
 0x572   :  { %v3768_v28 = vcombine.low %v5626_v55, %v5625_v13  ;;  %v2993_v55 = vld [vmem:[#allocation2 + $0x150] sm:$0xff]  ;;  %v5632_v13 = vld [vmem:[#allocation67_spill] sm:$0xff] }
 0x574   :  { %3121 = vmatpush1.bf16.msra.mxu1 %v2981_v58  ;;  %v2987_v58 = vld [vmem:[#allocation2 + $0x120] sm:$0xff] }
 0x575   :  { %3203 = vmatprep.subr.bf16.mxu1 %v2984_v22  ;;  %v2989_v22 = vld [vmem:[#allocation2 + $0x130] sm:$0xff] }
 0x577   :  { %3123 = vmatmul.mubr.bf16.vlgmr.msra.gmra.mrb[8].mxu1 %v3759_v41  ;;  %v2992_v41 = vld [vmem:[#allocation2 + $0x148] sm:$0xff] }
 0x578   :  { %3204 = vmatpush1.bf16.msra.mxu1 %v2983_v23  ;;  %3132 = vmatprep.mubr.bf16.mxu1 %v3764_v49  ;;  %v3767_v49 = vcombine.low %v5628_v7, %v5627_v20  ;;  %v5629_v23 = vld [vmem:[#allocation70_spill] sm:$0xff]  ;;  %v3000_v20 = vld [vmem:[#allocation2 + $0x188] sm:$0xff]  ;;  %v3775_v7 = vcombine.low %v5146_v46, %v5152_v52  ;;  %v3784_v46 = vcombine.low %v5173_v10, %v5179_v6  ;;  %v3009_v10 = vld [vmem:[#allocation2 + $0x1d0] sm:$0xff] }
 0x579   :  { %3205 = vmatprep.subr.bf16.mxu1 %v2986_v5  ;;  %v5630_v5 = vld [vmem:[#allocation68_spill] sm:$0xff]  ;;  %v3003_v52 = vld [vmem:[#allocation2 + $0x1a0] sm:$0xff]  ;;  %v3012_v6 = vld [vmem:[#allocation2 + $0x1e8] sm:$0xff] }
 0x57a   :  { %v3772_v54 = vcombine.low %v5630_v5, %v5629_v23  ;;  %v2999_v23 = vld [vmem:[#allocation2 + $0x180] sm:$0xff]  ;;  %v3002_v5 = vld [vmem:[#allocation2 + $0x198] sm:$0xff] }
 0x57c   :  { %3206 = vmatpush1.bf16.msra.mxu1 %v2985_v37  ;;  %v2991_v37 = vld [vmem:[#allocation2 + $0x140] sm:$0xff] }
 0x57d   :  { %3207 = vmatprep.subr.bf16.mxu1 %v2988_v35  ;;  %v2996_v35 = vld [vmem:[#allocation2 + $0x168] sm:$0xff] }
 0x57f   :  { %3133 = vmatmul.mubr.bf16.gmra.mrb[12].mxu1 %v3763_v24  ;;  %v5631_v24 = vld [vmem:[#allocation69_spill] sm:$0xff] }
 0x580   :  { %3208 = vmatpush1.bf16.msra.mxu1 %v2987_v58  ;;  %3142 = vmatprep.mubr.bf16.mxu1 %v3768_v28  ;;  %v3771_v28 = vcombine.low %v5632_v13, %v5631_v24  ;;  %v3776_v58 = vcombine.low %v5149_v26, %v5155_v33  ;;  %v3001_v26 = vld [vmem:[#allocation2 + $0x190] sm:$0xff]  ;;  %v3004_v33 = vld [vmem:[#allocation2 + $0x1a8] sm:$0xff]  ;;  %v3014_v24 = vld [vmem:[#allocation2 + $0x1f8] sm:$0xff]  ;;  %v3766_v13 = vcombine.low %v5280_v48, %v5283_v8 }
 0x581   :  { %3209 = vmatprep.subr.bf16.mxu1 %v2990_v21  ;;  %v2995_v21 = vld [vmem:[#allocation2 + $0x160] sm:$0xff]  ;;  %v5633_v48 = vld [vmem:[#allocation44_spill] sm:$0xff] }
 0x582   :  { %v3789_v8 = vcombine.low %v5633_v48, %v5343_v62 }
 0x584   :  { %3210 = vmatpush1.bf16.msra.mxu1 %v2989_v22  ;;  %v2998_v22 = vld [vmem:[#allocation2 + $0x178] sm:$0xff] }
 0x585   :  { %3211 = vmatprep.subr.bf16.mxu1 %v2992_v41  ;;  %v2997_v41 = vld [vmem:[#allocation2 + $0x170] sm:$0xff] }
 0x587   :  { %3143 = vmatmul.mubr.bf16.gmra.mrb[16].mxu1 %v3767_v49  ;;  %v3780_v49 = vcombine.low %v5161_v15, %v5167_v18  ;;  %v3005_v15 = vld [vmem:[#allocation2 + $0x1b0] sm:$0xff]  ;;  %v3008_v18 = vld [vmem:[#allocation2 + $0x1c8] sm:$0xff] }
 0x588   :  { %3212 = vmatpush1.bf16.msra.mxu1 %v2991_v37  ;;  %3152 = vmatprep.mubr.bf16.mxu1 %v3772_v54  ;;  %v3779_v54 = vcombine.low %v5158_v4, %v5164_v17  ;;  %v3006_v37 = vld [vmem:[#allocation2 + $0x1b8] sm:$0xff]  ;;  %v3788_v4 = vcombine.low %v5185_v29, %v5191_v2  ;;  %v3007_v17 = vld [vmem:[#allocation2 + $0x1c0] sm:$0xff]  ;;  %v3013_v29 = vld [vmem:[#allocation2 + $0x1f0] sm:$0xff]  ;;  %v3761_v2 = vcombine.low %v5234_v38, %v5237_v61 }
 0x589   :  { %3213 = vmatprep.subr.bf16.mxu1 %v2994_v14  ;;  %v3783_v14 = vcombine.low %v5170_v60, %v5176_v47  ;;  %v3762_v60 = vcombine.low %v5274_v32, %v5277_v59  ;;  %v3011_v47 = vld [vmem:[#allocation2 + $0x1e0] sm:$0xff]  ;;  %v3769_v32 = vcombine.low %v5246_v39, %v5249_v11  ;;  %v3774_v38 = vcombine.low %v5292_v63, %v5295_v25  ;;  %v5636_v25 = vld [vmem:[#allocation39_spill] sm:$0xff] }
 0x58a   :  { %v3773_v61 = vcombine.low %v5252_v43, %v5255_v53  ;;  %v3778_v59 = vcombine.low %v5370_v51, %v5373_v19  ;;  %v3781_v39 = vcombine.low %v5328_v44, %v5331_v9  ;;  %v3786_v11 = vcombine.low %v5382_v0, %v5385_v45 }
 0x58b   :  { %v3785_v43 = vcombine.low %v5334_v16, %v5337_v56  ;;  %v3790_v53 = vcombine.low %v5388_v1, %v5391_v50 }
 0x58c   :  { %3214 = vmatpush1.bf16.msra.mxu1 %v2993_v55  ;;  %v3010_v55 = vld [vmem:[#allocation2 + $0x1d8] sm:$0xff] }
 0x58d   :  { %3215 = vmatprep.subr.bf16.mxu1 %v2996_v35  ;;  %v3787_v35 = vcombine.low %v5182_v57, %v5188_v36  ;;  %v3765_v57 = vcombine.low %v5240_v3, %v5243_v27  ;;  %v3770_v36 = vcombine.low %v5286_v12, %v5289_v40  ;;  %v3777_v3 = vcombine.low %v5322_v42, %v5325_v31  ;;  %v5634_v12 = vld [vmem:[#allocation38_spill] sm:$0xff]  ;;  %v5635_v40 = vld [vmem:[#allocation35_spill] sm:$0xff] }
 0x58e   :  { %v3782_v27 = vcombine.low %v5376_v30, %v5379_v34  ;;  %v5459_v63 = vrot.slane %v5635_v40, %v5634_v12  ;;  %v5463_v42 = vrot.slane %v5635_v40, %v5636_v25 }
 0x58f   :  { %3153 = vmatmul.mubr.bf16.gmra.mrb[20].mxu1 %v3771_v28 }
 0x590   :  { %3216 = vmatpush1.bf16.msra.mxu1 %v2995_v21  ;;  %3162 = vmatprep.mubr.bf16.mxu1 %v3776_v58 }
 0x591   :  { %3217 = vmatprep.subr.bf16.mxu1 %v2998_v22 }
 0x594   :  { %3218 = vmatpush1.bf16.msra.mxu1 %v2997_v41 }
 0x595   :  { %3219 = vmatprep.subr.bf16.mxu1 %v3000_v20 }
 0x597   :  { %3163 = vmatmul.mubr.bf16.gmra.mrb[24].mxu1 %v3775_v7 }
 0x598   :  { %3220 = vmatpush1.bf16.msra.mxu1 %v2999_v23  ;;  %3172 = vmatprep.mubr.bf16.mxu1 %v3780_v49 }
 0x599   :  { %3221 = vmatprep.subr.bf16.mxu1 %v3002_v5 }
 0x59c   :  { %3222 = vmatpush1.bf16.msra.mxu1 %v3001_v26 }
 0x59d   :  { %3223 = vmatprep.subr.bf16.mxu1 %v3004_v33 }
 0x59f   :  { %3173 = vmatmul.mubr.bf16.gmra.mrb[28].mxu1 %v3779_v54 }
 0x5a0   :  { %3224 = vmatpush1.bf16.msra.mxu1 %v3003_v52  ;;  %3182 = vmatprep.mubr.bf16.mxu1 %v3784_v46 }
 0x5a1   :  { %3225 = vmatprep.subr.bf16.mxu1 %v3006_v37 }
 0x5a4   :  { %3226 = vmatpush1.bf16.msra.mxu1 %v3005_v15 }
 0x5a5   :  { %3227 = vmatprep.subr.bf16.mxu1 %v3008_v18 }
 0x5a7   :  { %3183 = vmatmul.mubr.bf16.gmra.mrb[32].mxu1 %v3783_v14 }
 0x5a8   :  { %3228 = vmatpush1.bf16.msra.mxu1 %v3007_v17  ;;  %3192 = vmatprep.mubr.bf16.mxu1 %v3788_v4 }
 0x5a9   :  { %3229 = vmatprep.subr.bf16.mxu1 %v3010_v55 }
 0x5ac   :  { %3230 = vmatpush1.bf16.msra.mxu1 %v3009_v10 }
 0x5ad   :  { %3231 = vmatprep.subr.bf16.mxu1 %v3012_v6 }
 0x5af   :  { %3193 = vmatmul.mubr.bf16.gmra.mrb[36].mxu1 %v3787_v35 }
 0x5b0   :  { %3232 = vmatpush1.bf16.msra.mxu1 %v3011_v47  ;;  %3235 = vmatprep.mubr.bf16.mxu1 %v3762_v60 }
 0x5b1   :  { %3233 = vmatprep.subr.bf16.mxu1 %v3014_v24 }
 0x5b4   :  { %3234 = vmatpush1.bf16.msra.mxu1 %v3013_v29 }
 0x5b7   :  { %3236 = vmatmul.mubr.bf16.vlgmr.msra.gmra.mrb[8].mxu1 %v3761_v2 }
 0x5b8   :  { %3245 = vmatprep.mubr.bf16.mxu1 %v3766_v13 }
 0x5bf   :  { %3246 = vmatmul.mubr.bf16.gmra.mrb[12].mxu1 %v3765_v57 }
 0x5c0   :  { %3255 = vmatprep.mubr.bf16.mxu1 %v3770_v36 }
 0x5c7   :  { %3256 = vmatmul.mubr.bf16.gmra.mrb[16].mxu1 %v3769_v32 }
 0x5c8   :  { %3265 = vmatprep.mubr.bf16.mxu1 %v3774_v38 }
 0x5cf   :  { %3266 = vmatmul.mubr.bf16.gmra.mrb[20].mxu1 %v3773_v61 }
 0x5d0   :  { %3275 = vmatprep.mubr.bf16.mxu1 %v3778_v59 }
 0x5d7   :  { %3276 = vmatmul.mubr.bf16.gmra.mrb[24].mxu1 %v3777_v3 }
 0x5d8   :  { %3285 = vmatprep.mubr.bf16.mxu1 %v3782_v27 }
 0x5df   :  { %3286 = vmatmul.mubr.bf16.gmra.mrb[28].mxu1 %v3781_v39 }
 0x5e0   :  { %3295 = vmatprep.mubr.bf16.mxu1 %v3786_v11 }
 0x5e7   :  { %3296 = vmatmul.mubr.bf16.gmra.mrb[32].mxu1 %v3785_v43 }
 0x5e8   :  { %3305 = vmatprep.mubr.bf16.mxu1 %v3790_v53 }
 0x5ef   :  { %3306 = vmatmul.mubr.bf16.gmra.mrb[36].mxu1 %v3789_v8 }
 0x68a   :  { %v3237_v31 = vpop.f32.mrb[8].mxu1 }
 0x68b   :  { %v3838_v44 = vadd.f32 %v3237_v31, %v5459_v63  ;;  %v3239_v9 = vpop.f32.mrb[9].mxu1 }
 0x68c   :  { %v3839_v16 = vadd.f32 %v3239_v9, %v5463_v42  ;;  %v3241_v56 = vpop.f32.mrb[10].mxu1 }
 0x68d   :  { %v3840_v51 = vadd.f32 %v3241_v56, %v5459_v63  ;;  %v3243_v19 = vpop.f32.mrb[11].mxu1  ;;  %v3316_v30 = vmax.f32 %v3838_v44, 0.0 }
 0x68e   :  { %v3841_v62 = vadd.f32 %v3243_v19, %v5463_v42  ;;  %v3317_v0 = vmax.f32 %v3839_v16, 0.0 }
 0x68f   :  { %v3318_v34 = vmax.f32 %v3840_v51, 0.0 }
 0x690   :  { %v3319_v45 = vmax.f32 %v3841_v62, 0.0 }
 0x691   :  { %v3348_v1 = vadd.f32 %v3318_v34, %v3316_v30 }
 0x692   :  { %v3361_v50 = vadd.f32 %v3319_v45, %v3317_v0  ;;  %v3247_v28 = vpop.f32.mrb[12].mxu1 }
 0x693   :  { %v3842_v58 = vadd.f32 %v3247_v28, %v5459_v63  ;;  %v3249_v21 = vpop.f32.mrb[13].mxu1 }
 0x694   :  { %v3843_v22 = vadd.f32 %v3249_v21, %v5463_v42  ;;  %v3251_v41 = vpop.f32.mrb[14].mxu1 }
 0x695   :  { %v3320_v20 = vmax.f32 %v3842_v58, 0.0  ;;  %v3844_v7 = vadd.f32 %v3251_v41, %v5459_v63  ;;  %v3253_v49 = vpop.f32.mrb[15].mxu1 }
 0x696   :  { %v3321_v23 = vmax.f32 %v3843_v22, 0.0  ;;  %v3845_v5 = vadd.f32 %v3253_v49, %v5463_v42 }
 0x697   :  { %v3349_v26 = vadd.f32 %v3348_v1, %v3320_v20  ;;  %v3322_v33 = vmax.f32 %v3844_v7, 0.0 }
 0x698   :  { %v3362_v54 = vadd.f32 %v3361_v50, %v3321_v23  ;;  %v3323_v46 = vmax.f32 %v3845_v5, 0.0 }
 0x699   :  { %v3350_v52 = vadd.f32 %v3349_v26, %v3322_v33 }
 0x69a   :  { %v3363_v37 = vadd.f32 %v3362_v54, %v3323_v46  ;;  %v3257_v15 = vpop.f32.mrb[16].mxu1 }
 0x69b   :  { %v3846_v18 = vadd.f32 %v3257_v15, %v5459_v63  ;;  %v3259_v14 = vpop.f32.mrb[17].mxu1 }
 0x69c   :  { %v3847_v4 = vadd.f32 %v3259_v14, %v5463_v42  ;;  %v3261_v17 = vpop.f32.mrb[18].mxu1 }
 0x69d   :  { %v3324_v55 = vmax.f32 %v3846_v18, 0.0  ;;  %v3848_v10 = vadd.f32 %v3261_v17, %v5459_v63  ;;  %v3263_v6 = vpop.f32.mrb[19].mxu1 }
 0x69e   :  { %v3325_v35 = vmax.f32 %v3847_v4, 0.0  ;;  %v3849_v60 = vadd.f32 %v3263_v6, %v5463_v42 }
 0x69f   :  { %v3351_v47 = vadd.f32 %v3350_v52, %v3324_v55  ;;  %v3326_v24 = vmax.f32 %v3848_v10, 0.0 }
 0x6a0   :  { %v3364_v29 = vadd.f32 %v3363_v37, %v3325_v35  ;;  %v3327_v2 = vmax.f32 %v3849_v60, 0.0 }
 0x6a1   :  { %v3352_v13 = vadd.f32 %v3351_v47, %v3326_v24 }
 0x6a2   :  { %v3365_v57 = vadd.f32 %v3364_v29, %v3327_v2  ;;  %v3267_v36 = vpop.f32.mrb[20].mxu1 }
 0x6a3   :  { %v3850_v32 = vadd.f32 %v3267_v36, %v5459_v63  ;;  %v3269_v38 = vpop.f32.mrb[21].mxu1 }
 0x6a4   :  { %v3851_v61 = vadd.f32 %v3269_v38, %v5463_v42  ;;  %v3271_v59 = vpop.f32.mrb[22].mxu1 }
 0x6a5   :  { %v3328_v3 = vmax.f32 %v3850_v32, 0.0  ;;  %v3852_v27 = vadd.f32 %v3271_v59, %v5459_v63  ;;  %v3273_v39 = vpop.f32.mrb[23].mxu1 }
 0x6a6   :  { %v3329_v11 = vmax.f32 %v3851_v61, 0.0  ;;  %v3853_v43 = vadd.f32 %v3273_v39, %v5463_v42 }
 0x6a7   :  { %v3353_v53 = vadd.f32 %v3352_v13, %v3328_v3  ;;  %v3330_v48 = vmax.f32 %v3852_v27, 0.0 }
 0x6a8   :  { %v3366_v8 = vadd.f32 %v3365_v57, %v3329_v11  ;;  %v3331_v40 = vmax.f32 %v3853_v43, 0.0 }
 0x6a9   :  { %v3354_v31 = vadd.f32 %v3353_v53, %v3330_v48 }
 0x6aa   :  { %v3367_v44 = vadd.f32 %v3366_v8, %v3331_v40  ;;  %v3277_v9 = vpop.f32.mrb[24].mxu1 }
 0x6ab   :  { %v3355_v16 = vrot.slane %v3354_v31, 4  ;;  %v3854_v56 = vadd.f32 %v3277_v9, %v5459_v63  ;;  %v3279_v51 = vpop.f32.mrb[25].mxu1 }
 0x6ac   :  { %v3368_v19 = vrot.slane %v3367_v44, 4  ;;  %v3855_v62 = vadd.f32 %v3279_v51, %v5463_v42  ;;  %v3281_v30 = vpop.f32.mrb[26].mxu1 }
 0x6ad   :  { %v3356_v34 = vadd.f32 %v3355_v16, %v3354_v31  ;;  %v3856_v0 = vadd.f32 %v3281_v30, %v5459_v63  ;;  %v3283_v45 = vpop.f32.mrb[27].mxu1  ;;  %v3332_v58 = vmax.f32 %v3854_v56, 0.0 }
 0x6ae   :  { %v3369_v1 = vadd.f32 %v3368_v19, %v3367_v44  ;;  %v3857_v50 = vadd.f32 %v3283_v45, %v5463_v42  ;;  %v3333_v41 = vmax.f32 %v3855_v62, 0.0 }
 0x6af   :  { %v3357_v28 = vrot.slane %v3356_v34, 2  ;;  %v3334_v21 = vmax.f32 %v3856_v0, 0.0 }
 0x6b0   :  { %v3370_v22 = vrot.slane %v3369_v1, 2  ;;  %v3335_v20 = vmax.f32 %v3857_v50, 0.0 }
 0x6b1   :  { %v3358_v7 = vadd.f32 %v3357_v28, %v3356_v34  ;;  %v3374_v49 = vadd.f32 %v3334_v21, %v3332_v58 }
 0x6b2   :  { %v3371_v23 = vadd.f32 %v3370_v22, %v3369_v1  ;;  %v3387_v5 = vadd.f32 %v3335_v20, %v3333_v41  ;;  %v3287_v26 = vpop.f32.mrb[28].mxu1 }
 0x6b3   :  { %v3359_v33 = vrot.slane %v3358_v7, 1  ;;  %v3858_v54 = vadd.f32 %v3287_v26, %v5459_v63  ;;  %v3289_v46 = vpop.f32.mrb[29].mxu1 }
 0x6b4   :  { %v3372_v52 = vrot.slane %v3371_v23, 1  ;;  %v3859_v37 = vadd.f32 %v3289_v46, %v5463_v42  ;;  %v3291_v15 = vpop.f32.mrb[30].mxu1 }
 0x6b5   :  { %v5487_v18 = vadd.f32 %v3359_v33, %v3358_v7  ;;  %v3336_v14 = vmax.f32 %v3858_v54, 0.0  ;;  %v3860_v4 = vadd.f32 %v3291_v15, %v5459_v63  ;;  %v3293_v17 = vpop.f32.mrb[31].mxu1 }
 0x6b6   :  { %v3373_v55 = vadd.f32 %v3372_v52, %v3371_v23  ;;  %v3337_v10 = vmax.f32 %v3859_v37, 0.0  ;;  %v3861_v6 = vadd.f32 %v3293_v17, %v5463_v42 }
 0x6b7   :  { %v3375_v35 = vadd.f32 %v3374_v49, %v3336_v14  ;;  %v3338_v60 = vmax.f32 %v3860_v4, 0.0 }
 0x6b8   :  { %v3388_v47 = vadd.f32 %v3387_v5, %v3337_v10  ;;  %v3339_v24 = vmax.f32 %v3861_v6, 0.0 }
 0x6b9   :  { %v3376_v29 = vadd.f32 %v3375_v35, %v3338_v60 }
 0x6ba   :  { %v3389_v2 = vadd.f32 %v3388_v47, %v3339_v24  ;;  %v3297_v13 = vpop.f32.mrb[32].mxu1 }
 0x6bb   :  { %v3862_v57 = vadd.f32 %v3297_v13, %v5459_v63  ;;  %v3299_v36 = vpop.f32.mrb[33].mxu1 }
 0x6bc   :  { %v3863_v32 = vadd.f32 %v3299_v36, %v5463_v42  ;;  %v3301_v38 = vpop.f32.mrb[34].mxu1 }
 0x6bd   :  { %v3340_v61 = vmax.f32 %v3862_v57, 0.0  ;;  %v3864_v59 = vadd.f32 %v3301_v38, %v5459_v63  ;;  %v3303_v3 = vpop.f32.mrb[35].mxu1 }
 0x6be   :  { %v3341_v27 = vmax.f32 %v3863_v32, 0.0  ;;  %v3865_v39 = vadd.f32 %v3303_v3, %v5463_v42 }
 0x6bf   :  { %v3377_v11 = vadd.f32 %v3376_v29, %v3340_v61  ;;  %v3342_v43 = vmax.f32 %v3864_v59, 0.0 }
 0x6c0   :  { %v3390_v53 = vadd.f32 %v3389_v2, %v3341_v27  ;;  %v3343_v48 = vmax.f32 %v3865_v39, 0.0 }
 0x6c1   :  { %v3378_v8 = vadd.f32 %v3377_v11, %v3342_v43 }
 0x6c2   :  { %v3391_v40 = vadd.f32 %v3390_v53, %v3343_v48  ;;  %v3307_v31 = vpop.f32.mrb[36].mxu1 }
 0x6c3   :  { %v3866_v44 = vadd.f32 %v3307_v31, %v5459_v63  ;;  %v3309_v9 = vpop.f32.mrb[37].mxu1 }
 0x6c4   :  { %v3867_v16 = vadd.f32 %v3309_v9, %v5463_v42  ;;  %v3311_v56 = vpop.f32.mrb[38].mxu1 }
 0x6c5   :  { %v3344_v51 = vmax.f32 %v3866_v44, 0.0  ;;  %v3868_v19 = vadd.f32 %v3311_v56, %v5459_v63  ;;  %v3313_v62 = vpop.f32.mrb[39].mxu1 }
 0x6c6   :  { %v3345_v30 = vmax.f32 %v3867_v16, 0.0  ;;  %v3869_v34 = vadd.f32 %v3313_v62, %v5463_v42 }
 0x6c7   :  { %v3379_v0 = vadd.f32 %v3378_v8, %v3344_v51  ;;  %v3346_v45 = vmax.f32 %v3868_v19, 0.0 }
 0x6c8   :  { %v3392_v1 = vadd.f32 %v3391_v40, %v3345_v30  ;;  %v3347_v50 = vmax.f32 %v3869_v34, 0.0 }
 0x6c9   :  { %v3380_v28 = vadd.f32 %v3379_v0, %v3346_v45 }
 0x6ca   :  { %v3393_v58 = vadd.f32 %v3392_v1, %v3347_v50 }
 0x6cb   :  { %v3381_v21 = vrot.slane %v3380_v28, 4 }
 0x6cc   :  { %v3394_v22 = vrot.slane %v3393_v58, 4 }
 0x6cd   :  { %v3382_v41 = vadd.f32 %v3381_v21, %v3380_v28 }
 0x6ce   :  { %v3395_v20 = vadd.f32 %v3394_v22, %v3393_v58 }
 0x6cf   :  { %v3383_v7 = vrot.slane %v3382_v41, 2 }
 0x6d0   :  { %v3396_v49 = vrot.slane %v3395_v20, 2 }
 0x6d1   :  { %v3384_v23 = vadd.f32 %v3383_v7, %v3382_v41 }
 0x6d2   :  { %v3397_v5 = vadd.f32 %v3396_v49, %v3395_v20 }
 0x6d3   :  { %v3385_v26 = vrot.slane %v3384_v23, 1 }
 0x6d4   :  { %v3398_v63 = vrot.slane %v3397_v5, 1 }
 0x6d5   :  { %v5499_v33 = vadd.f32 %v3385_v26, %v3384_v23 }
 0x6d6   :  { %v3399_v54 = vadd.f32 %v3398_v63, %v3397_v5 }
 0x6d7   :  { %4352 = dma.done.wait [#allocation5 + $0x1], 4096 }
 0x6d8   :  { %4353 = vsyncadd [#allocation5 + $0x1], 4294963200  ;;  %v3437_v42 = vpack.c.bf16 %v3373_v55, %v3373_v55  ;;  %v3439_v46 = vpack.c.bf16 %v3399_v54, %v3399_v54  ;;  %vm3459_vm4 = vcmask 1041409   ;;  %v3405_v4 = vld [vmem:[#allocation3 + $0x8] sm:$0xff]  ;;  %v3404_v17 = vld [vmem:[#allocation3] sm:$0xff]  ;;  %v3436_v31 = vpack.c.bf16 %v5487_v18, %v5487_v18 }
 0x6d9   :  { %v3407_v10 = vld [vmem:[#allocation3 + $0x18] sm:$0xff]  ;;  %3466 = vmatprep.subr.bf16.mxu0 %v3405_v4  ;;  %v3406_v6 = vld [vmem:[#allocation3 + $0x10] sm:$0xff]  ;;  %v3409_v35 = vld [vmem:[#allocation3 + $0x28] sm:$0xff]  ;;  %v3438_v44 = vpack.c.bf16 %v5499_v33, %v5499_v33 }
 0x6da   :  { %v3456_v52 = vunpack.c.l.b16 %v3437_v42  ;;  %v3458_v37 = vunpack.c.l.b16 %v3439_v46  ;;  %3467 = vmatpush1.bf16.msra.mxu0 %v3404_v17  ;;  %v3408_v60 = vld [vmem:[#allocation3 + $0x20] sm:$0xff]  ;;  %v3411_v55 = vld [vmem:[#allocation3 + $0x38] sm:$0xff]  ;;  %v3410_v47 = vld [vmem:[#allocation3 + $0x30] sm:$0xff]  ;;  %v3455_v56 = vunpack.c.l.b16 %v3436_v31 }
 0x6db   :  { %3468 = vmatprep.subr.bf16.mxu0 %v3407_v10  ;;  %v3413_v24 = vld [vmem:[#allocation3 + $0x48] sm:$0xff]  ;;  %v3412_v29 = vld [vmem:[#allocation3 + $0x40] sm:$0xff]  ;;  %v3415_v2 = vld [vmem:[#allocation3 + $0x58] sm:$0xff]  ;;  %v3457_v51 = vunpack.c.l.b16 %v3438_v44 }
 0x6dc   :  { %v3461_v15 = vsel %vm3459_vm4, %v3458_v37, %v3456_v52  ;;  %v3414_v13 = vld [vmem:[#allocation3 + $0x50] sm:$0xff]  ;;  %v3417_v57 = vld [vmem:[#allocation3 + $0x68] sm:$0xff]  ;;  %v3416_v36 = vld [vmem:[#allocation3 + $0x60] sm:$0xff] }
 0x6dd   :  { %v3463_v14 = vpack.c.b16 %v3461_v15, %v3461_v15  ;;  %v3419_v32 = vld [vmem:[#allocation3 + $0x78] sm:$0xff]  ;;  %v3418_v38 = vld [vmem:[#allocation3 + $0x70] sm:$0xff]  ;;  %v3421_v61 = vld [vmem:[#allocation3 + $0x88] sm:$0xff]  ;;  %v3460_v30 = vsel %vm3459_vm4, %v3457_v51, %v3455_v56 }
 0x6de   :  { %3469 = vmatpush1.bf16.msra.mxu0 %v3406_v6  ;;  %v3420_v59 = vld [vmem:[#allocation3 + $0x80] sm:$0xff]  ;;  %v3423_v3 = vld [vmem:[#allocation3 + $0x98] sm:$0xff]  ;;  %v3422_v27 = vld [vmem:[#allocation3 + $0x90] sm:$0xff]  ;;  %v3462_v0 = vpack.c.b16 %v3460_v30, %v3460_v30 }
 0x6df   :  { %3498 = vmatprep.mubr.bf16.mxu0 %v3463_v14  ;;  %3470 = vmatprep.subr.bf16.mxu0 %v3409_v35  ;;  %v3425_v39 = vld [vmem:[#allocation3 + $0xa8] sm:$0xff]  ;;  %v3424_v11 = vld [vmem:[#allocation3 + $0xa0] sm:$0xff]  ;;  %v3427_v43 = vld [vmem:[#allocation3 + $0xb8] sm:$0xff] }
 0x6e0   :  { %v3426_v53 = vld [vmem:[#allocation3 + $0xb0] sm:$0xff]  ;;  %v3429_v48 = vld [vmem:[#allocation3 + $0xc8] sm:$0xff]  ;;  %v3428_v8 = vld [vmem:[#allocation3 + $0xc0] sm:$0xff] }
 0x6e1   :  { %v3431_v40 = vld [vmem:[#allocation3 + $0xd8] sm:$0xff]  ;;  %v3430_v9 = vld [vmem:[#allocation3 + $0xd0] sm:$0xff]  ;;  %v3433_v16 = vld [vmem:[#allocation3 + $0xe8] sm:$0xff] }
 0x6e2   :  { %3471 = vmatpush1.bf16.msra.mxu0 %v3408_v60  ;;  %v3432_v19 = vld [vmem:[#allocation3 + $0xe0] sm:$0xff]  ;;  %v3435_v62 = vld [vmem:[#allocation3 + $0xf8] sm:$0xff]  ;;  %v3434_v34 = vld [vmem:[#allocation3 + $0xf0] sm:$0xff] }
 0x6e3   :  { %3472 = vmatprep.subr.bf16.mxu0 %v3411_v55  ;;  %v5637_v18 = vld [vmem:[#allocation36_spill] sm:$0xff] }
 0x6e4   :  { %v3444_v45 = vrot.slane %v5637_v18, %v5634_v12  ;;  %v3448_v1 = vrot.slane %v5637_v18, %v5636_v25 }
 0x6e6   :  { %3473 = vmatpush1.bf16.msra.mxu0 %v3410_v47 }
 0x6e7   :  { %3474 = vmatprep.subr.bf16.mxu0 %v3413_v24 }
 0x6ea   :  { %3475 = vmatpush1.bf16.msra.mxu0 %v3412_v29 }
 0x6eb   :  { %3476 = vmatprep.subr.bf16.mxu0 %v3415_v2 }
 0x6ee   :  { %3477 = vmatpush1.bf16.msra.mxu0 %v3414_v13 }
 0x6ef   :  { %3478 = vmatprep.subr.bf16.mxu0 %v3417_v57 }
 0x6f2   :  { %3479 = vmatpush1.bf16.msra.mxu0 %v3416_v36 }
 0x6f3   :  { %3480 = vmatprep.subr.bf16.mxu0 %v3419_v32 }
 0x6f6   :  { %3481 = vmatpush1.bf16.msra.mxu0 %v3418_v38 }
 0x6f7   :  { %3482 = vmatprep.subr.bf16.mxu0 %v3421_v61 }
 0x6fa   :  { %3483 = vmatpush1.bf16.msra.mxu0 %v3420_v59 }
 0x6fb   :  { %3484 = vmatprep.subr.bf16.mxu0 %v3423_v3 }
 0x6fe   :  { %3485 = vmatpush1.bf16.msra.mxu0 %v3422_v27 }
 0x6ff   :  { %3486 = vmatprep.subr.bf16.mxu0 %v3425_v39 }
 0x702   :  { %3487 = vmatpush1.bf16.msra.mxu0 %v3424_v11 }
 0x703   :  { %3488 = vmatprep.subr.bf16.mxu0 %v3427_v43 }
 0x706   :  { %3489 = vmatpush1.bf16.msra.mxu0 %v3426_v53 }
 0x707   :  { %3490 = vmatprep.subr.bf16.mxu0 %v3429_v48 }
 0x70a   :  { %3491 = vmatpush1.bf16.msra.mxu0 %v3428_v8 }
 0x70b   :  { %3492 = vmatprep.subr.bf16.mxu0 %v3431_v40 }
 0x70e   :  { %3493 = vmatpush1.bf16.msra.mxu0 %v3430_v9 }
 0x70f   :  { %3494 = vmatprep.subr.bf16.mxu0 %v3433_v16 }
 0x712   :  { %3495 = vmatpush1.bf16.msra.mxu0 %v3432_v19 }
 0x713   :  { %3496 = vmatprep.subr.bf16.mxu0 %v3435_v62 }
 0x716   :  { %3497 = vmatpush1.bf16.msra.mxu0 %v3434_v34 }
 0x719   :  { %3499 = vmatmul.mubr.bf16.vlgmr.msra.gmra.mrb[20].mxu0 %v3462_v0 }
 0x7ec   :  { %v3500_v50 = vpop.f32.mrb[20].mxu0 }
 0x7ed   :  { %v3501_v28 = vadd.f32 %v3500_v50, %v3444_v45  ;;  %v3502_v58 = vpop.f32.mrb[21].mxu0 }
 0x7ee   :  { %v3503_v21 = vadd.f32 %v3502_v58, %v3448_v1  ;;  %v3504_v22 = vpop.f32.mrb[22].mxu0 }
 0x7ef   :  { %v3507_v41 = vmax.f32 %v3501_v28, 0.0  ;;  %v3505_v20 = vpop.f32.mrb[23].mxu0 }
 0x7f0   :  { %v3508_v7 = vmax.f32 %v3503_v21, 0.0 }
 0x7f1   :  { %4354 = dma.done.wait [#allocation5 + $0x2], 2048 }
 0x7f2   :  { %4355 = vsyncadd [#allocation5 + $0x2], 4294965248  ;;  %v3529_v49 = vpack.c.bf16 %v3508_v7, %v3508_v7  ;;  %v3520_v23 = vld [vmem:[#allocation4 + $0x40] sm:$0xff]  ;;  %v3521_v26 = vld [vmem:[#allocation4 + $0x48] sm:$0xff]  ;;  %v3528_v10 = vpack.c.bf16 %v3507_v41, %v3507_v41  ;;  %s4383_s8 = smov [#allocation18]   ;;  %vm3570_vm5 = vcmask 1041408  }
 0x7f3   :  { %v3512_v5 = vld [vmem:[#allocation4] sm:$0xff]  ;;  %3816 = vmatprep.subr.bf16.mxu0 %v3520_v23  ;;  %v3513_v12 = vld [vmem:[#allocation4 + $0x8] sm:$0xff]  ;;  %v3522_v25 = vld [vmem:[#allocation4 + $0x50] sm:$0xff]  ;;  %s3579_s30 = sshll.u32 %s4383_s8, 4  ;;  %s3580_s30 = int_to_ptr.vmem [resolvable:$true] %s3579_s30 }
 0x7f4   :  { %3562 = vmatprep.mubr.bf16.mxu0 %v3529_v49  ;;  %3817 = vmatpush3.bf16.msra.mxu0 %v3512_v5  ;;  %v3514_v63 = vld [vmem:[#allocation4 + $0x10] sm:$0xff]  ;;  %v3523_v33 = vld [vmem:[#allocation4 + $0x58] sm:$0xff]  ;;  %v3524_v42 = vld [vmem:[#allocation4 + $0x60] sm:$0xff]  ;;  %s4320_s5 = scalar_lea.vmem %s3580_s30, 128  ;;  %p4325_p9 = scmp.lt.s32.totalorder %s3580_s30, %s3580_s30 }
 0x7f5   :  { %3818 = vmatprep.subr.bf16.mxu0 %v3521_v26  ;;  %v3515_v54 = vld [vmem:[#allocation4 + $0x18] sm:$0xff]  ;;  %v3516_v46 = vld [vmem:[#allocation4 + $0x20] sm:$0xff]  ;;  %v3525_v52 = vld [vmem:[#allocation4 + $0x68] sm:$0xff]  ;;  %p4321_p8 = scmp.ne.s32.totalorder %s3580_s30, %s4320_s5  ;;  %p4326_p10 = scmp.lt.s32.totalorder %s4320_s5, %s4320_s5 }
 0x7f6   :  { %v3517_v37 = vld [vmem:[#allocation4 + $0x28] sm:$0xff]  ;;  %v3526_v15 = vld [vmem:[#allocation4 + $0x70] sm:$0xff]  ;;  %v3527_v4 = vld [vmem:[#allocation4 + $0x78] sm:$0xff] }
 0x7f7   :  { %v3518_v14 = vld [vmem:[#allocation4 + $0x30] sm:$0xff]  ;;  %v3519_v17 = vld [vmem:[#allocation4 + $0x38] sm:$0xff]  ;;  %p4327_p11 = por %p4326_p10, %p4325_p9 }
 0x7f8   :  { %3819 = vmatpush3.bf16.msra.mxu0 %v3513_v12  ;;  %v5638_v24 = vld [vmem:[#allocation37_spill] sm:$0xff] }
 0x7f9   :  { %3820 = vmatprep.subr.bf16.mxu0 %v3522_v25  ;;  %p4328_p12 = pnand %p4327_p11, %p4321_p8 }
 0x7fc   :  { %3821 = vmatpush3.bf16.msra.mxu0 %v3514_v63 }
 0x7fd   :  { %3822 = vmatprep.subr.bf16.mxu0 %v3523_v33 }
 0x800   :  { %3823 = vmatpush3.bf16.msra.mxu0 %v3515_v54 }
 0x801   :  { %3824 = vmatprep.subr.bf16.mxu0 %v3524_v42 }
 0x804   :  { %3825 = vmatpush3.bf16.msra.mxu0 %v3516_v46 }
 0x805   :  { %3826 = vmatprep.subr.bf16.mxu0 %v3525_v52 }
 0x808   :  { %3827 = vmatpush3.bf16.msra.mxu0 %v3517_v37 }
 0x809   :  { %3828 = vmatprep.subr.bf16.mxu0 %v3526_v15 }
 0x80c   :  { %3829 = vmatpush3.bf16.msra.mxu0 %v3518_v14 }
 0x80d   :  { %3830 = vmatprep.subr.bf16.mxu0 %v3527_v4 }
 0x810   :  { %3831 = vmatpush3.bf16.msra.mxu0 %v3519_v17 }
 0x813   :  { %3563 = vmatmul.mubr.bf16.vlgmr.msra.gmra.mrb[24].mxu0 %v3528_v10 }
 0x8e6   :  { %v3832_v6 = vpop.f32.mrb[24].mxu0 }
 0x8e7   :  { %v3833_v35 = vpop.f32.mrb[25].mxu0 }
 0x8e8   :  { %v3834_v60 = vadd.f32 %v3833_v35, %v3832_v6  ;;  %v3835_v55 = vpop.f32.mrb[26].mxu0 }
 0x8e9   :  { %v3836_v47 = vpop.f32.mrb[27].mxu0 }
 0x8ea   :  { %v3565_v29 = vadd.f32 %v3834_v60, %v5638_v24 }
 0x8ec   :  { %v3571_v2 = vsel %vm3570_vm5, %v3565_v29, 0.0 }
 0x8ed   :  { %3572 = vst [vmem:[#allocation18] sm:$0xff] %v3571_v2 }
 0x8ee   :  { %4331 = shalt.err (!%p4328_p12)
}
 0x8ef   :  { %s4332_s9 = scalar_lea.hbm %s5534_s10, 128 }
 0x8f0   :  { %p4333_p13 = scmp.ne.s32.totalorder %s5534_s10, %s4332_s9  ;;  %p4336_p0 = scmp.lt.u32.totalorder %s4332_s9, %s5534_s10 }
 0x8f2   :  { %p4338_p1 = pnand %p4336_p0, %p4333_p13 }
 0x8f4   :  { %4341 = shalt.err (!%p4338_p1)
}
 0x8f5   :  { %3582 = dma.vmem_to_hbm [thread:$0]  %s3580_s30, 128, %s5534_s10, [#allocation8]  }
 0x8f6   :  { %4356 = dma.done.wait [#allocation8], 128  }
 0x8f7   :  { %4357 = vsyncadd [#allocation8], 4294967168 }
 0x8f8   :  { %3586 = vsyncpa [#allocation7], 1 }
 0x8f9   :  { %3587 = vsyncpa [#allocation10], 1 }
 0x8fa   :  { %3588 = vsyncpa [#allocation13], 1 }
 0x8fb   :  { %3589 = vsyncpa [#allocation16], 1 }
 0x8fc   :  { %3590 = vsyncpa [#allocation8], 1 }
 0x8fd   :  { %3591 = vsyncmov [#allocation5] }
 0x900   :  { %s3592_s18 = vpop.sfrf %3591 }
 0x901   :  { %p3791_p2 = scmp.ne.s32.totalorder %s3592_s18, 0 }
 0x903   :  { %3596 = shalt.err (%p3791_p2)  }
 0x904   :  { %3598 = vsyncmov [#allocation5 + $0x1] }
 0x907   :  { %s3599_s19 = vpop.sfrf %3598 }
 0x908   :  { %p3792_p3 = scmp.ne.s32.totalorder %s3599_s19, 0 }
 0x90a   :  { %3603 = shalt.err (%p3792_p3)  }
 0x90b   :  { %3605 = vsyncmov [#allocation5 + $0x2] }
 0x90e   :  { %s3606_s6 = vpop.sfrf %3605 }
 0x90f   :  { %p3793_p4 = scmp.ne.s32.totalorder %s3606_s6, 0 }
 0x911   :  { %3610 = shalt.err (%p3793_p4)  }

</bundles_post_ra>
